<compile_context>
chip_gen: v7x
topology: tpu7x:2x2x1
jax: 0.10.0
libtpu: 0.0.40
codegen_flags: <defaults>
</compile_context>

<pallas_src>
import functools
import math

import jax
import jax.numpy as jnp
from jax.experimental import pallas as pl
from jax.experimental.pallas import tpu as pltpu


# ----------------------------------------------------------------------------
# In-kernel helpers (operate on jnp values already loaded from VMEM refs)
# ----------------------------------------------------------------------------

_LN_EPS = 1e-5                              # PyTorch nn.LayerNorm default
_TRANS_B = (((1,), (1,)), ((), ()))         # dot_general: contract last dims (q @ k^T, no transpose)


def _layernorm(s, gamma, beta):
    """LayerNorm over the last dim (biased variance, matches nn.LayerNorm in eval)."""
    mu = jnp.mean(s, axis=-1, keepdims=True)
    var = jnp.mean(jnp.square(s - mu), axis=-1, keepdims=True)
    return (s - mu) * jax.lax.rsqrt(var + _LN_EPS) * gamma + beta


def _self_attention(x2d, wqkv, bqkv, neg_bias, n_head):
    """Multi-head self-attention on the batch-merged activation.

    x2d:      (B*S, D)   activation, rows are batch-major tokens
    wqkv:     (D, 3D)    fused [Q|K|V] weight; Q columns pre-scaled by 1/sqrt(Dh)
    bqkv:     (1, 3D)    fused bias (Q part pre-scaled)
    neg_bias: (B*S, B*S) 0 within a batch, -1e9 across batches -> per-batch softmax
    """
    BS, D = x2d.shape
    Dh = D // n_head
    qkv = jnp.dot(x2d, wqkv, preferred_element_type=jnp.float32) + bqkv   # one MXU matmul

    # Heads stay a small static loop of 2-D matmuls: at Dh=8 a head-batched 4-D dot_general
    # needs lane-splitting reshapes / second-minor transposes that cost more than they save.
    # TODO(synk): switch to a head-batched dot_general at production head dims (Dh >= 128).
    head_outs = []
    for h in range(n_head):
        q = qkv[:, h * Dh:(h + 1) * Dh]
        k = qkv[:, D + h * Dh: D + (h + 1) * Dh]
        v = qkv[:, 2 * D + h * Dh: 2 * D + (h + 1) * Dh]
        s = jax.lax.dot_general(q, k, _TRANS_B, preferred_element_type=jnp.float32)
        s = s + neg_bias                                    # mask cross-batch attention
        m = jnp.max(s, axis=-1, keepdims=True)
        e = jnp.exp(s - m)
        p = e / jnp.sum(e, axis=-1, keepdims=True)          # exact divide (reference parity)
        head_outs.append(jnp.dot(p, v, preferred_element_type=jnp.float32))
    return jnp.concatenate(head_outs, axis=-1)              # (B*S, D), lane-dense


# ----------------------------------------------------------------------------
# The single fused whole-model kernel
# ----------------------------------------------------------------------------

def _transformer_kernel(y_ref, wpre_ref, peb_ref, nbias_ref,
                        wqkv1_ref, bqkv1_ref, wqkv2_ref, bqkv2_ref,
                        wff1_ref, bff1_ref, wff2_ref, bff2_ref,
                        lng_ref, lnb_ref, fng_ref, fnb_ref,
                        wpost_ref, bpost_ref,
                        out_ref, *, n_layers, n_head):
    neg_bias = nbias_ref[...]                               # (B*S, B*S) constant mask addend

    # PreLayer + PositionalEncoding (linear bias pre-folded into peb).
    x = jnp.dot(y_ref[...], wpre_ref[...], preferred_element_type=jnp.float32) + peb_ref[...]

    # Decoder stack, statically unrolled.  All weights resident in VMEM; the activation never
    # leaves VMEM between sub-layers.
    for l in range(n_layers):
        ln_g = lng_ref[l]          # (3, D): [norm1, norm2, norm3] gains
        ln_b = lnb_ref[l]          # (3, D): [norm1, norm2, norm3] biases

        a1 = _self_attention(x, wqkv1_ref[l], bqkv1_ref[l], neg_bias, n_head)
        x = _layernorm(x + a1, ln_g[0:1, :], ln_b[0:1, :])

        # Reference DecoderLayer: attn2 is self-attention on the decoder stream (memory unused).
        a2 = _self_attention(x, wqkv2_ref[l], bqkv2_ref[l], neg_bias, n_head)
        x = _layernorm(x + a2, ln_g[1:2, :], ln_b[1:2, :])

        h = jnp.dot(x, wff1_ref[l], preferred_element_type=jnp.float32) + bff1_ref[l]
        h = jnp.maximum(h, 0.0)
        f = jnp.dot(h, wff2_ref[l], preferred_element_type=jnp.float32) + bff2_ref[l]
        x = _layernorm(x + f, ln_g[2:3, :], ln_b[2:3, :])

    # Final decoder LayerNorm + fused PostLayer (D -> 1) as multiply + lane reduction.
    x = _layernorm(x, fng_ref[...], fnb_ref[...])
    out_ref[...] = jnp.sum(x * wpost_ref[...], axis=-1, keepdims=True) + bpost_ref[...]


# ----------------------------------------------------------------------------
# Wrapper
# ----------------------------------------------------------------------------

def transformer_forward(params, x, y, cfg):
    """Matches reference `Transformer.forward(x, y)`.

    The reference DecoderLayer never reads the encoder output (`memory`), so the encoder stack
    is dead code with respect to the returned value and is intentionally not executed.
    """
    del x  # encoder input has no effect on the output (see note above)
    B, S, in_dim = y.shape
    D = cfg["d_model"]
    L = cfg["N_dec"]
    H = cfg["h_dec"]
    dec = params["dec"]

    w_pre, b_pre = params["y_pre"]
    # Fold the PreLayer bias into the positional-encoding slab, tiled batch-major to (B*S, D).
    peb = jnp.tile(b_pre[None, :] + params["pe"][:S, :], (B, 1))

    # Block-diagonal additive mask keeping attention within each batch sample (jit constant).
    batch_ids = jnp.repeat(jnp.arange(B, dtype=jnp.int32), S)
    neg_bias = jnp.where(batch_ids[:, None] == batch_ids[None, :], 0.0, -1e9).astype(jnp.float32)

    vmem = pl.BlockSpec(memory_space=pltpu.MemorySpace.VMEM)
    operands = (
        y.reshape(B * S, in_dim), w_pre, peb, neg_bias,
        dec["wqkv1"], dec["bqkv1"], dec["wqkv2"], dec["bqkv2"],
        dec["wff1"], dec["bff1"], dec["wff2"], dec["bff2"],
        dec["lng"], dec["lnb"],
        params["dec_ng"].reshape(1, D), params["dec_nb"].reshape(1, D),
        params["post"][0].reshape(1, D), params["post"][1].reshape(1, 1),
    )
    kernel = functools.partial(_transformer_kernel, n_layers=L, n_head=H)
    out = pl.pallas_call(
        kernel,
        out_shape=jax.ShapeDtypeStruct((B * S, 1), jnp.float32),
        in_specs=[vmem] * len(operands),
        out_specs=vmem,
    )(*operands)
    return out.reshape(B, S)        # == PostLayer output .squeeze(-1)


# ----------------------------------------------------------------------------
# Deterministic parameter initialization (nn.Linear default scheme)
# ----------------------------------------------------------------------------

def positional_encoding(d_model, max_len=500):
    pos = jnp.arange(max_len, dtype=jnp.float32)[:, None]
    tmp = jnp.arange(0, d_model, 2, dtype=jnp.float32)
    den = 1.0 / jnp.power(jnp.float32(max_len), 2.0 * tmp / d_model)
    ang = pos * den[None, :]
    pe = jnp.zeros((max_len, d_model), jnp.float32)
    pe = pe.at[:, 0::2].set(jnp.sin(ang))
    pe = pe.at[:, 1::2].set(jnp.cos(ang))
    return pe


def _init_linear(key, in_dim, out_dim):
    k1, k2 = jax.random.split(key)
    bound = 1.0 / math.sqrt(in_dim)
    w = jax.random.uniform(k1, (in_dim, out_dim), jnp.float32, -bound, bound)
    b = jax.random.uniform(k2, (out_dim,), jnp.float32, -bound, bound)
    return w, b


def _init_fused_qkv(key, d_model, n_head):
    kq, kk, kv = jax.random.split(key, 3)
    wq, bq = _init_linear(kq, d_model, d_model)
    wk, bk = _init_linear(kk, d_model, d_model)
    wv, bv = _init_linear(kv, d_model, d_model)
    inv_scale = 1.0 / math.sqrt(float(d_model // n_head))   # reference: scale = sqrt(d_model // n_head)
    # Fold 1/scale into the Q projection (weight AND bias) -> no per-score multiply in-kernel.
    wqkv = jnp.concatenate([wq * inv_scale, wk, wv], axis=1)          # (D, 3D)
    bqkv = jnp.concatenate([bq * inv_scale, bk, bv], axis=0)          # (3D,)
    return wqkv, bqkv


def init_params(key, cfg):
    d, ffh = cfg["d_model"], cfg["ff_hidnum"]
    L, H = cfg["N_dec"], cfg["h_dec"]
    keys = jax.random.split(key, 3)
    params = {}
    params["y_pre"] = _init_linear(keys[0], cfg["in_dim_dec"], d)
    params["pe"] = positional_encoding(d, max_len=500)

    wqkv1, bqkv1, wqkv2, bqkv2 = [], [], [], []
    wff1, bff1, wff2, bff2, lng, lnb = [], [], [], [], [], []
    for lk in jax.random.split(keys[1], L):
        ka1, ka2, kf1, kf2 = jax.random.split(lk, 4)
        wa, ba = _init_fused_qkv(ka1, d, H)
        wqkv1.append(wa); bqkv1.append(ba.reshape(1, 3 * d))
        wa, ba = _init_fused_qkv(ka2, d, H)
        wqkv2.append(wa); bqkv2.append(ba.reshape(1, 3 * d))
        w1, b1 = _init_linear(kf1, d, ffh)
        w2, b2 = _init_linear(kf2, ffh, d)
        wff1.append(w1); bff1.append(b1.reshape(1, ffh))
        wff2.append(w2); bff2.append(b2.reshape(1, d))
        lng.append(jnp.ones((3, d), jnp.float32))    # [norm1, norm2, norm3] weights
        lnb.append(jnp.zeros((3, d), jnp.float32))   # [norm1, norm2, norm3] biases
    params["dec"] = dict(
        wqkv1=jnp.stack(wqkv1), bqkv1=jnp.stack(bqkv1),
        wqkv2=jnp.stack(wqkv2), bqkv2=jnp.stack(bqkv2),
        wff1=jnp.stack(wff1), bff1=jnp.stack(bff1),
        wff2=jnp.stack(wff2), bff2=jnp.stack(bff2),
        lng=jnp.stack(lng), lnb=jnp.stack(lnb),
    )
    params["dec_ng"] = jnp.ones((d,), jnp.float32)
    params["dec_nb"] = jnp.zeros((d,), jnp.float32)
    params["post"] = _init_linear(keys[2], d, 1)
    # Encoder parameters intentionally not created: the reference decoder ignores `memory`,
    # so the encoder cannot affect the output (dead code removed per perf review).
    return params


# ----------------------------------------------------------------------------
# Demo
# ----------------------------------------------------------------------------

if __name__ == "__main__":
    cfg = dict(
        d_model=32, in_dim_enc=4, in_dim_dec=4,
        N_enc=2, N_dec=2, h_enc=4, h_dec=4, ff_hidnum=64,
    )
    B, Sx, Sy = 2, 8, 8

    key = jax.random.PRNGKey(0)
    kx, ky, kp = jax.random.split(key, 3)
    x = jax.random.normal(kx, (B, Sx, cfg["in_dim_enc"]), jnp.float32)
    y = jax.random.normal(ky, (B, Sy, cfg["in_dim_dec"]), jnp.float32)
    params = init_params(kp, cfg)

    fwd = jax.jit(functools.partial(transformer_forward, cfg=cfg))
    out = jax.block_until_ready(fwd(params, x, y))

    assert out.shape == (B, Sy), out.shape
    assert bool(jnp.all(jnp.isfinite(out)))
    print("KERNEL_OK")
</pallas_src>

<mosaic_0001>
module attributes {stable_mosaic.version = 11 : i64} {
  func.func @_transformer_kernel(%arg0: memref<16x4xf32, #tpu.memory_space<vmem>>, %arg1: memref<4x32xf32, #tpu.memory_space<vmem>>, %arg2: memref<16x32xf32, #tpu.memory_space<vmem>>, %arg3: memref<16x16xf32, #tpu.memory_space<vmem>>, %arg4: memref<2x32x96xf32, #tpu.memory_space<vmem>>, %arg5: memref<2x1x96xf32, #tpu.memory_space<vmem>>, %arg6: memref<2x32x96xf32, #tpu.memory_space<vmem>>, %arg7: memref<2x1x96xf32, #tpu.memory_space<vmem>>, %arg8: memref<2x32x64xf32, #tpu.memory_space<vmem>>, %arg9: memref<2x1x64xf32, #tpu.memory_space<vmem>>, %arg10: memref<2x64x32xf32, #tpu.memory_space<vmem>>, %arg11: memref<2x1x32xf32, #tpu.memory_space<vmem>>, %arg12: memref<2x3x32xf32, #tpu.memory_space<vmem>>, %arg13: memref<2x3x32xf32, #tpu.memory_space<vmem>>, %arg14: memref<1x32xf32, #tpu.memory_space<vmem>>, %arg15: memref<1x32xf32, #tpu.memory_space<vmem>>, %arg16: memref<1x32xf32, #tpu.memory_space<vmem>>, %arg17: memref<1x1xf32, #tpu.memory_space<vmem>>, %arg18: memref<16x1xf32, #tpu.memory_space<vmem>>) attributes {dimension_semantics = [], scalar_prefetch = 0 : i64, scratch_operands = 0 : i64, tpu.core_type = #tpu.core_type<tc>} {
    %c0 = arith.constant 0 : index
    %c0_0 = arith.constant 0 : index
    %0 = vector.load %arg3[%c0, %c0_0] : memref<16x16xf32, #tpu.memory_space<vmem>>, vector<16x16xf32>
    %c0_1 = arith.constant 0 : index
    %c0_2 = arith.constant 0 : index
    %1 = vector.load %arg0[%c0_1, %c0_2] : memref<16x4xf32, #tpu.memory_space<vmem>>, vector<16x4xf32>
    %c0_3 = arith.constant 0 : index
    %c0_4 = arith.constant 0 : index
    %2 = vector.load %arg1[%c0_3, %c0_4] : memref<4x32xf32, #tpu.memory_space<vmem>>, vector<4x32xf32>
    %cst = arith.constant dense<0.000000e+00> : vector<16x32xf32>
    %3 = tpu.matmul %1, %2, %cst {dimension_numbers = #tpu.dot_dimension_numbers<[1], [0], [0], [1], [0, 0, 1, 1], [], []>} : vector<16x4xf32>, vector<4x32xf32>, vector<16x32xf32> -> vector<16x32xf32>
    %c0_5 = arith.constant 0 : index
    %c0_6 = arith.constant 0 : index
    %4 = vector.load %arg2[%c0_5, %c0_6] : memref<16x32xf32, #tpu.memory_space<vmem>>, vector<16x32xf32>
    %5 = arith.addf %3, %4 : vector<16x32xf32>
    %c0_7 = arith.constant 0 : index
    %c0_8 = arith.constant 0 : index
    %c0_9 = arith.constant 0 : index
    %6 = vector.load %arg12[%c0_7, %c0_8, %c0_9] : memref<2x3x32xf32, #tpu.memory_space<vmem>>, vector<1x3x32xf32>
    %7 = vector.shape_cast %6 : vector<1x3x32xf32> to vector<3x32xf32>
    %c0_10 = arith.constant 0 : index
    %c0_11 = arith.constant 0 : index
    %c0_12 = arith.constant 0 : index
    %8 = vector.load %arg13[%c0_10, %c0_11, %c0_12] : memref<2x3x32xf32, #tpu.memory_space<vmem>>, vector<1x3x32xf32>
    %9 = vector.shape_cast %8 : vector<1x3x32xf32> to vector<3x32xf32>
    %c0_13 = arith.constant 0 : index
    %c0_14 = arith.constant 0 : index
    %c0_15 = arith.constant 0 : index
    %10 = vector.load %arg4[%c0_13, %c0_14, %c0_15] : memref<2x32x96xf32, #tpu.memory_space<vmem>>, vector<1x32x96xf32>
    %11 = vector.shape_cast %10 : vector<1x32x96xf32> to vector<32x96xf32>
    %c0_16 = arith.constant 0 : index
    %c0_17 = arith.constant 0 : index
    %c0_18 = arith.constant 0 : index
    %12 = vector.load %arg5[%c0_16, %c0_17, %c0_18] : memref<2x1x96xf32, #tpu.memory_space<vmem>>, vector<1x1x96xf32>
    %13 = vector.shape_cast %12 : vector<1x1x96xf32> to vector<1x96xf32>
    %cst_19 = arith.constant dense<0.000000e+00> : vector<16x96xf32>
    %14 = tpu.matmul %5, %11, %cst_19 {dimension_numbers = #tpu.dot_dimension_numbers<[1], [0], [0], [1], [0, 0, 1, 1], [], []>} : vector<16x32xf32>, vector<32x96xf32>, vector<16x96xf32> -> vector<16x96xf32>
    %15 = vector.broadcast %13 : vector<1x96xf32> to vector<16x96xf32>
    %16 = arith.addf %14, %15 : vector<16x96xf32>
    %17 = vector.extract_strided_slice %16 {offsets = [0, 0], sizes = [16, 8], strides = [1, 1]} : vector<16x96xf32> to vector<16x8xf32>
    %18 = vector.extract_strided_slice %16 {offsets = [0, 32], sizes = [16, 8], strides = [1, 1]} : vector<16x96xf32> to vector<16x8xf32>
    %19 = vector.extract_strided_slice %16 {offsets = [0, 64], sizes = [16, 8], strides = [1, 1]} : vector<16x96xf32> to vector<16x8xf32>
    %cst_20 = arith.constant dense<0.000000e+00> : vector<16x16xf32>
    %20 = tpu.matmul %17, %18, %cst_20 {dimension_numbers = #tpu.dot_dimension_numbers<[1], [1], [0], [0], [0, 0, 1, 0], [], []>} : vector<16x8xf32>, vector<16x8xf32>, vector<16x16xf32> -> vector<16x16xf32>
    %21 = arith.addf %20, %0 : vector<16x16xf32>
    %cst_21 = arith.constant dense<0xFF800000> : vector<16xf32>
    %22 = vector.multi_reduction <maximumf>, %21, %cst_21 [1] : vector<16x16xf32> to vector<16xf32>
    %23 = vector.shape_cast %22 : vector<16xf32> to vector<16x1xf32>
    %24 = vector.broadcast %23 : vector<16x1xf32> to vector<16x16xf32>
    %25 = arith.subf %21, %24 : vector<16x16xf32>
    %26 = math.exp %25 : vector<16x16xf32>
    %cst_22 = arith.constant dense<0.000000e+00> : vector<16xf32>
    %27 = vector.multi_reduction <add>, %26, %cst_22 [1] : vector<16x16xf32> to vector<16xf32>
    %28 = vector.shape_cast %27 : vector<16xf32> to vector<16x1xf32>
    %29 = vector.broadcast %28 : vector<16x1xf32> to vector<16x16xf32>
    %30 = arith.divf %26, %29 : vector<16x16xf32>
    %cst_23 = arith.constant dense<0.000000e+00> : vector<16x8xf32>
    %31 = tpu.matmul %30, %19, %cst_23 {dimension_numbers = #tpu.dot_dimension_numbers<[1], [0], [0], [1], [0, 0, 1, 1], [], []>} : vector<16x16xf32>, vector<16x8xf32>, vector<16x8xf32> -> vector<16x8xf32>
    %32 = vector.extract_strided_slice %16 {offsets = [0, 8], sizes = [16, 8], strides = [1, 1]} : vector<16x96xf32> to vector<16x8xf32>
    %33 = vector.extract_strided_slice %16 {offsets = [0, 40], sizes = [16, 8], strides = [1, 1]} : vector<16x96xf32> to vector<16x8xf32>
    %34 = vector.extract_strided_slice %16 {offsets = [0, 72], sizes = [16, 8], strides = [1, 1]} : vector<16x96xf32> to vector<16x8xf32>
    %cst_24 = arith.constant dense<0.000000e+00> : vector<16x16xf32>
    %35 = tpu.matmul %32, %33, %cst_24 {dimension_numbers = #tpu.dot_dimension_numbers<[1], [1], [0], [0], [0, 0, 1, 0], [], []>} : vector<16x8xf32>, vector<16x8xf32>, vector<16x16xf32> -> vector<16x16xf32>
    %36 = arith.addf %35, %0 : vector<16x16xf32>
    %cst_25 = arith.constant dense<0xFF800000> : vector<16xf32>
    %37 = vector.multi_reduction <maximumf>, %36, %cst_25 [1] : vector<16x16xf32> to vector<16xf32>
    %38 = vector.shape_cast %37 : vector<16xf32> to vector<16x1xf32>
    %39 = vector.broadcast %38 : vector<16x1xf32> to vector<16x16xf32>
    %40 = arith.subf %36, %39 : vector<16x16xf32>
    %41 = math.exp %40 : vector<16x16xf32>
    %cst_26 = arith.constant dense<0.000000e+00> : vector<16xf32>
    %42 = vector.multi_reduction <add>, %41, %cst_26 [1] : vector<16x16xf32> to vector<16xf32>
    %43 = vector.shape_cast %42 : vector<16xf32> to vector<16x1xf32>
    %44 = vector.broadcast %43 : vector<16x1xf32> to vector<16x16xf32>
    %45 = arith.divf %41, %44 : vector<16x16xf32>
    %cst_27 = arith.constant dense<0.000000e+00> : vector<16x8xf32>
    %46 = tpu.matmul %45, %34, %cst_27 {dimension_numbers = #tpu.dot_dimension_numbers<[1], [0], [0], [1], [0, 0, 1, 1], [], []>} : vector<16x16xf32>, vector<16x8xf32>, vector<16x8xf32> -> vector<16x8xf32>
    %47 = vector.extract_strided_slice %16 {offsets = [0, 16], sizes = [16, 8], strides = [1, 1]} : vector<16x96xf32> to vector<16x8xf32>
    %48 = vector.extract_strided_slice %16 {offsets = [0, 48], sizes = [16, 8], strides = [1, 1]} : vector<16x96xf32> to vector<16x8xf32>
    %49 = vector.extract_strided_slice %16 {offsets = [0, 80], sizes = [16, 8], strides = [1, 1]} : vector<16x96xf32> to vector<16x8xf32>
    %cst_28 = arith.constant dense<0.000000e+00> : vector<16x16xf32>
    %50 = tpu.matmul %47, %48, %cst_28 {dimension_numbers = #tpu.dot_dimension_numbers<[1], [1], [0], [0], [0, 0, 1, 0], [], []>} : vector<16x8xf32>, vector<16x8xf32>, vector<16x16xf32> -> vector<16x16xf32>
    %51 = arith.addf %50, %0 : vector<16x16xf32>
    %cst_29 = arith.constant dense<0xFF800000> : vector<16xf32>
    %52 = vector.multi_reduction <maximumf>, %51, %cst_29 [1] : vector<16x16xf32> to vector<16xf32>
    %53 = vector.shape_cast %52 : vector<16xf32> to vector<16x1xf32>
    %54 = vector.broadcast %53 : vector<16x1xf32> to vector<16x16xf32>
    %55 = arith.subf %51, %54 : vector<16x16xf32>
    %56 = math.exp %55 : vector<16x16xf32>
    %cst_30 = arith.constant dense<0.000000e+00> : vector<16xf32>
    %57 = vector.multi_reduction <add>, %56, %cst_30 [1] : vector<16x16xf32> to vector<16xf32>
    %58 = vector.shape_cast %57 : vector<16xf32> to vector<16x1xf32>
    %59 = vector.broadcast %58 : vector<16x1xf32> to vector<16x16xf32>
    %60 = arith.divf %56, %59 : vector<16x16xf32>
    %cst_31 = arith.constant dense<0.000000e+00> : vector<16x8xf32>
    %61 = tpu.matmul %60, %49, %cst_31 {dimension_numbers = #tpu.dot_dimension_numbers<[1], [0], [0], [1], [0, 0, 1, 1], [], []>} : vector<16x16xf32>, vector<16x8xf32>, vector<16x8xf32> -> vector<16x8xf32>
    %62 = vector.extract_strided_slice %16 {offsets = [0, 24], sizes = [16, 8], strides = [1, 1]} : vector<16x96xf32> to vector<16x8xf32>
    %63 = vector.extract_strided_slice %16 {offsets = [0, 56], sizes = [16, 8], strides = [1, 1]} : vector<16x96xf32> to vector<16x8xf32>
    %64 = vector.extract_strided_slice %16 {offsets = [0, 88], sizes = [16, 8], strides = [1, 1]} : vector<16x96xf32> to vector<16x8xf32>
    %cst_32 = arith.constant dense<0.000000e+00> : vector<16x16xf32>
    %65 = tpu.matmul %62, %63, %cst_32 {dimension_numbers = #tpu.dot_dimension_numbers<[1], [1], [0], [0], [0, 0, 1, 0], [], []>} : vector<16x8xf32>, vector<16x8xf32>, vector<16x16xf32> -> vector<16x16xf32>
    %66 = arith.addf %65, %0 : vector<16x16xf32>
    %cst_33 = arith.constant dense<0xFF800000> : vector<16xf32>
    %67 = vector.multi_reduction <maximumf>, %66, %cst_33 [1] : vector<16x16xf32> to vector<16xf32>
    %68 = vector.shape_cast %67 : vector<16xf32> to vector<16x1xf32>
    %69 = vector.broadcast %68 : vector<16x1xf32> to vector<16x16xf32>
    %70 = arith.subf %66, %69 : vector<16x16xf32>
    %71 = math.exp %70 : vector<16x16xf32>
    %cst_34 = arith.constant dense<0.000000e+00> : vector<16xf32>
    %72 = vector.multi_reduction <add>, %71, %cst_34 [1] : vector<16x16xf32> to vector<16xf32>
    %73 = vector.shape_cast %72 : vector<16xf32> to vector<16x1xf32>
    %74 = vector.broadcast %73 : vector<16x1xf32> to vector<16x16xf32>
    %75 = arith.divf %71, %74 : vector<16x16xf32>
    %cst_35 = arith.constant dense<0.000000e+00> : vector<16x8xf32>
    %76 = tpu.matmul %75, %64, %cst_35 {dimension_numbers = #tpu.dot_dimension_numbers<[1], [0], [0], [1], [0, 0, 1, 1], [], []>} : vector<16x16xf32>, vector<16x8xf32>, vector<16x8xf32> -> vector<16x8xf32>
    %77 = tpu.concatenate %31, %46, %61, %76 in 1 : vector<16x8xf32>, vector<16x8xf32>, vector<16x8xf32>, vector<16x8xf32> -> vector<16x32xf32>
    %78 = arith.addf %5, %77 : vector<16x32xf32>
    %79 = vector.extract_strided_slice %7 {offsets = [0, 0], sizes = [1, 32], strides = [1, 1]} : vector<3x32xf32> to vector<1x32xf32>
    %80 = vector.extract_strided_slice %9 {offsets = [0, 0], sizes = [1, 32], strides = [1, 1]} : vector<3x32xf32> to vector<1x32xf32>
    %cst_36 = arith.constant dense<0.000000e+00> : vector<16xf32>
    %81 = vector.multi_reduction <add>, %78, %cst_36 [1] : vector<16x32xf32> to vector<16xf32>
    %82 = vector.shape_cast %81 : vector<16xf32> to vector<16x1xf32>
    %cst_37 = arith.constant 3.200000e+01 : f32
    %83 = vector.broadcast %cst_37 : f32 to vector<16x1xf32>
    %84 = arith.divf %82, %83 : vector<16x1xf32>
    %85 = vector.broadcast %84 : vector<16x1xf32> to vector<16x32xf32>
    %86 = arith.subf %78, %85 : vector<16x32xf32>
    %87 = arith.mulf %86, %86 : vector<16x32xf32>
    %cst_38 = arith.constant dense<0.000000e+00> : vector<16xf32>
    %88 = vector.multi_reduction <add>, %87, %cst_38 [1] : vector<16x32xf32> to vector<16xf32>
    %89 = vector.shape_cast %88 : vector<16xf32> to vector<16x1xf32>
    %cst_39 = arith.constant 3.200000e+01 : f32
    %90 = vector.broadcast %cst_39 : f32 to vector<16x1xf32>
    %91 = arith.divf %89, %90 : vector<16x1xf32>
    %92 = vector.broadcast %84 : vector<16x1xf32> to vector<16x32xf32>
    %93 = arith.subf %78, %92 : vector<16x32xf32>
    %cst_40 = arith.constant 9.99999974E-6 : f32
    %94 = vector.broadcast %cst_40 : f32 to vector<16x1xf32>
    %95 = arith.addf %91, %94 : vector<16x1xf32>
    %96 = math.rsqrt %95 : vector<16x1xf32>
    %97 = vector.broadcast %96 : vector<16x1xf32> to vector<16x32xf32>
    %98 = arith.mulf %93, %97 : vector<16x32xf32>
    %99 = vector.broadcast %79 : vector<1x32xf32> to vector<16x32xf32>
    %100 = arith.mulf %98, %99 : vector<16x32xf32>
    %101 = vector.broadcast %80 : vector<1x32xf32> to vector<16x32xf32>
    %102 = arith.addf %100, %101 : vector<16x32xf32>
    %c0_41 = arith.constant 0 : index
    %c0_42 = arith.constant 0 : index
    %c0_43 = arith.constant 0 : index
    %103 = vector.load %arg6[%c0_41, %c0_42, %c0_43] : memref<2x32x96xf32, #tpu.memory_space<vmem>>, vector<1x32x96xf32>
    %104 = vector.shape_cast %103 : vector<1x32x96xf32> to vector<32x96xf32>
    %c0_44 = arith.constant 0 : index
    %c0_45 = arith.constant 0 : index
    %c0_46 = arith.constant 0 : index
    %105 = vector.load %arg7[%c0_44, %c0_45, %c0_46] : memref<2x1x96xf32, #tpu.memory_space<vmem>>, vector<1x1x96xf32>
    %106 = vector.shape_cast %105 : vector<1x1x96xf32> to vector<1x96xf32>
    %cst_47 = arith.constant dense<0.000000e+00> : vector<16x96xf32>
    %107 = tpu.matmul %102, %104, %cst_47 {dimension_numbers = #tpu.dot_dimension_numbers<[1], [0], [0], [1], [0, 0, 1, 1], [], []>} : vector<16x32xf32>, vector<32x96xf32>, vector<16x96xf32> -> vector<16x96xf32>
    %108 = vector.broadcast %106 : vector<1x96xf32> to vector<16x96xf32>
    %109 = arith.addf %107, %108 : vector<16x96xf32>
    %110 = vector.extract_strided_slice %109 {offsets = [0, 0], sizes = [16, 8], strides = [1, 1]} : vector<16x96xf32> to vector<16x8xf32>
    %111 = vector.extract_strided_slice %109 {offsets = [0, 32], sizes = [16, 8], strides = [1, 1]} : vector<16x96xf32> to vector<16x8xf32>
    %112 = vector.extract_strided_slice %109 {offsets = [0, 64], sizes = [16, 8], strides = [1, 1]} : vector<16x96xf32> to vector<16x8xf32>
    %cst_48 = arith.constant dense<0.000000e+00> : vector<16x16xf32>
    %113 = tpu.matmul %110, %111, %cst_48 {dimension_numbers = #tpu.dot_dimension_numbers<[1], [1], [0], [0], [0, 0, 1, 0], [], []>} : vector<16x8xf32>, vector<16x8xf32>, vector<16x16xf32> -> vector<16x16xf32>
    %114 = arith.addf %113, %0 : vector<16x16xf32>
    %cst_49 = arith.constant dense<0xFF800000> : vector<16xf32>
    %115 = vector.multi_reduction <maximumf>, %114, %cst_49 [1] : vector<16x16xf32> to vector<16xf32>
    %116 = vector.shape_cast %115 : vector<16xf32> to vector<16x1xf32>
    %117 = vector.broadcast %116 : vector<16x1xf32> to vector<16x16xf32>
    %118 = arith.subf %114, %117 : vector<16x16xf32>
    %119 = math.exp %118 : vector<16x16xf32>
    %cst_50 = arith.constant dense<0.000000e+00> : vector<16xf32>
    %120 = vector.multi_reduction <add>, %119, %cst_50 [1] : vector<16x16xf32> to vector<16xf32>
    %121 = vector.shape_cast %120 : vector<16xf32> to vector<16x1xf32>
    %122 = vector.broadcast %121 : vector<16x1xf32> to vector<16x16xf32>
    %123 = arith.divf %119, %122 : vector<16x16xf32>
    %cst_51 = arith.constant dense<0.000000e+00> : vector<16x8xf32>
    %124 = tpu.matmul %123, %112, %cst_51 {dimension_numbers = #tpu.dot_dimension_numbers<[1], [0], [0], [1], [0, 0, 1, 1], [], []>} : vector<16x16xf32>, vector<16x8xf32>, vector<16x8xf32> -> vector<16x8xf32>
    %125 = vector.extract_strided_slice %109 {offsets = [0, 8], sizes = [16, 8], strides = [1, 1]} : vector<16x96xf32> to vector<16x8xf32>
    %126 = vector.extract_strided_slice %109 {offsets = [0, 40], sizes = [16, 8], strides = [1, 1]} : vector<16x96xf32> to vector<16x8xf32>
    %127 = vector.extract_strided_slice %109 {offsets = [0, 72], sizes = [16, 8], strides = [1, 1]} : vector<16x96xf32> to vector<16x8xf32>
    %cst_52 = arith.constant dense<0.000000e+00> : vector<16x16xf32>
    %128 = tpu.matmul %125, %126, %cst_52 {dimension_numbers = #tpu.dot_dimension_numbers<[1], [1], [0], [0], [0, 0, 1, 0], [], []>} : vector<16x8xf32>, vector<16x8xf32>, vector<16x16xf32> -> vector<16x16xf32>
    %129 = arith.addf %128, %0 : vector<16x16xf32>
    %cst_53 = arith.constant dense<0xFF800000> : vector<16xf32>
    %130 = vector.multi_reduction <maximumf>, %129, %cst_53 [1] : vector<16x16xf32> to vector<16xf32>
    %131 = vector.shape_cast %130 : vector<16xf32> to vector<16x1xf32>
    %132 = vector.broadcast %131 : vector<16x1xf32> to vector<16x16xf32>
    %133 = arith.subf %129, %132 : vector<16x16xf32>
    %134 = math.exp %133 : vector<16x16xf32>
    %cst_54 = arith.constant dense<0.000000e+00> : vector<16xf32>
    %135 = vector.multi_reduction <add>, %134, %cst_54 [1] : vector<16x16xf32> to vector<16xf32>
    %136 = vector.shape_cast %135 : vector<16xf32> to vector<16x1xf32>
    %137 = vector.broadcast %136 : vector<16x1xf32> to vector<16x16xf32>
    %138 = arith.divf %134, %137 : vector<16x16xf32>
    %cst_55 = arith.constant dense<0.000000e+00> : vector<16x8xf32>
    %139 = tpu.matmul %138, %127, %cst_55 {dimension_numbers = #tpu.dot_dimension_numbers<[1], [0], [0], [1], [0, 0, 1, 1], [], []>} : vector<16x16xf32>, vector<16x8xf32>, vector<16x8xf32> -> vector<16x8xf32>
    %140 = vector.extract_strided_slice %109 {offsets = [0, 16], sizes = [16, 8], strides = [1, 1]} : vector<16x96xf32> to vector<16x8xf32>
    %141 = vector.extract_strided_slice %109 {offsets = [0, 48], sizes = [16, 8], strides = [1, 1]} : vector<16x96xf32> to vector<16x8xf32>
    %142 = vector.extract_strided_slice %109 {offsets = [0, 80], sizes = [16, 8], strides = [1, 1]} : vector<16x96xf32> to vector<16x8xf32>
    %cst_56 = arith.constant dense<0.000000e+00> : vector<16x16xf32>
    %143 = tpu.matmul %140, %141, %cst_56 {dimension_numbers = #tpu.dot_dimension_numbers<[1], [1], [0], [0], [0, 0, 1, 0], [], []>} : vector<16x8xf32>, vector<16x8xf32>, vector<16x16xf32> -> vector<16x16xf32>
    %144 = arith.addf %143, %0 : vector<16x16xf32>
    %cst_57 = arith.constant dense<0xFF800000> : vector<16xf32>
    %145 = vector.multi_reduction <maximumf>, %144, %cst_57 [1] : vector<16x16xf32> to vector<16xf32>
    %146 = vector.shape_cast %145 : vector<16xf32> to vector<16x1xf32>
    %147 = vector.broadcast %146 : vector<16x1xf32> to vector<16x16xf32>
    %148 = arith.subf %144, %147 : vector<16x16xf32>
    %149 = math.exp %148 : vector<16x16xf32>
    %cst_58 = arith.constant dense<0.000000e+00> : vector<16xf32>
    %150 = vector.multi_reduction <add>, %149, %cst_58 [1] : vector<16x16xf32> to vector<16xf32>
    %151 = vector.shape_cast %150 : vector<16xf32> to vector<16x1xf32>
    %152 = vector.broadcast %151 : vector<16x1xf32> to vector<16x16xf32>
    %153 = arith.divf %149, %152 : vector<16x16xf32>
    %cst_59 = arith.constant dense<0.000000e+00> : vector<16x8xf32>
    %154 = tpu.matmul %153, %142, %cst_59 {dimension_numbers = #tpu.dot_dimension_numbers<[1], [0], [0], [1], [0, 0, 1, 1], [], []>} : vector<16x16xf32>, vector<16x8xf32>, vector<16x8xf32> -> vector<16x8xf32>
    %155 = vector.extract_strided_slice %109 {offsets = [0, 24], sizes = [16, 8], strides = [1, 1]} : vector<16x96xf32> to vector<16x8xf32>
    %156 = vector.extract_strided_slice %109 {offsets = [0, 56], sizes = [16, 8], strides = [1, 1]} : vector<16x96xf32> to vector<16x8xf32>
    %157 = vector.extract_strided_slice %109 {offsets = [0, 88], sizes = [16, 8], strides = [1, 1]} : vector<16x96xf32> to vector<16x8xf32>
    %cst_60 = arith.constant dense<0.000000e+00> : vector<16x16xf32>
    %158 = tpu.matmul %155, %156, %cst_60 {dimension_numbers = #tpu.dot_dimension_numbers<[1], [1], [0], [0], [0, 0, 1, 0], [], []>} : vector<16x8xf32>, vector<16x8xf32>, vector<16x16xf32> -> vector<16x16xf32>
    %159 = arith.addf %158, %0 : vector<16x16xf32>
    %cst_61 = arith.constant dense<0xFF800000> : vector<16xf32>
    %160 = vector.multi_reduction <maximumf>, %159, %cst_61 [1] : vector<16x16xf32> to vector<16xf32>
    %161 = vector.shape_cast %160 : vector<16xf32> to vector<16x1xf32>
    %162 = vector.broadcast %161 : vector<16x1xf32> to vector<16x16xf32>
    %163 = arith.subf %159, %162 : vector<16x16xf32>
    %164 = math.exp %163 : vector<16x16xf32>
    %cst_62 = arith.constant dense<0.000000e+00> : vector<16xf32>
    %165 = vector.multi_reduction <add>, %164, %cst_62 [1] : vector<16x16xf32> to vector<16xf32>
    %166 = vector.shape_cast %165 : vector<16xf32> to vector<16x1xf32>
    %167 = vector.broadcast %166 : vector<16x1xf32> to vector<16x16xf32>
    %168 = arith.divf %164, %167 : vector<16x16xf32>
    %cst_63 = arith.constant dense<0.000000e+00> : vector<16x8xf32>
    %169 = tpu.matmul %168, %157, %cst_63 {dimension_numbers = #tpu.dot_dimension_numbers<[1], [0], [0], [1], [0, 0, 1, 1], [], []>} : vector<16x16xf32>, vector<16x8xf32>, vector<16x8xf32> -> vector<16x8xf32>
    %170 = tpu.concatenate %124, %139, %154, %169 in 1 : vector<16x8xf32>, vector<16x8xf32>, vector<16x8xf32>, vector<16x8xf32> -> vector<16x32xf32>
    %171 = arith.addf %102, %170 : vector<16x32xf32>
    %172 = vector.extract_strided_slice %7 {offsets = [1, 0], sizes = [1, 32], strides = [1, 1]} : vector<3x32xf32> to vector<1x32xf32>
    %173 = vector.extract_strided_slice %9 {offsets = [1, 0], sizes = [1, 32], strides = [1, 1]} : vector<3x32xf32> to vector<1x32xf32>
    %cst_64 = arith.constant dense<0.000000e+00> : vector<16xf32>
    %174 = vector.multi_reduction <add>, %171, %cst_64 [1] : vector<16x32xf32> to vector<16xf32>
    %175 = vector.shape_cast %174 : vector<16xf32> to vector<16x1xf32>
    %cst_65 = arith.constant 3.200000e+01 : f32
    %176 = vector.broadcast %cst_65 : f32 to vector<16x1xf32>
    %177 = arith.divf %175, %176 : vector<16x1xf32>
    %178 = vector.broadcast %177 : vector<16x1xf32> to vector<16x32xf32>
    %179 = arith.subf %171, %178 : vector<16x32xf32>
    %180 = arith.mulf %179, %179 : vector<16x32xf32>
    %cst_66 = arith.constant dense<0.000000e+00> : vector<16xf32>
    %181 = vector.multi_reduction <add>, %180, %cst_66 [1] : vector<16x32xf32> to vector<16xf32>
    %182 = vector.shape_cast %181 : vector<16xf32> to vector<16x1xf32>
    %cst_67 = arith.constant 3.200000e+01 : f32
    %183 = vector.broadcast %cst_67 : f32 to vector<16x1xf32>
    %184 = arith.divf %182, %183 : vector<16x1xf32>
    %185 = vector.broadcast %177 : vector<16x1xf32> to vector<16x32xf32>
    %186 = arith.subf %171, %185 : vector<16x32xf32>
    %cst_68 = arith.constant 9.99999974E-6 : f32
    %187 = vector.broadcast %cst_68 : f32 to vector<16x1xf32>
    %188 = arith.addf %184, %187 : vector<16x1xf32>
    %189 = math.rsqrt %188 : vector<16x1xf32>
    %190 = vector.broadcast %189 : vector<16x1xf32> to vector<16x32xf32>
    %191 = arith.mulf %186, %190 : vector<16x32xf32>
    %192 = vector.broadcast %172 : vector<1x32xf32> to vector<16x32xf32>
    %193 = arith.mulf %191, %192 : vector<16x32xf32>
    %194 = vector.broadcast %173 : vector<1x32xf32> to vector<16x32xf32>
    %195 = arith.addf %193, %194 : vector<16x32xf32>
    %c0_69 = arith.constant 0 : index
    %c0_70 = arith.constant 0 : index
    %c0_71 = arith.constant 0 : index
    %196 = vector.load %arg8[%c0_69, %c0_70, %c0_71] : memref<2x32x64xf32, #tpu.memory_space<vmem>>, vector<1x32x64xf32>
    %197 = vector.shape_cast %196 : vector<1x32x64xf32> to vector<32x64xf32>
    %cst_72 = arith.constant dense<0.000000e+00> : vector<16x64xf32>
    %198 = tpu.matmul %195, %197, %cst_72 {dimension_numbers = #tpu.dot_dimension_numbers<[1], [0], [0], [1], [0, 0, 1, 1], [], []>} : vector<16x32xf32>, vector<32x64xf32>, vector<16x64xf32> -> vector<16x64xf32>
    %c0_73 = arith.constant 0 : index
    %c0_74 = arith.constant 0 : index
    %c0_75 = arith.constant 0 : index
    %199 = vector.load %arg9[%c0_73, %c0_74, %c0_75] : memref<2x1x64xf32, #tpu.memory_space<vmem>>, vector<1x1x64xf32>
    %200 = vector.shape_cast %199 : vector<1x1x64xf32> to vector<1x64xf32>
    %201 = vector.broadcast %200 : vector<1x64xf32> to vector<16x64xf32>
    %202 = arith.addf %198, %201 : vector<16x64xf32>
    %cst_76 = arith.constant 0.000000e+00 : f32
    %203 = vector.broadcast %cst_76 : f32 to vector<16x64xf32>
    %204 = arith.maximumf %202, %203 : vector<16x64xf32>
    %c0_77 = arith.constant 0 : index
    %c0_78 = arith.constant 0 : index
    %c0_79 = arith.constant 0 : index
    %205 = vector.load %arg10[%c0_77, %c0_78, %c0_79] : memref<2x64x32xf32, #tpu.memory_space<vmem>>, vector<1x64x32xf32>
    %206 = vector.shape_cast %205 : vector<1x64x32xf32> to vector<64x32xf32>
    %cst_80 = arith.constant dense<0.000000e+00> : vector<16x32xf32>
    %207 = tpu.matmul %204, %206, %cst_80 {dimension_numbers = #tpu.dot_dimension_numbers<[1], [0], [0], [1], [0, 0, 1, 1], [], []>} : vector<16x64xf32>, vector<64x32xf32>, vector<16x32xf32> -> vector<16x32xf32>
    %c0_81 = arith.constant 0 : index
    %c0_82 = arith.constant 0 : index
    %c0_83 = arith.constant 0 : index
    %208 = vector.load %arg11[%c0_81, %c0_82, %c0_83] : memref<2x1x32xf32, #tpu.memory_space<vmem>>, vector<1x1x32xf32>
    %209 = vector.shape_cast %208 : vector<1x1x32xf32> to vector<1x32xf32>
    %210 = vector.broadcast %209 : vector<1x32xf32> to vector<16x32xf32>
    %211 = arith.addf %207, %210 : vector<16x32xf32>
    %212 = arith.addf %195, %211 : vector<16x32xf32>
    %213 = vector.extract_strided_slice %7 {offsets = [2, 0], sizes = [1, 32], strides = [1, 1]} : vector<3x32xf32> to vector<1x32xf32>
    %214 = vector.extract_strided_slice %9 {offsets = [2, 0], sizes = [1, 32], strides = [1, 1]} : vector<3x32xf32> to vector<1x32xf32>
    %cst_84 = arith.constant dense<0.000000e+00> : vector<16xf32>
    %215 = vector.multi_reduction <add>, %212, %cst_84 [1] : vector<16x32xf32> to vector<16xf32>
    %216 = vector.shape_cast %215 : vector<16xf32> to vector<16x1xf32>
    %cst_85 = arith.constant 3.200000e+01 : f32
    %217 = vector.broadcast %cst_85 : f32 to vector<16x1xf32>
    %218 = arith.divf %216, %217 : vector<16x1xf32>
    %219 = vector.broadcast %218 : vector<16x1xf32> to vector<16x32xf32>
    %220 = arith.subf %212, %219 : vector<16x32xf32>
    %221 = arith.mulf %220, %220 : vector<16x32xf32>
    %cst_86 = arith.constant dense<0.000000e+00> : vector<16xf32>
    %222 = vector.multi_reduction <add>, %221, %cst_86 [1] : vector<16x32xf32> to vector<16xf32>
    %223 = vector.shape_cast %222 : vector<16xf32> to vector<16x1xf32>
    %cst_87 = arith.constant 3.200000e+01 : f32
    %224 = vector.broadcast %cst_87 : f32 to vector<16x1xf32>
    %225 = arith.divf %223, %224 : vector<16x1xf32>
    %226 = vector.broadcast %218 : vector<16x1xf32> to vector<16x32xf32>
    %227 = arith.subf %212, %226 : vector<16x32xf32>
    %cst_88 = arith.constant 9.99999974E-6 : f32
    %228 = vector.broadcast %cst_88 : f32 to vector<16x1xf32>
    %229 = arith.addf %225, %228 : vector<16x1xf32>
    %230 = math.rsqrt %229 : vector<16x1xf32>
    %231 = vector.broadcast %230 : vector<16x1xf32> to vector<16x32xf32>
    %232 = arith.mulf %227, %231 : vector<16x32xf32>
    %233 = vector.broadcast %213 : vector<1x32xf32> to vector<16x32xf32>
    %234 = arith.mulf %232, %233 : vector<16x32xf32>
    %235 = vector.broadcast %214 : vector<1x32xf32> to vector<16x32xf32>
    %236 = arith.addf %234, %235 : vector<16x32xf32>
    %c1 = arith.constant 1 : index
    %c0_89 = arith.constant 0 : index
    %c0_90 = arith.constant 0 : index
    %237 = vector.load %arg12[%c1, %c0_89, %c0_90] : memref<2x3x32xf32, #tpu.memory_space<vmem>>, vector<1x3x32xf32>
    %238 = vector.shape_cast %237 : vector<1x3x32xf32> to vector<3x32xf32>
    %c1_91 = arith.constant 1 : index
    %c0_92 = arith.constant 0 : index
    %c0_93 = arith.constant 0 : index
    %239 = vector.load %arg13[%c1_91, %c0_92, %c0_93] : memref<2x3x32xf32, #tpu.memory_space<vmem>>, vector<1x3x32xf32>
    %240 = vector.shape_cast %239 : vector<1x3x32xf32> to vector<3x32xf32>
    %c1_94 = arith.constant 1 : index
    %c0_95 = arith.constant 0 : index
    %c0_96 = arith.constant 0 : index
    %241 = vector.load %arg4[%c1_94, %c0_95, %c0_96] : memref<2x32x96xf32, #tpu.memory_space<vmem>>, vector<1x32x96xf32>
    %242 = vector.shape_cast %241 : vector<1x32x96xf32> to vector<32x96xf32>
    %c1_97 = arith.constant 1 : index
    %c0_98 = arith.constant 0 : index
    %c0_99 = arith.constant 0 : index
    %243 = vector.load %arg5[%c1_97, %c0_98, %c0_99] : memref<2x1x96xf32, #tpu.memory_space<vmem>>, vector<1x1x96xf32>
    %244 = vector.shape_cast %243 : vector<1x1x96xf32> to vector<1x96xf32>
    %cst_100 = arith.constant dense<0.000000e+00> : vector<16x96xf32>
    %245 = tpu.matmul %236, %242, %cst_100 {dimension_numbers = #tpu.dot_dimension_numbers<[1], [0], [0], [1], [0, 0, 1, 1], [], []>} : vector<16x32xf32>, vector<32x96xf32>, vector<16x96xf32> -> vector<16x96xf32>
    %246 = vector.broadcast %244 : vector<1x96xf32> to vector<16x96xf32>
    %247 = arith.addf %245, %246 : vector<16x96xf32>
    %248 = vector.extract_strided_slice %247 {offsets = [0, 0], sizes = [16, 8], strides = [1, 1]} : vector<16x96xf32> to vector<16x8xf32>
    %249 = vector.extract_strided_slice %247 {offsets = [0, 32], sizes = [16, 8], strides = [1, 1]} : vector<16x96xf32> to vector<16x8xf32>
    %250 = vector.extract_strided_slice %247 {offsets = [0, 64], sizes = [16, 8], strides = [1, 1]} : vector<16x96xf32> to vector<16x8xf32>
    %cst_101 = arith.constant dense<0.000000e+00> : vector<16x16xf32>
    %251 = tpu.matmul %248, %249, %cst_101 {dimension_numbers = #tpu.dot_dimension_numbers<[1], [1], [0], [0], [0, 0, 1, 0], [], []>} : vector<16x8xf32>, vector<16x8xf32>, vector<16x16xf32> -> vector<16x16xf32>
    %252 = arith.addf %251, %0 : vector<16x16xf32>
    %cst_102 = arith.constant dense<0xFF800000> : vector<16xf32>
    %253 = vector.multi_reduction <maximumf>, %252, %cst_102 [1] : vector<16x16xf32> to vector<16xf32>
    %254 = vector.shape_cast %253 : vector<16xf32> to vector<16x1xf32>
    %255 = vector.broadcast %254 : vector<16x1xf32> to vector<16x16xf32>
    %256 = arith.subf %252, %255 : vector<16x16xf32>
    %257 = math.exp %256 : vector<16x16xf32>
    %cst_103 = arith.constant dense<0.000000e+00> : vector<16xf32>
    %258 = vector.multi_reduction <add>, %257, %cst_103 [1] : vector<16x16xf32> to vector<16xf32>
    %259 = vector.shape_cast %258 : vector<16xf32> to vector<16x1xf32>
    %260 = vector.broadcast %259 : vector<16x1xf32> to vector<16x16xf32>
    %261 = arith.divf %257, %260 : vector<16x16xf32>
    %cst_104 = arith.constant dense<0.000000e+00> : vector<16x8xf32>
    %262 = tpu.matmul %261, %250, %cst_104 {dimension_numbers = #tpu.dot_dimension_numbers<[1], [0], [0], [1], [0, 0, 1, 1], [], []>} : vector<16x16xf32>, vector<16x8xf32>, vector<16x8xf32> -> vector<16x8xf32>
    %263 = vector.extract_strided_slice %247 {offsets = [0, 8], sizes = [16, 8], strides = [1, 1]} : vector<16x96xf32> to vector<16x8xf32>
    %264 = vector.extract_strided_slice %247 {offsets = [0, 40], sizes = [16, 8], strides = [1, 1]} : vector<16x96xf32> to vector<16x8xf32>
    %265 = vector.extract_strided_slice %247 {offsets = [0, 72], sizes = [16, 8], strides = [1, 1]} : vector<16x96xf32> to vector<16x8xf32>
    %cst_105 = arith.constant dense<0.000000e+00> : vector<16x16xf32>
    %266 = tpu.matmul %263, %264, %cst_105 {dimension_numbers = #tpu.dot_dimension_numbers<[1], [1], [0], [0], [0, 0, 1, 0], [], []>} : vector<16x8xf32>, vector<16x8xf32>, vector<16x16xf32> -> vector<16x16xf32>
    %267 = arith.addf %266, %0 : vector<16x16xf32>
    %cst_106 = arith.constant dense<0xFF800000> : vector<16xf32>
    %268 = vector.multi_reduction <maximumf>, %267, %cst_106 [1] : vector<16x16xf32> to vector<16xf32>
    %269 = vector.shape_cast %268 : vector<16xf32> to vector<16x1xf32>
    %270 = vector.broadcast %269 : vector<16x1xf32> to vector<16x16xf32>
    %271 = arith.subf %267, %270 : vector<16x16xf32>
    %272 = math.exp %271 : vector<16x16xf32>
    %cst_107 = arith.constant dense<0.000000e+00> : vector<16xf32>
    %273 = vector.multi_reduction <add>, %272, %cst_107 [1] : vector<16x16xf32> to vector<16xf32>
    %274 = vector.shape_cast %273 : vector<16xf32> to vector<16x1xf32>
    %275 = vector.broadcast %274 : vector<16x1xf32> to vector<16x16xf32>
    %276 = arith.divf %272, %275 : vector<16x16xf32>
    %cst_108 = arith.constant dense<0.000000e+00> : vector<16x8xf32>
    %277 = tpu.matmul %276, %265, %cst_108 {dimension_numbers = #tpu.dot_dimension_numbers<[1], [0], [0], [1], [0, 0, 1, 1], [], []>} : vector<16x16xf32>, vector<16x8xf32>, vector<16x8xf32> -> vector<16x8xf32>
    %278 = vector.extract_strided_slice %247 {offsets = [0, 16], sizes = [16, 8], strides = [1, 1]} : vector<16x96xf32> to vector<16x8xf32>
    %279 = vector.extract_strided_slice %247 {offsets = [0, 48], sizes = [16, 8], strides = [1, 1]} : vector<16x96xf32> to vector<16x8xf32>
    %280 = vector.extract_strided_slice %247 {offsets = [0, 80], sizes = [16, 8], strides = [1, 1]} : vector<16x96xf32> to vector<16x8xf32>
    %cst_109 = arith.constant dense<0.000000e+00> : vector<16x16xf32>
    %281 = tpu.matmul %278, %279, %cst_109 {dimension_numbers = #tpu.dot_dimension_numbers<[1], [1], [0], [0], [0, 0, 1, 0], [], []>} : vector<16x8xf32>, vector<16x8xf32>, vector<16x16xf32> -> vector<16x16xf32>
    %282 = arith.addf %281, %0 : vector<16x16xf32>
    %cst_110 = arith.constant dense<0xFF800000> : vector<16xf32>
    %283 = vector.multi_reduction <maximumf>, %282, %cst_110 [1] : vector<16x16xf32> to vector<16xf32>
    %284 = vector.shape_cast %283 : vector<16xf32> to vector<16x1xf32>
    %285 = vector.broadcast %284 : vector<16x1xf32> to vector<16x16xf32>
    %286 = arith.subf %282, %285 : vector<16x16xf32>
    %287 = math.exp %286 : vector<16x16xf32>
    %cst_111 = arith.constant dense<0.000000e+00> : vector<16xf32>
    %288 = vector.multi_reduction <add>, %287, %cst_111 [1] : vector<16x16xf32> to vector<16xf32>
    %289 = vector.shape_cast %288 : vector<16xf32> to vector<16x1xf32>
    %290 = vector.broadcast %289 : vector<16x1xf32> to vector<16x16xf32>
    %291 = arith.divf %287, %290 : vector<16x16xf32>
    %cst_112 = arith.constant dense<0.000000e+00> : vector<16x8xf32>
    %292 = tpu.matmul %291, %280, %cst_112 {dimension_numbers = #tpu.dot_dimension_numbers<[1], [0], [0], [1], [0, 0, 1, 1], [], []>} : vector<16x16xf32>, vector<16x8xf32>, vector<16x8xf32> -> vector<16x8xf32>
    %293 = vector.extract_strided_slice %247 {offsets = [0, 24], sizes = [16, 8], strides = [1, 1]} : vector<16x96xf32> to vector<16x8xf32>
    %294 = vector.extract_strided_slice %247 {offsets = [0, 56], sizes = [16, 8], strides = [1, 1]} : vector<16x96xf32> to vector<16x8xf32>
    %295 = vector.extract_strided_slice %247 {offsets = [0, 88], sizes = [16, 8], strides = [1, 1]} : vector<16x96xf32> to vector<16x8xf32>
    %cst_113 = arith.constant dense<0.000000e+00> : vector<16x16xf32>
    %296 = tpu.matmul %293, %294, %cst_113 {dimension_numbers = #tpu.dot_dimension_numbers<[1], [1], [0], [0], [0, 0, 1, 0], [], []>} : vector<16x8xf32>, vector<16x8xf32>, vector<16x16xf32> -> vector<16x16xf32>
    %297 = arith.addf %296, %0 : vector<16x16xf32>
    %cst_114 = arith.constant dense<0xFF800000> : vector<16xf32>
    %298 = vector.multi_reduction <maximumf>, %297, %cst_114 [1] : vector<16x16xf32> to vector<16xf32>
    %299 = vector.shape_cast %298 : vector<16xf32> to vector<16x1xf32>
    %300 = vector.broadcast %299 : vector<16x1xf32> to vector<16x16xf32>
    %301 = arith.subf %297, %300 : vector<16x16xf32>
    %302 = math.exp %301 : vector<16x16xf32>
    %cst_115 = arith.constant dense<0.000000e+00> : vector<16xf32>
    %303 = vector.multi_reduction <add>, %302, %cst_115 [1] : vector<16x16xf32> to vector<16xf32>
    %304 = vector.shape_cast %303 : vector<16xf32> to vector<16x1xf32>
    %305 = vector.broadcast %304 : vector<16x1xf32> to vector<16x16xf32>
    %306 = arith.divf %302, %305 : vector<16x16xf32>
    %cst_116 = arith.constant dense<0.000000e+00> : vector<16x8xf32>
    %307 = tpu.matmul %306, %295, %cst_116 {dimension_numbers = #tpu.dot_dimension_numbers<[1], [0], [0], [1], [0, 0, 1, 1], [], []>} : vector<16x16xf32>, vector<16x8xf32>, vector<16x8xf32> -> vector<16x8xf32>
    %308 = tpu.concatenate %262, %277, %292, %307 in 1 : vector<16x8xf32>, vector<16x8xf32>, vector<16x8xf32>, vector<16x8xf32> -> vector<16x32xf32>
    %309 = arith.addf %236, %308 : vector<16x32xf32>
    %310 = vector.extract_strided_slice %238 {offsets = [0, 0], sizes = [1, 32], strides = [1, 1]} : vector<3x32xf32> to vector<1x32xf32>
    %311 = vector.extract_strided_slice %240 {offsets = [0, 0], sizes = [1, 32], strides = [1, 1]} : vector<3x32xf32> to vector<1x32xf32>
    %cst_117 = arith.constant dense<0.000000e+00> : vector<16xf32>
    %312 = vector.multi_reduction <add>, %309, %cst_117 [1] : vector<16x32xf32> to vector<16xf32>
    %313 = vector.shape_cast %312 : vector<16xf32> to vector<16x1xf32>
    %cst_118 = arith.constant 3.200000e+01 : f32
    %314 = vector.broadcast %cst_118 : f32 to vector<16x1xf32>
    %315 = arith.divf %313, %314 : vector<16x1xf32>
    %316 = vector.broadcast %315 : vector<16x1xf32> to vector<16x32xf32>
    %317 = arith.subf %309, %316 : vector<16x32xf32>
    %318 = arith.mulf %317, %317 : vector<16x32xf32>
    %cst_119 = arith.constant dense<0.000000e+00> : vector<16xf32>
    %319 = vector.multi_reduction <add>, %318, %cst_119 [1] : vector<16x32xf32> to vector<16xf32>
    %320 = vector.shape_cast %319 : vector<16xf32> to vector<16x1xf32>
    %cst_120 = arith.constant 3.200000e+01 : f32
    %321 = vector.broadcast %cst_120 : f32 to vector<16x1xf32>
    %322 = arith.divf %320, %321 : vector<16x1xf32>
    %323 = vector.broadcast %315 : vector<16x1xf32> to vector<16x32xf32>
    %324 = arith.subf %309, %323 : vector<16x32xf32>
    %cst_121 = arith.constant 9.99999974E-6 : f32
    %325 = vector.broadcast %cst_121 : f32 to vector<16x1xf32>
    %326 = arith.addf %322, %325 : vector<16x1xf32>
    %327 = math.rsqrt %326 : vector<16x1xf32>
    %328 = vector.broadcast %327 : vector<16x1xf32> to vector<16x32xf32>
    %329 = arith.mulf %324, %328 : vector<16x32xf32>
    %330 = vector.broadcast %310 : vector<1x32xf32> to vector<16x32xf32>
    %331 = arith.mulf %329, %330 : vector<16x32xf32>
    %332 = vector.broadcast %311 : vector<1x32xf32> to vector<16x32xf32>
    %333 = arith.addf %331, %332 : vector<16x32xf32>
    %c1_122 = arith.constant 1 : index
    %c0_123 = arith.constant 0 : index
    %c0_124 = arith.constant 0 : index
    %334 = vector.load %arg6[%c1_122, %c0_123, %c0_124] : memref<2x32x96xf32, #tpu.memory_space<vmem>>, vector<1x32x96xf32>
    %335 = vector.shape_cast %334 : vector<1x32x96xf32> to vector<32x96xf32>
    %c1_125 = arith.constant 1 : index
    %c0_126 = arith.constant 0 : index
    %c0_127 = arith.constant 0 : index
    %336 = vector.load %arg7[%c1_125, %c0_126, %c0_127] : memref<2x1x96xf32, #tpu.memory_space<vmem>>, vector<1x1x96xf32>
    %337 = vector.shape_cast %336 : vector<1x1x96xf32> to vector<1x96xf32>
    %cst_128 = arith.constant dense<0.000000e+00> : vector<16x96xf32>
    %338 = tpu.matmul %333, %335, %cst_128 {dimension_numbers = #tpu.dot_dimension_numbers<[1], [0], [0], [1], [0, 0, 1, 1], [], []>} : vector<16x32xf32>, vector<32x96xf32>, vector<16x96xf32> -> vector<16x96xf32>
    %339 = vector.broadcast %337 : vector<1x96xf32> to vector<16x96xf32>
    %340 = arith.addf %338, %339 : vector<16x96xf32>
    %341 = vector.extract_strided_slice %340 {offsets = [0, 0], sizes = [16, 8], strides = [1, 1]} : vector<16x96xf32> to vector<16x8xf32>
    %342 = vector.extract_strided_slice %340 {offsets = [0, 32], sizes = [16, 8], strides = [1, 1]} : vector<16x96xf32> to vector<16x8xf32>
    %343 = vector.extract_strided_slice %340 {offsets = [0, 64], sizes = [16, 8], strides = [1, 1]} : vector<16x96xf32> to vector<16x8xf32>
    %cst_129 = arith.constant dense<0.000000e+00> : vector<16x16xf32>
    %344 = tpu.matmul %341, %342, %cst_129 {dimension_numbers = #tpu.dot_dimension_numbers<[1], [1], [0], [0], [0, 0, 1, 0], [], []>} : vector<16x8xf32>, vector<16x8xf32>, vector<16x16xf32> -> vector<16x16xf32>
    %345 = arith.addf %344, %0 : vector<16x16xf32>
    %cst_130 = arith.constant dense<0xFF800000> : vector<16xf32>
    %346 = vector.multi_reduction <maximumf>, %345, %cst_130 [1] : vector<16x16xf32> to vector<16xf32>
    %347 = vector.shape_cast %346 : vector<16xf32> to vector<16x1xf32>
    %348 = vector.broadcast %347 : vector<16x1xf32> to vector<16x16xf32>
    %349 = arith.subf %345, %348 : vector<16x16xf32>
    %350 = math.exp %349 : vector<16x16xf32>
    %cst_131 = arith.constant dense<0.000000e+00> : vector<16xf32>
    %351 = vector.multi_reduction <add>, %350, %cst_131 [1] : vector<16x16xf32> to vector<16xf32>
    %352 = vector.shape_cast %351 : vector<16xf32> to vector<16x1xf32>
    %353 = vector.broadcast %352 : vector<16x1xf32> to vector<16x16xf32>
    %354 = arith.divf %350, %353 : vector<16x16xf32>
    %cst_132 = arith.constant dense<0.000000e+00> : vector<16x8xf32>
    %355 = tpu.matmul %354, %343, %cst_132 {dimension_numbers = #tpu.dot_dimension_numbers<[1], [0], [0], [1], [0, 0, 1, 1], [], []>} : vector<16x16xf32>, vector<16x8xf32>, vector<16x8xf32> -> vector<16x8xf32>
    %356 = vector.extract_strided_slice %340 {offsets = [0, 8], sizes = [16, 8], strides = [1, 1]} : vector<16x96xf32> to vector<16x8xf32>
    %357 = vector.extract_strided_slice %340 {offsets = [0, 40], sizes = [16, 8], strides = [1, 1]} : vector<16x96xf32> to vector<16x8xf32>
    %358 = vector.extract_strided_slice %340 {offsets = [0, 72], sizes = [16, 8], strides = [1, 1]} : vector<16x96xf32> to vector<16x8xf32>
    %cst_133 = arith.constant dense<0.000000e+00> : vector<16x16xf32>
    %359 = tpu.matmul %356, %357, %cst_133 {dimension_numbers = #tpu.dot_dimension_numbers<[1], [1], [0], [0], [0, 0, 1, 0], [], []>} : vector<16x8xf32>, vector<16x8xf32>, vector<16x16xf32> -> vector<16x16xf32>
    %360 = arith.addf %359, %0 : vector<16x16xf32>
    %cst_134 = arith.constant dense<0xFF800000> : vector<16xf32>
    %361 = vector.multi_reduction <maximumf>, %360, %cst_134 [1] : vector<16x16xf32> to vector<16xf32>
    %362 = vector.shape_cast %361 : vector<16xf32> to vector<16x1xf32>
    %363 = vector.broadcast %362 : vector<16x1xf32> to vector<16x16xf32>
    %364 = arith.subf %360, %363 : vector<16x16xf32>
    %365 = math.exp %364 : vector<16x16xf32>
    %cst_135 = arith.constant dense<0.000000e+00> : vector<16xf32>
    %366 = vector.multi_reduction <add>, %365, %cst_135 [1] : vector<16x16xf32> to vector<16xf32>
    %367 = vector.shape_cast %366 : vector<16xf32> to vector<16x1xf32>
    %368 = vector.broadcast %367 : vector<16x1xf32> to vector<16x16xf32>
    %369 = arith.divf %365, %368 : vector<16x16xf32>
    %cst_136 = arith.constant dense<0.000000e+00> : vector<16x8xf32>
    %370 = tpu.matmul %369, %358, %cst_136 {dimension_numbers = #tpu.dot_dimension_numbers<[1], [0], [0], [1], [0, 0, 1, 1], [], []>} : vector<16x16xf32>, vector<16x8xf32>, vector<16x8xf32> -> vector<16x8xf32>
    %371 = vector.extract_strided_slice %340 {offsets = [0, 16], sizes = [16, 8], strides = [1, 1]} : vector<16x96xf32> to vector<16x8xf32>
    %372 = vector.extract_strided_slice %340 {offsets = [0, 48], sizes = [16, 8], strides = [1, 1]} : vector<16x96xf32> to vector<16x8xf32>
    %373 = vector.extract_strided_slice %340 {offsets = [0, 80], sizes = [16, 8], strides = [1, 1]} : vector<16x96xf32> to vector<16x8xf32>
    %cst_137 = arith.constant dense<0.000000e+00> : vector<16x16xf32>
    %374 = tpu.matmul %371, %372, %cst_137 {dimension_numbers = #tpu.dot_dimension_numbers<[1], [1], [0], [0], [0, 0, 1, 0], [], []>} : vector<16x8xf32>, vector<16x8xf32>, vector<16x16xf32> -> vector<16x16xf32>
    %375 = arith.addf %374, %0 : vector<16x16xf32>
    %cst_138 = arith.constant dense<0xFF800000> : vector<16xf32>
    %376 = vector.multi_reduction <maximumf>, %375, %cst_138 [1] : vector<16x16xf32> to vector<16xf32>
    %377 = vector.shape_cast %376 : vector<16xf32> to vector<16x1xf32>
    %378 = vector.broadcast %377 : vector<16x1xf32> to vector<16x16xf32>
    %379 = arith.subf %375, %378 : vector<16x16xf32>
    %380 = math.exp %379 : vector<16x16xf32>
    %cst_139 = arith.constant dense<0.000000e+00> : vector<16xf32>
    %381 = vector.multi_reduction <add>, %380, %cst_139 [1] : vector<16x16xf32> to vector<16xf32>
    %382 = vector.shape_cast %381 : vector<16xf32> to vector<16x1xf32>
    %383 = vector.broadcast %382 : vector<16x1xf32> to vector<16x16xf32>
    %384 = arith.divf %380, %383 : vector<16x16xf32>
    %cst_140 = arith.constant dense<0.000000e+00> : vector<16x8xf32>
    %385 = tpu.matmul %384, %373, %cst_140 {dimension_numbers = #tpu.dot_dimension_numbers<[1], [0], [0], [1], [0, 0, 1, 1], [], []>} : vector<16x16xf32>, vector<16x8xf32>, vector<16x8xf32> -> vector<16x8xf32>
    %386 = vector.extract_strided_slice %340 {offsets = [0, 24], sizes = [16, 8], strides = [1, 1]} : vector<16x96xf32> to vector<16x8xf32>
    %387 = vector.extract_strided_slice %340 {offsets = [0, 56], sizes = [16, 8], strides = [1, 1]} : vector<16x96xf32> to vector<16x8xf32>
    %388 = vector.extract_strided_slice %340 {offsets = [0, 88], sizes = [16, 8], strides = [1, 1]} : vector<16x96xf32> to vector<16x8xf32>
    %cst_141 = arith.constant dense<0.000000e+00> : vector<16x16xf32>
    %389 = tpu.matmul %386, %387, %cst_141 {dimension_numbers = #tpu.dot_dimension_numbers<[1], [1], [0], [0], [0, 0, 1, 0], [], []>} : vector<16x8xf32>, vector<16x8xf32>, vector<16x16xf32> -> vector<16x16xf32>
    %390 = arith.addf %389, %0 : vector<16x16xf32>
    %cst_142 = arith.constant dense<0xFF800000> : vector<16xf32>
    %391 = vector.multi_reduction <maximumf>, %390, %cst_142 [1] : vector<16x16xf32> to vector<16xf32>
    %392 = vector.shape_cast %391 : vector<16xf32> to vector<16x1xf32>
    %393 = vector.broadcast %392 : vector<16x1xf32> to vector<16x16xf32>
    %394 = arith.subf %390, %393 : vector<16x16xf32>
    %395 = math.exp %394 : vector<16x16xf32>
    %cst_143 = arith.constant dense<0.000000e+00> : vector<16xf32>
    %396 = vector.multi_reduction <add>, %395, %cst_143 [1] : vector<16x16xf32> to vector<16xf32>
    %397 = vector.shape_cast %396 : vector<16xf32> to vector<16x1xf32>
    %398 = vector.broadcast %397 : vector<16x1xf32> to vector<16x16xf32>
    %399 = arith.divf %395, %398 : vector<16x16xf32>
    %cst_144 = arith.constant dense<0.000000e+00> : vector<16x8xf32>
    %400 = tpu.matmul %399, %388, %cst_144 {dimension_numbers = #tpu.dot_dimension_numbers<[1], [0], [0], [1], [0, 0, 1, 1], [], []>} : vector<16x16xf32>, vector<16x8xf32>, vector<16x8xf32> -> vector<16x8xf32>
    %401 = tpu.concatenate %355, %370, %385, %400 in 1 : vector<16x8xf32>, vector<16x8xf32>, vector<16x8xf32>, vector<16x8xf32> -> vector<16x32xf32>
    %402 = arith.addf %333, %401 : vector<16x32xf32>
    %403 = vector.extract_strided_slice %238 {offsets = [1, 0], sizes = [1, 32], strides = [1, 1]} : vector<3x32xf32> to vector<1x32xf32>
    %404 = vector.extract_strided_slice %240 {offsets = [1, 0], sizes = [1, 32], strides = [1, 1]} : vector<3x32xf32> to vector<1x32xf32>
    %cst_145 = arith.constant dense<0.000000e+00> : vector<16xf32>
    %405 = vector.multi_reduction <add>, %402, %cst_145 [1] : vector<16x32xf32> to vector<16xf32>
    %406 = vector.shape_cast %405 : vector<16xf32> to vector<16x1xf32>
    %cst_146 = arith.constant 3.200000e+01 : f32
    %407 = vector.broadcast %cst_146 : f32 to vector<16x1xf32>
    %408 = arith.divf %406, %407 : vector<16x1xf32>
    %409 = vector.broadcast %408 : vector<16x1xf32> to vector<16x32xf32>
    %410 = arith.subf %402, %409 : vector<16x32xf32>
    %411 = arith.mulf %410, %410 : vector<16x32xf32>
    %cst_147 = arith.constant dense<0.000000e+00> : vector<16xf32>
    %412 = vector.multi_reduction <add>, %411, %cst_147 [1] : vector<16x32xf32> to vector<16xf32>
    %413 = vector.shape_cast %412 : vector<16xf32> to vector<16x1xf32>
    %cst_148 = arith.constant 3.200000e+01 : f32
    %414 = vector.broadcast %cst_148 : f32 to vector<16x1xf32>
    %415 = arith.divf %413, %414 : vector<16x1xf32>
    %416 = vector.broadcast %408 : vector<16x1xf32> to vector<16x32xf32>
    %417 = arith.subf %402, %416 : vector<16x32xf32>
    %cst_149 = arith.constant 9.99999974E-6 : f32
    %418 = vector.broadcast %cst_149 : f32 to vector<16x1xf32>
    %419 = arith.addf %415, %418 : vector<16x1xf32>
    %420 = math.rsqrt %419 : vector<16x1xf32>
    %421 = vector.broadcast %420 : vector<16x1xf32> to vector<16x32xf32>
    %422 = arith.mulf %417, %421 : vector<16x32xf32>
    %423 = vector.broadcast %403 : vector<1x32xf32> to vector<16x32xf32>
    %424 = arith.mulf %422, %423 : vector<16x32xf32>
    %425 = vector.broadcast %404 : vector<1x32xf32> to vector<16x32xf32>
    %426 = arith.addf %424, %425 : vector<16x32xf32>
    %c1_150 = arith.constant 1 : index
    %c0_151 = arith.constant 0 : index
    %c0_152 = arith.constant 0 : index
    %427 = vector.load %arg8[%c1_150, %c0_151, %c0_152] : memref<2x32x64xf32, #tpu.memory_space<vmem>>, vector<1x32x64xf32>
    %428 = vector.shape_cast %427 : vector<1x32x64xf32> to vector<32x64xf32>
    %cst_153 = arith.constant dense<0.000000e+00> : vector<16x64xf32>
    %429 = tpu.matmul %426, %428, %cst_153 {dimension_numbers = #tpu.dot_dimension_numbers<[1], [0], [0], [1], [0, 0, 1, 1], [], []>} : vector<16x32xf32>, vector<32x64xf32>, vector<16x64xf32> -> vector<16x64xf32>
    %c1_154 = arith.constant 1 : index
    %c0_155 = arith.constant 0 : index
    %c0_156 = arith.constant 0 : index
    %430 = vector.load %arg9[%c1_154, %c0_155, %c0_156] : memref<2x1x64xf32, #tpu.memory_space<vmem>>, vector<1x1x64xf32>
    %431 = vector.shape_cast %430 : vector<1x1x64xf32> to vector<1x64xf32>
    %432 = vector.broadcast %431 : vector<1x64xf32> to vector<16x64xf32>
    %433 = arith.addf %429, %432 : vector<16x64xf32>
    %cst_157 = arith.constant 0.000000e+00 : f32
    %434 = vector.broadcast %cst_157 : f32 to vector<16x64xf32>
    %435 = arith.maximumf %433, %434 : vector<16x64xf32>
    %c1_158 = arith.constant 1 : index
    %c0_159 = arith.constant 0 : index
    %c0_160 = arith.constant 0 : index
    %436 = vector.load %arg10[%c1_158, %c0_159, %c0_160] : memref<2x64x32xf32, #tpu.memory_space<vmem>>, vector<1x64x32xf32>
    %437 = vector.shape_cast %436 : vector<1x64x32xf32> to vector<64x32xf32>
    %cst_161 = arith.constant dense<0.000000e+00> : vector<16x32xf32>
    %438 = tpu.matmul %435, %437, %cst_161 {dimension_numbers = #tpu.dot_dimension_numbers<[1], [0], [0], [1], [0, 0, 1, 1], [], []>} : vector<16x64xf32>, vector<64x32xf32>, vector<16x32xf32> -> vector<16x32xf32>
    %c1_162 = arith.constant 1 : index
    %c0_163 = arith.constant 0 : index
    %c0_164 = arith.constant 0 : index
    %439 = vector.load %arg11[%c1_162, %c0_163, %c0_164] : memref<2x1x32xf32, #tpu.memory_space<vmem>>, vector<1x1x32xf32>
    %440 = vector.shape_cast %439 : vector<1x1x32xf32> to vector<1x32xf32>
    %441 = vector.broadcast %440 : vector<1x32xf32> to vector<16x32xf32>
    %442 = arith.addf %438, %441 : vector<16x32xf32>
    %443 = arith.addf %426, %442 : vector<16x32xf32>
    %444 = vector.extract_strided_slice %238 {offsets = [2, 0], sizes = [1, 32], strides = [1, 1]} : vector<3x32xf32> to vector<1x32xf32>
    %445 = vector.extract_strided_slice %240 {offsets = [2, 0], sizes = [1, 32], strides = [1, 1]} : vector<3x32xf32> to vector<1x32xf32>
    %cst_165 = arith.constant dense<0.000000e+00> : vector<16xf32>
    %446 = vector.multi_reduction <add>, %443, %cst_165 [1] : vector<16x32xf32> to vector<16xf32>
    %447 = vector.shape_cast %446 : vector<16xf32> to vector<16x1xf32>
    %cst_166 = arith.constant 3.200000e+01 : f32
    %448 = vector.broadcast %cst_166 : f32 to vector<16x1xf32>
    %449 = arith.divf %447, %448 : vector<16x1xf32>
    %450 = vector.broadcast %449 : vector<16x1xf32> to vector<16x32xf32>
    %451 = arith.subf %443, %450 : vector<16x32xf32>
    %452 = arith.mulf %451, %451 : vector<16x32xf32>
    %cst_167 = arith.constant dense<0.000000e+00> : vector<16xf32>
    %453 = vector.multi_reduction <add>, %452, %cst_167 [1] : vector<16x32xf32> to vector<16xf32>
    %454 = vector.shape_cast %453 : vector<16xf32> to vector<16x1xf32>
    %cst_168 = arith.constant 3.200000e+01 : f32
    %455 = vector.broadcast %cst_168 : f32 to vector<16x1xf32>
    %456 = arith.divf %454, %455 : vector<16x1xf32>
    %457 = vector.broadcast %449 : vector<16x1xf32> to vector<16x32xf32>
    %458 = arith.subf %443, %457 : vector<16x32xf32>
    %cst_169 = arith.constant 9.99999974E-6 : f32
    %459 = vector.broadcast %cst_169 : f32 to vector<16x1xf32>
    %460 = arith.addf %456, %459 : vector<16x1xf32>
    %461 = math.rsqrt %460 : vector<16x1xf32>
    %462 = vector.broadcast %461 : vector<16x1xf32> to vector<16x32xf32>
    %463 = arith.mulf %458, %462 : vector<16x32xf32>
    %464 = vector.broadcast %444 : vector<1x32xf32> to vector<16x32xf32>
    %465 = arith.mulf %463, %464 : vector<16x32xf32>
    %466 = vector.broadcast %445 : vector<1x32xf32> to vector<16x32xf32>
    %467 = arith.addf %465, %466 : vector<16x32xf32>
    %c0_170 = arith.constant 0 : index
    %c0_171 = arith.constant 0 : index
    %468 = vector.load %arg14[%c0_170, %c0_171] : memref<1x32xf32, #tpu.memory_space<vmem>>, vector<1x32xf32>
    %c0_172 = arith.constant 0 : index
    %c0_173 = arith.constant 0 : index
    %469 = vector.load %arg15[%c0_172, %c0_173] : memref<1x32xf32, #tpu.memory_space<vmem>>, vector<1x32xf32>
    %cst_174 = arith.constant dense<0.000000e+00> : vector<16xf32>
    %470 = vector.multi_reduction <add>, %467, %cst_174 [1] : vector<16x32xf32> to vector<16xf32>
    %471 = vector.shape_cast %470 : vector<16xf32> to vector<16x1xf32>
    %cst_175 = arith.constant 3.200000e+01 : f32
    %472 = vector.broadcast %cst_175 : f32 to vector<16x1xf32>
    %473 = arith.divf %471, %472 : vector<16x1xf32>
    %474 = vector.broadcast %473 : vector<16x1xf32> to vector<16x32xf32>
    %475 = arith.subf %467, %474 : vector<16x32xf32>
    %476 = arith.mulf %475, %475 : vector<16x32xf32>
    %cst_176 = arith.constant dense<0.000000e+00> : vector<16xf32>
    %477 = vector.multi_reduction <add>, %476, %cst_176 [1] : vector<16x32xf32> to vector<16xf32>
    %478 = vector.shape_cast %477 : vector<16xf32> to vector<16x1xf32>
    %cst_177 = arith.constant 3.200000e+01 : f32
    %479 = vector.broadcast %cst_177 : f32 to vector<16x1xf32>
    %480 = arith.divf %478, %479 : vector<16x1xf32>
    %481 = vector.broadcast %473 : vector<16x1xf32> to vector<16x32xf32>
    %482 = arith.subf %467, %481 : vector<16x32xf32>
    %cst_178 = arith.constant 9.99999974E-6 : f32
    %483 = vector.broadcast %cst_178 : f32 to vector<16x1xf32>
    %484 = arith.addf %480, %483 : vector<16x1xf32>
    %485 = math.rsqrt %484 : vector<16x1xf32>
    %486 = vector.broadcast %485 : vector<16x1xf32> to vector<16x32xf32>
    %487 = arith.mulf %482, %486 : vector<16x32xf32>
    %488 = vector.broadcast %468 : vector<1x32xf32> to vector<16x32xf32>
    %489 = arith.mulf %487, %488 : vector<16x32xf32>
    %490 = vector.broadcast %469 : vector<1x32xf32> to vector<16x32xf32>
    %491 = arith.addf %489, %490 : vector<16x32xf32>
    %c0_179 = arith.constant 0 : index
    %c0_180 = arith.constant 0 : index
    %492 = vector.load %arg16[%c0_179, %c0_180] : memref<1x32xf32, #tpu.memory_space<vmem>>, vector<1x32xf32>
    %493 = vector.broadcast %492 : vector<1x32xf32> to vector<16x32xf32>
    %494 = arith.mulf %491, %493 : vector<16x32xf32>
    %cst_181 = arith.constant dense<0.000000e+00> : vector<16xf32>
    %495 = vector.multi_reduction <add>, %494, %cst_181 [1] : vector<16x32xf32> to vector<16xf32>
    %496 = vector.shape_cast %495 : vector<16xf32> to vector<16x1xf32>
    %c0_182 = arith.constant 0 : index
    %c0_183 = arith.constant 0 : index
    %497 = vector.load %arg17[%c0_182, %c0_183] : memref<1x1xf32, #tpu.memory_space<vmem>>, vector<1x1xf32>
    %498 = vector.broadcast %497 : vector<1x1xf32> to vector<16x1xf32>
    %499 = arith.addf %496, %498 : vector<16x1xf32>
    %c0_184 = arith.constant 0 : index
    %c0_185 = arith.constant 0 : index
    %500 = vector.load %arg18[%c0_184, %c0_185] : memref<16x1xf32, #tpu.memory_space<vmem>>, vector<16x1xf32>
    tpu.vector_store %arg18[%c0_184, %c0_185], %499 {strides = array<i32>} : memref<16x1xf32, #tpu.memory_space<vmem>>, vector<16x1xf32>,
    return
  }
}

</mosaic_0001>

<bundles_post_ra>
// kernel: eq.8
= control target key start
LH: loop header
LB: loop body
LE: loop exit
PB: predicated region body
PF: predicated region fallthrough
CT: control target
= control target key end

     0   :  { %vm7_vm0 = vcmask 64512   ;;  %vm13_vm1 = vcmask 130112   ;;  %s39_s0 = inlined_call_operand.vmem [shape: s32[2,8], index: 0, kind: input, shape index: {}]   ;;  %s40_s1 = inlined_call_operand.vmem [shape: s32[16], index: 1, kind: output, shape index: {}]  }
   0x1   :  { %v4_v0 = vld [vmem:[%s39_s0] sm:$0x3]  ;;  %s22_s0 = smov 8  }
   0x2   :  { %5 = vst [vmem:[#allocation1] sm:$0x3] %v4_v0 }
   0x9   :  { %v10_v1 = vld [vmem:[#allocation1 + $0x1] sm:$0x1]   ;;  %v6_v2 = vld [vmem:[#allocation1] sm:$0x1]  }
   0xa   :  { %11 = vrot.lane.b32.xlu0 %v10_v1, %s22_s0  ;;  %8 = vst.msk [vmem:[#allocation0] sm:$0x1] %vm7_vm0, %v6_v2  }
  0x7c   :  { %v12_v3 = vpop.permute.xlu0 %11  }
  0x7d   :  { %14 = vst.msk [vmem:[#allocation0] sm:$0x1] %vm13_vm1, %v12_v3  }
  0x84   :  { %v18_v4 = vld [vmem:[#allocation0] sm:$0x1] }
  0x85   :  { %20 = vst [vmem:[%s40_s1] sm:$0x1] %v18_v4 }

// kernel: transformer_forward.1
= control target key start
LH: loop header
LB: loop body
LE: loop exit
PB: predicated region body
PF: predicated region fallthrough
CT: control target
= control target key end

     0   :  { %vm75_vm0 = vcmask 1043456   ;;  %vm68_vm1 = vcmask 31744   ;;  %vm167_vm2 = vcmask 261120   ;;  %vm255_vm3 = vcmask 64512   ;;  %s6752_s21 = smov 96   ;;  %s6746_s22 = smov 88   ;;  %s6705_s1 = inlined_call_operand.vmem [shape: f32[4,32], index: 1, kind: input, shape index: {}]   ;;  %s6706_s0 = inlined_call_operand.vmem [shape: f32[16,4], index: 0, kind: input, shape index: {}]   ;;  %s6707_s4 = inlined_call_operand.vmem [shape: f32[2,32,96], index: 4, kind: input, shape index: {}]   ;;  %s6708_s2 = inlined_call_operand.vmem [shape: f32[16,32], index: 2, kind: input, shape index: {}]   ;;  %s6709_s5 = inlined_call_operand.vmem [shape: f32[2,1,96], index: 5, kind: input, shape index: {}]   ;;  %s6710_s3 = inlined_call_operand.vmem [shape: f32[16,16], index: 3, kind: input, shape index: {}]   ;;  %s6711_s6 = inlined_call_operand.vmem [shape: f32[2,32,96], index: 6, kind: input, shape index: {}]   ;;  %s6712_s12 = inlined_call_operand.vmem [shape: f32[2,3,32], index: 12, kind: input, shape index: {}]   ;;  %s6713_s13 = inlined_call_operand.vmem [shape: f32[2,3,32], index: 13, kind: input, shape index: {}]   ;;  %s6714_s7 = inlined_call_operand.vmem [shape: f32[2,1,96], index: 7, kind: input, shape index: {}]   ;;  %s6715_s8 = inlined_call_operand.vmem [shape: f32[2,32,64], index: 8, kind: input, shape index: {}]   ;;  %s6716_s10 = inlined_call_operand.vmem [shape: f32[2,64,32], index: 10, kind: input, shape index: {}]   ;;  %s6717_s9 = inlined_call_operand.vmem [shape: f32[2,1,64], index: 9, kind: input, shape index: {}]   ;;  %s6718_s11 = inlined_call_operand.vmem [shape: f32[2,1,32], index: 11, kind: input, shape index: {}]   ;;  %s6719_s17 = inlined_call_operand.<no memory space> [shape: f32[1,1], index: 17, kind: input, shape index: {}]   ;;  %s6720_s14 = inlined_call_operand.vmem [shape: f32[1,32], index: 14, kind: input, shape index: {}]   ;;  %s6721_s15 = inlined_call_operand.vmem [shape: f32[1,32], index: 15, kind: input, shape index: {}]   ;;  %s6722_s16 = inlined_call_operand.vmem [shape: f32[1,32], index: 16, kind: input, shape index: {}]   ;;  %s6723_s18 = inlined_call_operand.vmem [shape: f32[16,1], index: 18, kind: output, shape index: {}]  }
   0x1   :  { %6755 = sst [smem:[#allocation3_spill]] %s6705_s1  ;;  %v66_v9 = vld [vmem:[%s6708_s2] sm:$0xff]  ;;  %v67_v10 = vld [vmem:[%s6708_s2 + $0x8] sm:$0xff]  ;;  %s6748_s2 = smov 120   ;;  %vm5961_vm4 = vmpackc.low %vm255_vm3, %vm255_vm3  ;;  %vm339_vm5 = vcmask 130048   ;;  %vm1077_vm6 = vcmask 195584  }
   0x2   :  { %6756 = sst [smem:[#allocation4_spill]] %s6706_s0  ;;  %s6762_s29 = sld [smem:[#allocation3_spill]]  ;;  %v4552_v15 = vld [vmem:[%s6709_s5] ss:$0 sm:$0xff]  ;;  %v5980_v32 = vld [vmem:[%s6710_s3 + $0x8] sm:$0xff]  ;;  %vm2190_vm7 = vcmask 523264  }
   0x3   :  { %6757 = sst [smem:[#allocation5_spill]] %s6707_s4  ;;  %s6763_s19 = sld [smem:[#allocation4_spill]]  ;;  %v5985_v33 = vld [vmem:[%s6710_s3] sm:$0xff]  ;;  %vm4542_vm8 = vcmask 7168  }
   0x4   :  { %6758 = sst [smem:[#allocation6_spill]] %s6720_s14  ;;  %s6764_s4 = sld [smem:[#allocation5_spill]] }
   0x5   :  { %6759 = sst [smem:[#allocation7_spill]] %s6721_s15  ;;  %s6750_s27 = smov 64  }
   0x6   :  { %6760 = sst [smem:[#allocation8_spill]] %s6722_s16  ;;  %s6744_s28 = smov 80  }
   0x7   :  { %6761 = sst [smem:[#allocation9_spill]] %s6723_s18  ;;  %s6742_s30 = smov 56  }
   0x8   :  { %v65_v0 = vld [vmem:[%s6762_s29] sm:$0xf]  ;;  %s6738_s29 = smov 72   ;;  %s6740_s1 = smov 112  }
   0x9   :  { %v63_v1 = vld [vmem:[%s6763_s19] sm:$0xff]  ;;  %v64_v2 = vld [vmem:[%s6763_s19 + $0x8] sm:$0xff]  ;;  %4889 = vmatprep.subr.msk.mxu0 %vm75_vm0, %v65_v0  ;;  %s6736_s19 = smov 104   ;;  %s6734_s0 = smov 48  }
   0xa   :  { %4891 = vmatprep.mubr.msk.f32.mxu0 %vm68_vm1, %v63_v1  ;;  %v156_v3 = vld [vmem:[%s6764_s4] sm:$0xff]  ;;  %v157_v4 = vld [vmem:[%s6764_s4 + $0x8] sm:$0xff]  ;;  %4890 = vmatpush3.msk.msra.mxu0 %vm75_vm0, %v65_v0  ;;  %v158_v6 = vld [vmem:[%s6764_s4 + $0x10] sm:$0xff]  ;;  %s6732_s20 = smov 8   ;;  %s6730_s23 = smov 40  }
   0xb   :  { %v5222_v5 = vpack.c.bf16 %v157_v4, %v156_v3  ;;  %4892 = vmatmul.mubr.msk.f32.vlgmr.msra.gmra.mrb[0].mxu0 %vm68_vm1, %v64_v2  ;;  %v159_v7 = vld [vmem:[%s6764_s4 + $0x18] sm:$0xff]  ;;  %s6728_s24 = smov 16   ;;  %s6726_s25 = smov 24  }
   0xc   :  { %v5226_v8 = vpack.c.bf16 %v159_v7, %v158_v6  ;;  %s6768_s26 = smov 104   ;;  %s6781_s14 = sld [smem:[#allocation6_spill]] }
   0xd   :  { %5223 = vmatprep.subr.bf16.mxu1 %v5222_v5 }
   0xe   :  { %5225 = vmatpush3.bf16.msra.mxu1 %v5222_v5 }
   0xf   :  { %5227 = vmatprep.subr.bf16.mxu1 %v5226_v8 }
  0x12   :  { %5229 = vmatpush3.bf16.msra.mxu1 %v5226_v8 }
  0xde   :  { %v4893_v11 = vpop.f32.mrb[0].mxu0 }
  0xdf   :  { %v145_v12 = vpop.f32.mrb[1].mxu0  ;;  %v5932_v14 = vadd.f32 %v4893_v11, %v67_v10 }
  0xe0   :  { %v5930_v13 = vadd.f32 %v145_v12, %v66_v9 }
  0xe2   :  { %4902 = vmatprep.mubr.msk.f32.mxu1 %vm167_vm2, %v5930_v13 }
  0xe3   :  { %4903 = vmatmul.mubr.msk.f32.vlgmr.msra.gmra.mrb[0].mxu1 %vm167_vm2, %v5932_v14 }
 0x1b6   :  { %v4904_v16 = vpop.f32.mrb[0].mxu1 }
 0x1b7   :  { %v5941_v17 = vadd.f32 %v4904_v16, %v4552_v15  ;;  %v240_v18 = vpop.f32.mrb[1].mxu1 }
 0x1b8   :  { %v5943_v19 = vadd.f32 %v4552_v15, %v240_v18 }
 0x1ba   :  { %449 = vrot.lane.b32.xlu1 %v5943_v19, %s6748_s2  ;;  %4909 = vmatprep.mubr.msk.f32.mxu0 %vm255_vm3, %v5943_v19  ;;  %v5951_v20 = vpack.i.bf16 %v5941_v17, %v5943_v19 }
 0x1bc   :  { %5477 = vrot.lane.b32.xlu0 %v5951_v20, %s6752_s21 }
 0x1be   :  { %451 = vrot.lane.b32.xlu1 %v5941_v17, %s6748_s2 }
 0x1c0   :  { %5482 = vrot.lane.b32.xlu0 %v5951_v20, %s6746_s22 }
 0x22c   :  { %v450_v30 = vpop.permute.xlu1 %449 }
 0x22e   :  { %v5478_v21 = vpop.permute.xlu0 %5477 }
 0x22f   :  { %v5480_v22 = vunpack.i.h.bf16 %v5478_v21  ;;  %v5479_v23 = vunpack.i.l.bf16 %v5478_v21 }
 0x230   :  { %v452_v31 = vpop.permute.xlu1 %451 }
 0x231   :  { %v5230_v25 = vpack.c.bf16 %v5480_v22, %v5479_v23 }
 0x232   :  { %v5483_v26 = vpop.permute.xlu0 %5482 }
 0x233   :  { %v5485_v27 = vunpack.i.h.bf16 %v5483_v26  ;;  %v5484_v28 = vunpack.i.l.bf16 %v5483_v26  ;;  %5232 = vmatprep.subr.msk.bf16.mxu0 %vm5961_vm4, %v5230_v25 }
 0x234   :  { %5235 = vmatpush3.bf16.xpose.msk.msra.mxu0 %vm5961_vm4, %v5230_v25 }
 0x235   :  { %v5240_v29 = vpack.c.bf16 %v5485_v27, %v5484_v28 }
 0x237   :  { %5242 = vmatprep.subr.msk.bf16.mxu0 %vm5961_vm4, %v5240_v29 }
 0x23b   :  { %4910 = vmatmul.mubr.msk.f32.vlgmr.msra.gmra.mrb[2].mxu0 %vm255_vm3, %v5941_v17 }
 0x23c   :  { %5245 = vmatpush3.bf16.xpose.msk.msra.mxu0 %vm5961_vm4, %v5240_v29  ;;  %4923 = vmatprep.mubr.msk.f32.mxu0 %vm255_vm3, %v450_v30 }
 0x243   :  { %4924 = vmatmul.mubr.msk.f32.vlgmr.msra.gmra.mrb[4].mxu0 %vm255_vm3, %v452_v31 }
 0x30e   :  { %v4911_v34 = vpop.f32.mrb[2].mxu0 }
 0x30f   :  { %v336_v35 = vadd.f32 %v4911_v34, %v5980_v32  ;;  %v330_v36 = vpop.f32.mrb[3].mxu0 }
 0x310   :  { %v331_v37 = vadd.f32 %v330_v36, %v5985_v33 }
 0x311   :  { %v343_v38 = vsel %vm339_vm5, %v336_v35, -inf }
 0x312   :  { %344 = vmax.xlane.f32.xlu1 %v343_v38  ;;  %v340_v39 = vsel %vm339_vm5, %v331_v37, -inf }
 0x313   :  { %341 = vmax.xlane.f32.xlu0 %v340_v39 }
 0x316   :  { %v4925_v40 = vpop.f32.mrb[4].mxu0 }
 0x317   :  { %v531_v41 = vpop.f32.mrb[5].mxu0  ;;  %v537_v43 = vadd.f32 %v4925_v40, %v5980_v32 }
 0x318   :  { %v532_v42 = vadd.f32 %v531_v41, %v5985_v33 }
 0x319   :  { %v543_v45 = vsel %vm339_vm5, %v537_v43, -inf }
 0x31a   :  { %v540_v44 = vsel %vm339_vm5, %v532_v42, -inf }
 0x31b   :  { %541 = vmax.xlane.f32.xlu0 %v540_v44 }
 0x31f   :  { %544 = vmax.xlane.f32.xlu0 %v543_v45 }
 0x323   :  { %5487 = vrot.lane.b32.xlu1 %v5951_v20, %s6750_s27 }
 0x39f   :  { %v345_v46 = vpop.xlane.xlu1 %344 }
 0x3a0   :  { %v347_v47 = vsub.f32 %v336_v35, %v345_v46  ;;  %v342_v48 = vpop.xlane.xlu0 %341 }
 0x3a1   :  { %v346_v49 = vsub.f32 %v331_v37, %v342_v48 }
 0x3a2   :  { %v350_v50 = vmul.f32 1.442695, %v347_v47 }
 0x3a3   :  { %v348_v51 = vmul.f32 1.442695, %v346_v49  ;;  %v5488_v52 = vpop.permute.xlu1 %5487 }
 0x3a4   :  { %5636 = vpow2.f32 %v350_v50  ;;  %v5490_v53 = vunpack.i.h.bf16 %v5488_v52  ;;  %v5489_v54 = vunpack.i.l.bf16 %v5488_v52 }
 0x3a5   :  { %5638 = vpow2.f32 %v348_v51 }
 0x3a6   :  { %v5236_v55 = vpack.c.bf16 %v5490_v53, %v5489_v54 }
 0x3a8   :  { %5237 = vmatprep.subr.bf16.mxu1 %v5236_v55  ;;  %v542_v56 = vpop.xlane.xlu0 %541 }
 0x3a9   :  { %5239 = vmatpush3.bf16.msra.mxu1 %v5236_v55  ;;  %v546_v2 = vsub.f32 %v532_v42, %v542_v56 }
 0x3ab   :  { %v548_v3 = vmul.f32 1.442695, %v546_v2 }
 0x3ac   :  { %v545_v57 = vpop.xlane.xlu0 %544 }
 0x3ad   :  { %v547_v58 = vsub.f32 %v537_v43, %v545_v57 }
 0x3ae   :  { %v5637_v59 = vpop.eup %5636 }
 0x3af   :  { %v5639_v60 = vpop.eup %5638  ;;  %v550_v61 = vmul.f32 1.442695, %v547_v58  ;;  %v355_v62 = vsel %vm339_vm5, %v5637_v59, 0.0 }
 0x3b0   :  { %356 = vadd.xlane.f32.xlu0 %v355_v62  ;;  %v352_v63 = vsel %vm339_vm5, %v5639_v60, 0.0 }
 0x3b1   :  { %5640 = vpow2.f32 %v550_v61  ;;  %353 = vadd.xlane.f32.xlu1 %v352_v63 }
 0x3b2   :  { %5642 = vpow2.f32 %v548_v3 }
 0x3bb   :  { %v5641_v0 = vpop.eup %5640 }
 0x3bc   :  { %v555_v1 = vsel %vm339_vm5, %v5641_v0, 0.0  ;;  %v5643_v4 = vpop.eup %5642 }
 0x3bd   :  { %556 = vadd.xlane.f32.xlu0 %v555_v1  ;;  %v552_v5 = vsel %vm339_vm5, %v5643_v4, 0.0 }
 0x3c2   :  { %5497 = vrot.lane.b32.xlu1 %v5951_v20, %s6744_s28 }
 0x3c6   :  { %5502 = vrot.lane.b32.xlu1 %v5951_v20, %s6738_s29  ;;  %s6770_s29 = smov 8  }
 0x3d3   :  { %5492 = vrot.lane.b32.xlu0 %v5951_v20, %s6742_s30 }
 0x3d7   :  { %649 = vrot.lane.b32.xlu0 %v5943_v19, %s6740_s1 }
 0x3db   :  { %849 = vrot.lane.b32.xlu0 %v5943_v19, %s6736_s19 }
 0x3ea   :  { %553 = vadd.xlane.f32.xlu1 %v552_v5 }
 0x3fb   :  { %651 = vrot.lane.b32.xlu1 %v5941_v17, %s6740_s1 }
 0x3ff   :  { %851 = vrot.lane.b32.xlu1 %v5941_v17, %s6736_s19  ;;  %s6771_s19 = smov 40  }
 0x43d   :  { %v357_v6 = vpop.xlane.xlu0 %356 }
 0x43e   :  { %5644 = vrcp.f32 %v357_v6  ;;  %v354_v7 = vpop.xlane.xlu1 %353 }
 0x43f   :  { %5646 = vrcp.f32 %v354_v7 }
 0x442   :  { %v5498_v8 = vpop.permute.xlu1 %5497 }
 0x443   :  { %v5500_v22 = vunpack.i.h.bf16 %v5498_v8  ;;  %v5499_v23 = vunpack.i.l.bf16 %v5498_v8 }
 0x445   :  { %v5250_v29 = vpack.c.bf16 %v5500_v22, %v5499_v23 }
 0x446   :  { %v5503_v9 = vpop.permute.xlu1 %5502 }
 0x447   :  { %v5505_v10 = vunpack.i.h.bf16 %v5503_v9  ;;  %v5504_v11 = vunpack.i.l.bf16 %v5503_v9 }
 0x448   :  { %v5645_v12 = vpop.eup %5644 }
 0x449   :  { %v5647_v15 = vpop.eup %5646  ;;  %v5260_v16 = vpack.c.bf16 %v5505_v10, %v5504_v11  ;;  %v361_v21 = vmul.f32 %v5645_v12, %v5637_v59 }
 0x44a   :  { %v557_v18 = vpop.xlane.xlu0 %556  ;;  %v359_v19 = vmul.f32 %v5647_v15, %v5639_v60 }
 0x44b   :  { %5262 = vmatprep.subr.msk.bf16.mxu0 %vm5961_vm4, %v5260_v16  ;;  %5648 = vrcp.f32 %v557_v18 }
 0x44c   :  { %4916 = vmatprep.mubr.msk.f32.mxu1 %vm339_vm5, %v359_v19  ;;  %5265 = vmatpush3.bf16.xpose.msk.msra.mxu0 %vm5961_vm4, %v5260_v16 }
 0x44d   :  { %4917 = vmatmul.mubr.msk.f32.vlgmr.msra.gmra.mrb[2].mxu1 %vm339_vm5, %v361_v21 }
 0x44e   :  { %v5493_v17 = vpop.permute.xlu0 %5492 }
 0x44f   :  { %v5495_v25 = vunpack.i.h.bf16 %v5493_v17  ;;  %v5494_v26 = vunpack.i.l.bf16 %v5493_v17 }
 0x451   :  { %v5246_v27 = vpack.c.bf16 %v5495_v25, %v5494_v26 }
 0x452   :  { %v650_v28 = vpop.permute.xlu0 %649 }
 0x453   :  { %5247 = vmatprep.subr.bf16.mxu1 %v5246_v27 }
 0x454   :  { %5249 = vmatpush3.bf16.msra.mxu1 %v5246_v27 }
 0x455   :  { %5252 = vmatprep.subr.msk.bf16.mxu1 %vm5961_vm4, %v5250_v29  ;;  %v5649_v36 = vpop.eup %5648 }
 0x456   :  { %v850_v30 = vpop.permute.xlu0 %849  ;;  %v561_v39 = vmul.f32 %v5649_v36, %v5641_v0 }
 0x457   :  { %4951 = vmatprep.mubr.msk.f32.mxu0 %vm255_vm3, %v850_v30 }
 0x477   :  { %v554_v31 = vpop.xlane.xlu1 %553 }
 0x478   :  { %5650 = vrcp.f32 %v554_v31 }
 0x47b   :  { %v652_v34 = vpop.permute.xlu1 %651 }
 0x47f   :  { %v852_v35 = vpop.permute.xlu1 %851 }
 0x480   :  { %4952 = vmatmul.mubr.msk.f32.vlgmr.msra.gmra.mrb[6].mxu0 %vm255_vm3, %v852_v35 }
 0x482   :  { %v5651_v37 = vpop.eup %5650 }
 0x483   :  { %v559_v38 = vmul.f32 %v5651_v37, %v5643_v4 }
 0x485   :  { %4930 = vmatprep.mubr.msk.f32.mxu1 %vm339_vm5, %v559_v38 }
 0x486   :  { %4931 = vmatmul.mubr.msk.f32.vlgmr.msra.gmra.mrb[4].mxu1 %vm339_vm5, %v561_v39 }
 0x487   :  { %5255 = vmatpush3.bf16.xpose.msk.msra.mxu1 %vm5961_vm4, %v5250_v29  ;;  %4937 = vmatprep.mubr.msk.f32.mxu1 %vm255_vm3, %v650_v28 }
 0x48e   :  { %4938 = vmatmul.mubr.msk.f32.vlgmr.msra.gmra.mrb[6].mxu1 %vm255_vm3, %v652_v34 }
 0x520   :  { %v6031_v40 = vpop.f32.mrb[2].mxu1 }
 0x521   :  { %v6033_v41 = vpop.f32.mrb[3].mxu1 }
 0x553   :  { %v4953_v42 = vpop.f32.mrb[6].mxu0 }
 0x554   :  { %v931_v43 = vpop.f32.mrb[7].mxu0  ;;  %v937_v53 = vadd.f32 %v4953_v42, %v5980_v32 }
 0x555   :  { %v932_v51 = vadd.f32 %v931_v43, %v5985_v33 }
 0x556   :  { %v943_v55 = vsel %vm339_vm5, %v937_v53, -inf }
 0x557   :  { %v940_v54 = vsel %vm339_vm5, %v932_v51, -inf }
 0x559   :  { %v4932_v44 = vpop.f32.mrb[4].mxu1 }
 0x55a   :  { %v640_v45 = vpop.f32.mrb[5].mxu1 }
 0x561   :  { %v4939_v46 = vpop.f32.mrb[6].mxu1 }
 0x562   :  { %v737_v47 = vadd.f32 %v4939_v46, %v5980_v32  ;;  %v731_v48 = vpop.f32.mrb[7].mxu1 }
 0x563   :  { %v732_v49 = vadd.f32 %v731_v48, %v5985_v33 }
 0x564   :  { %v743_v50 = vsel %vm339_vm5, %v737_v47, -inf }
 0x565   :  { %744 = vmax.xlane.f32.xlu1 %v743_v50  ;;  %v740_v52 = vsel %vm339_vm5, %v732_v49, -inf }
 0x566   :  { %741 = vmax.xlane.f32.xlu0 %v740_v52 }
 0x56a   :  { %941 = vmax.xlane.f32.xlu0 %v940_v54 }
 0x56e   :  { %944 = vmax.xlane.f32.xlu0 %v943_v55 }
 0x5f2   :  { %v745_v58 = vpop.xlane.xlu1 %744 }
 0x5f3   :  { %v742_v56 = vpop.xlane.xlu0 %741  ;;  %v747_v61 = vsub.f32 %v737_v47, %v745_v58 }
 0x5f4   :  { %v746_v57 = vsub.f32 %v732_v49, %v742_v56 }
 0x5f5   :  { %v750_v2 = vmul.f32 1.442695, %v747_v61 }
 0x5f6   :  { %v748_v62 = vmul.f32 1.442695, %v746_v57 }
 0x5f7   :  { %v942_v59 = vpop.xlane.xlu0 %941 }
 0x5f8   :  { %v946_v60 = vsub.f32 %v932_v51, %v942_v59 }
 0x5fa   :  { %v948_v63 = vmul.f32 1.442695, %v946_v60 }
 0x5fb   :  { %v945_v0 = vpop.xlane.xlu0 %944 }
 0x5fc   :  { %5652 = vpow2.f32 %v948_v63  ;;  %v947_v1 = vsub.f32 %v937_v53, %v945_v0 }
 0x5fd   :  { %5654 = vpow2.f32 %v748_v62 }
 0x5fe   :  { %v950_v3 = vmul.f32 1.442695, %v947_v1 }
 0x600   :  { %5656 = vpow2.f32 %v950_v3 }
 0x601   :  { %5658 = vpow2.f32 %v750_v2  ;;  %v1122_v2 = vld [vmem:[%s6711_s6 + $0x8] sm:$0xff] }
 0x606   :  { %v5653_v4 = vpop.eup %5652 }
 0x607   :  { %v952_v5 = vsel %vm339_vm5, %v5653_v4, 0.0  ;;  %v5655_v6 = vpop.eup %5654 }
 0x608   :  { %953 = vadd.xlane.f32.xlu1 %v952_v5  ;;  %v752_v8 = vsel %vm339_vm5, %v5655_v6, 0.0  ;;  %v1124_v5 = vld [vmem:[%s6711_s6 + $0x18] sm:$0xff] }
 0x60a   :  { %v5657_v7 = vpop.eup %5656 }
 0x60b   :  { %v955_v9 = vsel %vm339_vm5, %v5657_v7, 0.0  ;;  %v5659_v10 = vpop.eup %5658 }
 0x60c   :  { %753 = vadd.xlane.f32.xlu1 %v752_v8  ;;  %956 = vadd.xlane.f32.xlu0 %v955_v9  ;;  %v755_v11 = vsel %vm339_vm5, %v5659_v10, 0.0  ;;  %v1109_v9 = vlaneseq }
 0x610   :  { %756 = vadd.xlane.f32.xlu0 %v755_v11 }
 0x61d   :  { %5507 = vrot.lane.b32.xlu1 %v5951_v20, %s6734_s0  ;;  %s6769_s0 = smov 48  }
 0x621   :  { %1051 = vrot.lane.b32.xlu1 %v640_v45, %s6732_s20 }
 0x625   :  { %1053 = vrot.lane.b32.xlu1 %v4932_v44, %s6732_s20  ;;  %s6772_s20 = smov 16  }
 0x626   :  { %5512 = vrot.lane.b32.xlu0 %v5951_v20, %s6730_s23  ;;  %s6773_s23 = smov 24  }
 0x695   :  { %v954_v12 = vpop.xlane.xlu1 %953 }
 0x699   :  { %v754_v15 = vpop.xlane.xlu1 %753  ;;  %v957_v16 = vpop.xlane.xlu0 %956 }
 0x69a   :  { %5660 = vrcp.f32 %v754_v15  ;;  %v6087_v15 = vshrl.u32 %v1109_v9, 7 }
 0x69b   :  { %5662 = vrcp.f32 %v954_v12 }
 0x69d   :  { %v5508_v18 = vpop.permute.xlu1 %5507  ;;  %v757_v19 = vpop.xlane.xlu0 %756 }
 0x69e   :  { %v5510_v21 = vunpack.i.h.bf16 %v5508_v18  ;;  %v5509_v17 = vunpack.i.l.bf16 %v5508_v18  ;;  %5664 = vrcp.f32 %v757_v19  ;;  %v6090_v18 = vsub.s32 0, %v6087_v15  ;;  %v6095_v19 = vld [vmem:[%s6712_s12] sm:$0x7] }
 0x69f   :  { %5666 = vrcp.f32 %v957_v16 }
 0x6a0   :  { %v5256_v22 = vpack.c.bf16 %v5510_v21, %v5509_v17  ;;  %v6100_v21 = vld [vmem:[%s6713_s13] sm:$0x7]  ;;  %v1112_v17 = vrot.slane %v6095_v19, %v6090_v18 }
 0x6a1   :  { %v5513_v23 = vpop.permute.xlu0 %5512  ;;  %v1052_v43 = vpop.permute.xlu1 %1051 }
 0x6a2   :  { %v5515_v25 = vunpack.i.h.bf16 %v5513_v23  ;;  %v5514_v26 = vunpack.i.l.bf16 %v5513_v23  ;;  %5257 = vmatprep.subr.bf16.mxu1 %v5256_v22  ;;  %v1073_v48 = vsel %vm255_vm3, %v6033_v41, %v1052_v43 }
 0x6a3   :  { %5259 = vmatpush3.bf16.msra.mxu1 %v5256_v22 }
 0x6a4   :  { %v5661_v27 = vpop.eup %5660  ;;  %v5266_v28 = vpack.c.bf16 %v5515_v25, %v5514_v26  ;;  %v1118_v25 = vrot.slane %v6100_v21, %v6090_v18 }
 0x6a5   :  { %v759_v20 = vmul.f32 %v5661_v27, %v5655_v6  ;;  %v5663_v29 = vpop.eup %5662  ;;  %v1054_v44 = vpop.permute.xlu1 %1053 }
 0x6a6   :  { %5267 = vmatprep.subr.bf16.mxu1 %v5266_v28  ;;  %v959_v35 = vmul.f32 %v5663_v29, %v5653_v4  ;;  %v1074_v47 = vsel %vm255_vm3, %v6031_v40, %v1054_v44  ;;  %v1123_v4 = vld [vmem:[%s6711_s6 + $0x10] sm:$0xff] }
 0x6a7   :  { %4944 = vmatprep.mubr.msk.f32.mxu1 %vm339_vm5, %v759_v20  ;;  %v5274_v6 = vpack.c.bf16 %v1124_v5, %v1123_v4 }
 0x6a8   :  { %v5665_v30 = vpop.eup %5664 }
 0x6a9   :  { %v761_v31 = vmul.f32 %v5665_v30, %v5659_v10  ;;  %v5667_v34 = vpop.eup %5666 }
 0x6aa   :  { %v961_v36 = vmul.f32 %v5667_v34, %v5657_v7 }
 0x6ab   :  { %4945 = vmatmul.mubr.msk.f32.vlgmr.msra.gmra.mrb[8].mxu1 %vm339_vm5, %v761_v31  ;;  %v4579_v31 = vld [vmem:[%s6714_s7] ss:$0 sm:$0xff] }
 0x6ac   :  { %5269 = vmatpush3.bf16.msra.mxu1 %v5266_v28  ;;  %4958 = vmatprep.mubr.msk.f32.mxu1 %vm339_vm5, %v959_v35 }
 0x6af   :  { %4959 = vmatmul.mubr.msk.f32.vlgmr.msra.gmra.mrb[10].mxu1 %vm339_vm5, %v961_v36 }
 0x77e   :  { %v4946_v37 = vpop.f32.mrb[8].mxu1 }
 0x77f   :  { %1061 = vrot.lane.b32.xlu1 %v4946_v37, %s6728_s24  ;;  %v840_v38 = vpop.f32.mrb[9].mxu1 }
 0x780   :  { %1059 = vrot.lane.b32.xlu0 %v840_v38, %s6728_s24 }
 0x782   :  { %v4960_v39 = vpop.f32.mrb[10].mxu1 }
 0x783   :  { %1069 = vrot.lane.b32.xlu1 %v4960_v39, %s6726_s25  ;;  %v1040_v42 = vpop.f32.mrb[11].mxu1 }
 0x784   :  { %1067 = vrot.lane.b32.xlu0 %v1040_v42, %s6726_s25  ;;  %s6767_s25 = smov 72  }
 0x7f1   :  { %v1062_v45 = vpop.permute.xlu1 %1061 }
 0x7f2   :  { %v1060_v46 = vpop.permute.xlu0 %1059  ;;  %v1076_v49 = vsel %vm339_vm5, %v1074_v47, %v1062_v45 }
 0x7f3   :  { %v1075_v51 = vsel %vm339_vm5, %v1073_v48, %v1060_v46 }
 0x7f5   :  { %v1070_v50 = vpop.permute.xlu1 %1069 }
 0x7f6   :  { %v1079_v52 = vsel %vm1077_vm6, %v1076_v49, %v1070_v50  ;;  %v1068_v53 = vpop.permute.xlu0 %1067 }
 0x7f7   :  { %v1078_v54 = vsel %vm1077_vm6, %v1075_v51, %v1068_v53  ;;  %v1081_v55 = vadd.f32 %v1079_v52, %v5932_v14 }
 0x7f8   :  { %v1080_v56 = vadd.f32 %v1078_v54, %v5930_v13  ;;  %v1121_v13 = vld [vmem:[%s6711_s6] sm:$0xff] }
 0x7f9   :  { %v1085_v57 = vsel %vm167_vm2, %v1081_v55, 0.0  ;;  %v5270_v3 = vpack.c.bf16 %v1122_v2, %v1121_v13 }
 0x7fa   :  { %1086 = vadd.xlane.f32.xlu1 %v1085_v57  ;;  %v1082_v40 = vsel %vm167_vm2, %v1080_v56, 0.0 }
 0x7fb   :  { %1083 = vadd.xlane.f32.xlu0 %v1082_v40  ;;  %5271 = vmatprep.subr.bf16.mxu1 %v5270_v3 }
 0x7fc   :  { %5273 = vmatpush3.bf16.msra.mxu1 %v5270_v3 }
 0x7fd   :  { %5275 = vmatprep.subr.bf16.mxu1 %v5274_v6 }
 0x800   :  { %5277 = vmatpush3.bf16.msra.mxu1 %v5274_v6 }
 0x887   :  { %v1087_v41 = vpop.xlane.xlu1 %1086 }
 0x888   :  { %v1090_v58 = vmul.f32 0.03125, %v1087_v41  ;;  %v1084_v59 = vpop.xlane.xlu0 %1083 }
 0x889   :  { %v1089_v60 = vmul.f32 0.03125, %v1084_v59 }
 0x88a   :  { %v1092_v61 = vsub.f32 %v1081_v55, %v1090_v58 }
 0x88b   :  { %v1091_v62 = vsub.f32 %v1080_v56, %v1089_v60 }
 0x88c   :  { %v1094_v1 = vmul.f32 %v1092_v61, %v1092_v61 }
 0x88d   :  { %v1093_v63 = vmul.f32 %v1091_v62, %v1091_v62 }
 0x88e   :  { %v1098_v14 = vsel %vm167_vm2, %v1094_v1, 0.0 }
 0x88f   :  { %v1095_v0 = vsel %vm167_vm2, %v1093_v63, 0.0 }
 0x890   :  { %1096 = vadd.xlane.f32.xlu0 %v1095_v0 }
 0x894   :  { %1099 = vadd.xlane.f32.xlu0 %v1098_v14 }
 0x91d   :  { %v1097_v7 = vpop.xlane.xlu0 %1096 }
 0x91e   :  { %v1101_v8 = vmul.f32 0.03125, %v1097_v7 }
 0x920   :  { %v1103_v10 = vadd.f32 1e-05, %v1101_v8 }
 0x921   :  { %v1100_v11 = vpop.xlane.xlu0 %1099 }
 0x922   :  { %5668 = vrsqrt.f32 %v1103_v10  ;;  %v1102_v12 = vmul.f32 0.03125, %v1100_v11 }
 0x924   :  { %v1104_v16 = vadd.f32 1e-05, %v1102_v12 }
 0x926   :  { %5670 = vrsqrt.f32 %v1104_v16 }
 0x92c   :  { %v5669_v22 = vpop.eup %5668 }
 0x92d   :  { %v1107_v23 = vmul.f32 %v5669_v22, %v1091_v62 }
 0x92f   :  { %v1113_v26 = vmul.f32 %v1112_v17, %v1107_v23 }
 0x930   :  { %v5671_v27 = vpop.eup %5670 }
 0x931   :  { %v1108_v28 = vmul.f32 %v5671_v27, %v1092_v61  ;;  %v6106_v20 = vadd.f32 %v1118_v25, %v1113_v26 }
 0x933   :  { %v1114_v29 = vmul.f32 %v1112_v17, %v1108_v28  ;;  %4969 = vmatprep.mubr.msk.f32.mxu1 %vm167_vm2, %v6106_v20 }
 0x935   :  { %v6110_v30 = vadd.f32 %v1118_v25, %v1114_v29 }
 0x937   :  { %4970 = vmatmul.mubr.msk.f32.vlgmr.msra.gmra.mrb[12].mxu1 %vm167_vm2, %v6110_v30 }
 0xa0a   :  { %v4971_v34 = vpop.f32.mrb[12].mxu1 }
 0xa0b   :  { %v6117_v35 = vadd.f32 %v4971_v34, %v4579_v31  ;;  %v1204_v36 = vpop.f32.mrb[13].mxu1 }
 0xa0c   :  { %v6119_v37 = vadd.f32 %v4579_v31, %v1204_v36 }
 0xa0e   :  { %4976 = vmatprep.mubr.msk.f32.mxu0 %vm255_vm3, %v6119_v37  ;;  %v6125_v38 = vpack.i.bf16 %v6117_v35, %v6119_v37 }
 0xa10   :  { %5522 = vrot.lane.b32.xlu0 %v6125_v38, %s6746_s22  ;;  %5517 = vrot.lane.b32.xlu1 %v6125_v38, %s6752_s21  ;;  %s6780_s22 = smov 112  }
 0xa14   :  { %1411 = vrot.lane.b32.xlu1 %v6119_v37, %s6748_s2 }
 0xa18   :  { %1413 = vrot.lane.b32.xlu1 %v6117_v35, %s6748_s2  ;;  %s6779_s2 = smov 56  }
 0xa82   :  { %v5523_v39 = vpop.permute.xlu0 %5522  ;;  %v5518_v42 = vpop.permute.xlu1 %5517 }
 0xa83   :  { %v5525_v43 = vunpack.i.h.bf16 %v5523_v39  ;;  %v5524_v44 = vunpack.i.l.bf16 %v5523_v39  ;;  %v5520_v45 = vunpack.i.h.bf16 %v5518_v42  ;;  %v5519_v46 = vunpack.i.l.bf16 %v5518_v42 }
 0xa85   :  { %v5278_v47 = vpack.c.bf16 %v5520_v45, %v5519_v46  ;;  %v5288_v48 = vpack.c.bf16 %v5525_v43, %v5524_v44 }
 0xa86   :  { %v1412_v49 = vpop.permute.xlu1 %1411 }
 0xa87   :  { %5280 = vmatprep.subr.msk.bf16.mxu0 %vm5961_vm4, %v5278_v47 }
 0xa88   :  { %5283 = vmatpush3.bf16.xpose.msk.msra.mxu0 %vm5961_vm4, %v5278_v47 }
 0xa89   :  { %5290 = vmatprep.subr.msk.bf16.mxu0 %vm5961_vm4, %v5288_v48 }
 0xa8a   :  { %v1414_v50 = vpop.permute.xlu1 %1413 }
 0xa8f   :  { %4977 = vmatmul.mubr.msk.f32.vlgmr.msra.gmra.mrb[8].mxu0 %vm255_vm3, %v6117_v35 }
 0xa90   :  { %5293 = vmatpush3.bf16.xpose.msk.msra.mxu0 %vm5961_vm4, %v5288_v48  ;;  %4990 = vmatprep.mubr.msk.f32.mxu0 %vm255_vm3, %v1412_v49 }
 0xa97   :  { %4991 = vmatmul.mubr.msk.f32.vlgmr.msra.gmra.mrb[10].mxu0 %vm255_vm3, %v1414_v50 }
 0xb62   :  { %v4978_v51 = vpop.f32.mrb[8].mxu0 }
 0xb63   :  { %v1299_v52 = vadd.f32 %v4978_v51, %v5980_v32  ;;  %v1293_v53 = vpop.f32.mrb[9].mxu0 }
 0xb64   :  { %v1294_v54 = vadd.f32 %v1293_v53, %v5985_v33 }
 0xb65   :  { %v1305_v55 = vsel %vm339_vm5, %v1299_v52, -inf }
 0xb66   :  { %1306 = vmax.xlane.f32.xlu1 %v1305_v55  ;;  %v1302_v56 = vsel %vm339_vm5, %v1294_v54, -inf }
 0xb67   :  { %1303 = vmax.xlane.f32.xlu0 %v1302_v56 }
 0xb6a   :  { %v4992_v57 = vpop.f32.mrb[10].mxu0 }
 0xb6b   :  { %v1493_v40 = vpop.f32.mrb[11].mxu0  ;;  %v1499_v58 = vadd.f32 %v4992_v57, %v5980_v32 }
 0xb6c   :  { %v1494_v41 = vadd.f32 %v1493_v40, %v5985_v33 }
 0xb6d   :  { %v1505_v60 = vsel %vm339_vm5, %v1499_v58, -inf }
 0xb6e   :  { %v1502_v59 = vsel %vm339_vm5, %v1494_v41, -inf }
 0xb6f   :  { %1503 = vmax.xlane.f32.xlu0 %v1502_v59 }
 0xb73   :  { %1506 = vmax.xlane.f32.xlu0 %v1505_v60 }
 0xb77   :  { %5527 = vrot.lane.b32.xlu1 %v6125_v38, %s6750_s27  ;;  %s6774_s27 = smov 96  }
 0xbf3   :  { %v1307_v61 = vpop.xlane.xlu1 %1306 }
 0xbf4   :  { %v1309_v62 = vsub.f32 %v1299_v52, %v1307_v61  ;;  %v1304_v63 = vpop.xlane.xlu0 %1303 }
 0xbf5   :  { %v1308_v0 = vsub.f32 %v1294_v54, %v1304_v63 }
 0xbf6   :  { %v1312_v1 = vmul.f32 1.442695, %v1309_v62 }
 0xbf7   :  { %v1310_v14 = vmul.f32 1.442695, %v1308_v0  ;;  %v5528_v13 = vpop.permute.xlu1 %5527 }
 0xbf8   :  { %5672 = vpow2.f32 %v1312_v1  ;;  %v5530_v2 = vunpack.i.h.bf16 %v5528_v13  ;;  %v5529_v3 = vunpack.i.l.bf16 %v5528_v13 }
 0xbf9   :  { %5674 = vpow2.f32 %v1310_v14 }
 0xbfa   :  { %v5284_v4 = vpack.c.bf16 %v5530_v2, %v5529_v3 }
 0xbfc   :  { %5285 = vmatprep.subr.bf16.mxu1 %v5284_v4  ;;  %v1504_v5 = vpop.xlane.xlu0 %1503 }
 0xbfd   :  { %5287 = vmatpush3.bf16.msra.mxu1 %v5284_v4  ;;  %v1508_v22 = vsub.f32 %v1494_v41, %v1504_v5 }
 0xbff   :  { %v1510_v23 = vmul.f32 1.442695, %v1508_v22 }
 0xc00   :  { %v1507_v6 = vpop.xlane.xlu0 %1506 }
 0xc01   :  { %v1509_v7 = vsub.f32 %v1499_v58, %v1507_v6 }
 0xc02   :  { %v5673_v8 = vpop.eup %5672 }
 0xc03   :  { %v5675_v9 = vpop.eup %5674  ;;  %v1512_v10 = vmul.f32 1.442695, %v1509_v7  ;;  %v1317_v11 = vsel %vm339_vm5, %v5673_v8, 0.0 }
 0xc04   :  { %1318 = vadd.xlane.f32.xlu0 %v1317_v11  ;;  %v1314_v12 = vsel %vm339_vm5, %v5675_v9, 0.0 }
 0xc05   :  { %5676 = vpow2.f32 %v1512_v10  ;;  %1315 = vadd.xlane.f32.xlu1 %v1314_v12 }
 0xc06   :  { %5678 = vpow2.f32 %v1510_v23 }
 0xc0f   :  { %v5677_v16 = vpop.eup %5676 }
 0xc10   :  { %v1517_v17 = vsel %vm339_vm5, %v5677_v16, 0.0  ;;  %v5679_v25 = vpop.eup %5678 }
 0xc11   :  { %1518 = vadd.xlane.f32.xlu0 %v1517_v17  ;;  %v1514_v26 = vsel %vm339_vm5, %v5679_v25, 0.0 }
 0xc16   :  { %5537 = vrot.lane.b32.xlu1 %v6125_v38, %s6744_s28 }
 0xc27   :  { %5532 = vrot.lane.b32.xlu0 %v6125_v38, %s6742_s30  ;;  %s6778_s30 = smov 80  }
 0xc2b   :  { %1613 = vrot.lane.b32.xlu0 %v6117_v35, %s6740_s1 }
 0xc3a   :  { %1515 = vadd.xlane.f32.xlu1 %v1514_v26 }
 0xc4b   :  { %1611 = vrot.lane.b32.xlu1 %v6119_v37, %s6740_s1  ;;  %s6775_s1 = smov 64  }
 0xc91   :  { %v1319_v27 = vpop.xlane.xlu0 %1318 }
 0xc92   :  { %5680 = vrcp.f32 %v1319_v27  ;;  %v1316_v28 = vpop.xlane.xlu1 %1315 }
 0xc93   :  { %5682 = vrcp.f32 %v1316_v28 }
 0xc96   :  { %v5538_v42 = vpop.permute.xlu1 %5537 }
 0xc97   :  { %v5540_v44 = vunpack.i.h.bf16 %v5538_v42  ;;  %v5539_v45 = vunpack.i.l.bf16 %v5538_v42 }
 0xc99   :  { %v5298_v49 = vpack.c.bf16 %v5540_v44, %v5539_v45 }
 0xc9c   :  { %v5681_v29 = vpop.eup %5680 }
 0xc9d   :  { %v5683_v31 = vpop.eup %5682  ;;  %v1323_v39 = vmul.f32 %v5681_v29, %v5673_v8 }
 0xc9e   :  { %v1519_v34 = vpop.xlane.xlu0 %1518  ;;  %v1321_v36 = vmul.f32 %v5683_v31, %v5675_v9 }
 0xc9f   :  { %5684 = vrcp.f32 %v1519_v34 }
 0xca0   :  { %4983 = vmatprep.mubr.msk.f32.mxu1 %vm339_vm5, %v1321_v36 }
 0xca1   :  { %4984 = vmatmul.mubr.msk.f32.vlgmr.msra.gmra.mrb[14].mxu1 %vm339_vm5, %v1323_v39 }
 0xca2   :  { %v5533_v43 = vpop.permute.xlu0 %5532 }
 0xca3   :  { %v5535_v46 = vunpack.i.h.bf16 %v5533_v43  ;;  %v5534_v47 = vunpack.i.l.bf16 %v5533_v43 }
 0xca5   :  { %v5294_v48 = vpack.c.bf16 %v5535_v46, %v5534_v47 }
 0xca6   :  { %v1614_v56 = vpop.permute.xlu0 %1613 }
 0xca7   :  { %5295 = vmatprep.subr.bf16.mxu1 %v5294_v48 }
 0xca8   :  { %5297 = vmatpush3.bf16.msra.mxu1 %v5294_v48 }
 0xca9   :  { %5300 = vmatprep.subr.msk.bf16.mxu1 %vm5961_vm4, %v5298_v49  ;;  %v5685_v51 = vpop.eup %5684 }
 0xcaa   :  { %v1523_v54 = vmul.f32 %v5685_v51, %v5677_v16 }
 0xcc7   :  { %v1516_v50 = vpop.xlane.xlu1 %1515 }
 0xcc8   :  { %5686 = vrcp.f32 %v1516_v50 }
 0xccb   :  { %v1612_v55 = vpop.permute.xlu1 %1611 }
 0xcd2   :  { %v5687_v52 = vpop.eup %5686 }
 0xcd3   :  { %v1521_v53 = vmul.f32 %v5687_v52, %v5679_v25 }
 0xcd5   :  { %4997 = vmatprep.mubr.msk.f32.mxu1 %vm339_vm5, %v1521_v53 }
 0xcd6   :  { %4998 = vmatmul.mubr.msk.f32.vlgmr.msra.gmra.mrb[16].mxu1 %vm339_vm5, %v1523_v54 }
 0xcd7   :  { %5303 = vmatpush3.bf16.xpose.msk.msra.mxu1 %vm5961_vm4, %v5298_v49  ;;  %5004 = vmatprep.mubr.msk.f32.mxu1 %vm255_vm3, %v1612_v55 }
 0xcde   :  { %5005 = vmatmul.mubr.msk.f32.vlgmr.msra.gmra.mrb[18].mxu1 %vm255_vm3, %v1614_v56 }
 0xd74   :  { %v6179_v57 = vpop.f32.mrb[14].mxu1 }
 0xd75   :  { %v6181_v40 = vpop.f32.mrb[15].mxu1 }
 0xda9   :  { %v6183_v41 = vpop.f32.mrb[16].mxu1 }
 0xdaa   :  { %v6185_v58 = vpop.f32.mrb[17].mxu1 }
 0xdb1   :  { %v5006_v59 = vpop.f32.mrb[18].mxu1 }
 0xdb2   :  { %v1699_v60 = vadd.f32 %v5006_v59, %v5980_v32  ;;  %v1693_v61 = vpop.f32.mrb[19].mxu1 }
 0xdb3   :  { %v1694_v62 = vadd.f32 %v1693_v61, %v5985_v33 }
 0xdb4   :  { %v1705_v63 = vsel %vm339_vm5, %v1699_v60, -inf }
 0xdb5   :  { %1706 = vmax.xlane.f32.xlu0 %v1705_v63  ;;  %v1702_v0 = vsel %vm339_vm5, %v1694_v62, -inf }
 0xdb6   :  { %1703 = vmax.xlane.f32.xlu1 %v1702_v0 }
 0xe42   :  { %v1707_v1 = vpop.xlane.xlu0 %1706 }
 0xe43   :  { %v1709_v14 = vsub.f32 %v1699_v60, %v1707_v1  ;;  %v1704_v13 = vpop.xlane.xlu1 %1703 }
 0xe44   :  { %v1708_v2 = vsub.f32 %v1694_v62, %v1704_v13 }
 0xe45   :  { %v1712_v3 = vmul.f32 1.442695, %v1709_v14 }
 0xe46   :  { %v1710_v4 = vmul.f32 1.442695, %v1708_v2 }
 0xe47   :  { %5688 = vpow2.f32 %v1712_v3 }
 0xe48   :  { %5690 = vpow2.f32 %v1710_v4 }
 0xe51   :  { %v5689_v5 = vpop.eup %5688 }
 0xe52   :  { %v5691_v6 = vpop.eup %5690  ;;  %v1717_v7 = vsel %vm339_vm5, %v5689_v5, 0.0 }
 0xe53   :  { %1718 = vadd.xlane.f32.xlu1 %v1717_v7  ;;  %v1714_v8 = vsel %vm339_vm5, %v5691_v6, 0.0 }
 0xe54   :  { %1715 = vadd.xlane.f32.xlu0 %v1714_v8 }
 0xe64   :  { %5547 = vrot.lane.b32.xlu1 %v6125_v38, %s6767_s25 }
 0xe68   :  { %1811 = vrot.lane.b32.xlu1 %v6119_v37, %s6768_s26 }
 0xe6a   :  { %5542 = vrot.lane.b32.xlu0 %v6125_v38, %s6769_s0 }
 0xe6e   :  { %1813 = vrot.lane.b32.xlu0 %v6117_v35, %s6768_s26 }
 0xee0   :  { %v1719_v9 = vpop.xlane.xlu1 %1718 }
 0xee1   :  { %5692 = vrcp.f32 %v1719_v9  ;;  %v1716_v10 = vpop.xlane.xlu0 %1715 }
 0xee2   :  { %5694 = vrcp.f32 %v1716_v10 }
 0xee4   :  { %v5548_v11 = vpop.permute.xlu1 %5547 }
 0xee5   :  { %v5543_v12 = vpop.permute.xlu0 %5542  ;;  %v5550_v16 = vunpack.i.h.bf16 %v5548_v11  ;;  %v5549_v17 = vunpack.i.l.bf16 %v5548_v11 }
 0xee6   :  { %v5545_v22 = vunpack.i.h.bf16 %v5543_v12  ;;  %v5544_v23 = vunpack.i.l.bf16 %v5543_v12 }
 0xee7   :  { %v5308_v26 = vpack.c.bf16 %v5550_v16, %v5549_v17 }
 0xee8   :  { %v5304_v25 = vpack.c.bf16 %v5545_v22, %v5544_v23  ;;  %v1812_v29 = vpop.permute.xlu1 %1811 }
 0xee9   :  { %v1814_v31 = vpop.permute.xlu0 %1813 }
 0xeea   :  { %5305 = vmatprep.subr.bf16.mxu0 %v5304_v25 }
 0xeeb   :  { %v5693_v37 = vpop.eup %5692  ;;  %5307 = vmatpush3.bf16.msra.mxu0 %v5304_v25 }
 0xeec   :  { %v5695_v27 = vpop.eup %5694  ;;  %5310 = vmatprep.subr.msk.bf16.mxu0 %vm5961_vm4, %v5308_v26  ;;  %v1723_v28 = vmul.f32 %v5693_v37, %v5689_v5 }
 0xeed   :  { %v1721_v35 = vmul.f32 %v5695_v27, %v5691_v6 }
 0xeef   :  { %5011 = vmatprep.mubr.msk.f32.mxu0 %vm339_vm5, %v1721_v35 }
 0xef0   :  { %5012 = vmatmul.mubr.msk.f32.vlgmr.msra.gmra.mrb[12].mxu0 %vm339_vm5, %v1723_v28 }
 0xef1   :  { %5018 = vmatprep.mubr.msk.f32.mxu0 %vm255_vm3, %v1812_v29  ;;  %v2082_v29 = vld [vmem:[%s6715_s8 + $0x8] sm:$0xff] }
 0xef4   :  { %5313 = vmatpush3.bf16.xpose.msk.msra.mxu0 %vm5961_vm4, %v5308_v26 }
 0xefb   :  { %5019 = vmatmul.mubr.msk.f32.vlgmr.msra.gmra.mrb[14].mxu0 %vm255_vm3, %v1814_v31 }
 0xfc3   :  { %v5013_v34 = vpop.f32.mrb[12].mxu0 }
 0xfc4   :  { %v1802_v36 = vpop.f32.mrb[13].mxu0 }
 0xfce   :  { %v5020_v39 = vpop.f32.mrb[14].mxu0 }
 0xfcf   :  { %v1899_v42 = vadd.f32 %v5020_v39, %v5980_v32  ;;  %v1893_v43 = vpop.f32.mrb[15].mxu0 }
 0xfd0   :  { %v1894_v44 = vadd.f32 %v1893_v43, %v5985_v33  ;;  %v2176_v43 = vld [vmem:[%s6716_s10 + $0x8] sm:$0xff] }
 0xfd1   :  { %v1905_v45 = vsel %vm339_vm5, %v1899_v42, -inf }
 0xfd2   :  { %1906 = vmax.xlane.f32.xlu0 %v1905_v45  ;;  %v1902_v46 = vsel %vm339_vm5, %v1894_v44, -inf }
 0xfd3   :  { %1903 = vmax.xlane.f32.xlu1 %v1902_v46  ;;  %v2178_v46 = vld [vmem:[%s6716_s10 + $0x18] sm:$0xff] }
0x105f   :  { %v1907_v47 = vpop.xlane.xlu0 %1906 }
0x1060   :  { %v1909_v48 = vsub.f32 %v1899_v42, %v1907_v47  ;;  %v1904_v49 = vpop.xlane.xlu1 %1903  ;;  %v2175_v42 = vld [vmem:[%s6716_s10] sm:$0xff] }
0x1061   :  { %v1908_v50 = vsub.f32 %v1894_v44, %v1904_v49  ;;  %v2177_v44 = vld [vmem:[%s6716_s10 + $0x10] sm:$0xff]  ;;  %v5326_v45 = vpack.c.bf16 %v2176_v43, %v2175_v42  ;;  %v2180_v49 = vld [vmem:[%s6716_s10 + $0x28] sm:$0xff]  ;;  %v4617_v42 = vld [vmem:[%s6764_s4 + $0x38] sm:$0xff] }
0x1062   :  { %v1912_v51 = vmul.f32 1.442695, %v1909_v48  ;;  %v5330_v47 = vpack.c.bf16 %v2178_v46, %v2177_v44  ;;  %v2179_v48 = vld [vmem:[%s6716_s10 + $0x20] sm:$0xff] }
0x1063   :  { %v1910_v52 = vmul.f32 1.442695, %v1908_v50  ;;  %5327 = vmatprep.subr.bf16.mxu0 %v5326_v45  ;;  %v5334_v50 = vpack.c.bf16 %v2180_v49, %v2179_v48 }
0x1064   :  { %5696 = vpow2.f32 %v1912_v51  ;;  %5329 = vmatpush3.bf16.msra.mxu0 %v5326_v45 }
0x1065   :  { %5698 = vpow2.f32 %v1910_v52  ;;  %5331 = vmatprep.subr.bf16.mxu0 %v5330_v47 }
0x1068   :  { %5333 = vmatpush3.bf16.msra.mxu0 %v5330_v47 }
0x1069   :  { %5335 = vmatprep.subr.bf16.mxu0 %v5334_v50 }
0x106c   :  { %5337 = vmatpush3.bf16.msra.mxu0 %v5334_v50  ;;  %v6311_v50 = vsub.s32 2, %v6087_v15 }
0x106e   :  { %v5697_v53 = vpop.eup %5696 }
0x106f   :  { %v5699_v54 = vpop.eup %5698  ;;  %v1917_v32 = vsel %vm339_vm5, %v5697_v53, 0.0 }
0x1070   :  { %1918 = vadd.xlane.f32.xlu1 %v1917_v32  ;;  %v1914_v33 = vsel %vm339_vm5, %v5699_v54, 0.0 }
0x1071   :  { %1915 = vadd.xlane.f32.xlu0 %v1914_v33 }
0x1081   :  { %2013 = vrot.lane.b32.xlu1 %v6185_v58, %s6770_s29 }
0x1085   :  { %2015 = vrot.lane.b32.xlu1 %v6183_v41, %s6770_s29 }
0x1087   :  { %5552 = vrot.lane.b32.xlu0 %v6125_v38, %s6771_s19 }
0x1089   :  { %2023 = vrot.lane.b32.xlu1 %v5013_v34, %s6772_s20  ;;  %v2083_v34 = vld [vmem:[%s6715_s8 + $0x10] sm:$0xff] }
0x108b   :  { %2021 = vrot.lane.b32.xlu0 %v1802_v36, %s6772_s20  ;;  %v2084_v36 = vld [vmem:[%s6715_s8 + $0x18] sm:$0xff] }
0x108c   :  { %v5322_v39 = vpack.c.bf16 %v2084_v36, %v2083_v34  ;;  %v4615_v34 = vld [vmem:[%s6764_s4 + $0x28] sm:$0xff] }
0x10fd   :  { %v1919_v55 = vpop.xlane.xlu1 %1918 }
0x10fe   :  { %5700 = vrcp.f32 %v1919_v55  ;;  %v1916_v56 = vpop.xlane.xlu0 %1915  ;;  %v6272_v55 = vsub.s32 1, %v6087_v15  ;;  %v4619_v15 = vld [vmem:[%s6709_s5 + $0x1] ss:$0 sm:$0xff]  ;;  %s6776_s5 = smov 120  }
0x10ff   :  { %5702 = vrcp.f32 %v1916_v56 }
0x1100   :  { %v2072_v56 = vrot.slane %v6095_v19, %v6272_v55 }
0x1101   :  { %v2014_v14 = vpop.permute.xlu1 %2013 }
0x1102   :  { %v5553_v59 = vpop.permute.xlu0 %5552  ;;  %v2035_v5 = vsel %vm255_vm3, %v6181_v40, %v2014_v14  ;;  %v2182_v14 = vld [vmem:[%s6716_s10 + $0x38] sm:$0xff] }
0x1103   :  { %v5555_v60 = vunpack.i.h.bf16 %v5553_v59  ;;  %v5554_v61 = vunpack.i.l.bf16 %v5553_v59 }
0x1105   :  { %v5314_v62 = vpack.c.bf16 %v5555_v60, %v5554_v61  ;;  %v2016_v13 = vpop.permute.xlu1 %2015  ;;  %v2078_v61 = vrot.slane %v6100_v21, %v6272_v55 }
0x1106   :  { %v2022_v3 = vpop.permute.xlu0 %2021  ;;  %v2036_v4 = vsel %vm255_vm3, %v6179_v57, %v2016_v13 }
0x1107   :  { %5315 = vmatprep.subr.bf16.mxu1 %v5314_v62  ;;  %v2037_v8 = vsel %vm339_vm5, %v2035_v5, %v2022_v3 }
0x1108   :  { %v5701_v58 = vpop.eup %5700  ;;  %5317 = vmatpush3.bf16.msra.mxu1 %v5314_v62 }
0x1109   :  { %v5703_v63 = vpop.eup %5702  ;;  %v1923_v0 = vmul.f32 %v5701_v58, %v5697_v53  ;;  %v2024_v2 = vpop.permute.xlu1 %2023 }
0x110a   :  { %v1921_v41 = vmul.f32 %v5703_v63, %v5699_v54  ;;  %v2038_v6 = vsel %vm339_vm5, %v2036_v4, %v2024_v2  ;;  %v4606_v2 = vld [vmem:[%s6717_s9] ss:$0 sm:$0xff] }
0x110c   :  { %5025 = vmatprep.mubr.msk.f32.mxu1 %vm339_vm5, %v1921_v41 }
0x110d   :  { %5026 = vmatmul.mubr.msk.f32.vlgmr.msra.gmra.mrb[20].mxu1 %vm339_vm5, %v1923_v0 }
0x11e0   :  { %v5027_v38 = vpop.f32.mrb[20].mxu1 }
0x11e1   :  { %2031 = vrot.lane.b32.xlu1 %v5027_v38, %s6773_s23  ;;  %v2002_v1 = vpop.f32.mrb[21].mxu1 }
0x11e2   :  { %2029 = vrot.lane.b32.xlu0 %v2002_v1, %s6773_s23  ;;  %v2181_v1 = vld [vmem:[%s6716_s10 + $0x30] sm:$0xff] }
0x11e3   :  { %v5338_v13 = vpack.c.bf16 %v2182_v14, %v2181_v1 }
0x11e5   :  { %5339 = vmatprep.subr.bf16.mxu0 %v5338_v13 }
0x11e6   :  { %5341 = vmatpush3.bf16.msra.mxu0 %v5338_v13 }
0x1253   :  { %v2032_v7 = vpop.permute.xlu1 %2031 }
0x1254   :  { %v2040_v9 = vsel %vm1077_vm6, %v2038_v6, %v2032_v7  ;;  %v2030_v10 = vpop.permute.xlu0 %2029 }
0x1255   :  { %v2039_v11 = vsel %vm1077_vm6, %v2037_v8, %v2030_v10  ;;  %v2042_v12 = vadd.f32 %v2040_v9, %v6110_v30  ;;  %v4609_v9 = vld [vmem:[%s6718_s11] ss:$0 sm:$0xff] }
0x1256   :  { %v2041_v16 = vadd.f32 %v2039_v11, %v6106_v20  ;;  %v2081_v20 = vld [vmem:[%s6715_s8] sm:$0xff] }
0x1257   :  { %v2046_v17 = vsel %vm167_vm2, %v2042_v12, 0.0  ;;  %v5318_v31 = vpack.c.bf16 %v2082_v29, %v2081_v20 }
0x1258   :  { %2047 = vadd.xlane.f32.xlu1 %v2046_v17  ;;  %v2043_v57 = vsel %vm167_vm2, %v2041_v16, 0.0 }
0x1259   :  { %2044 = vadd.xlane.f32.xlu0 %v2043_v57  ;;  %5319 = vmatprep.subr.bf16.mxu1 %v5318_v31 }
0x125a   :  { %5321 = vmatpush3.bf16.msra.mxu1 %v5318_v31  ;;  %v4614_v31 = vld [vmem:[%s6764_s4 + $0x20] sm:$0xff] }
0x125b   :  { %5323 = vmatprep.subr.bf16.mxu1 %v5322_v39  ;;  %v5342_v36 = vpack.c.bf16 %v4615_v34, %v4614_v31 }
0x125e   :  { %5325 = vmatpush3.bf16.msra.mxu1 %v5322_v39  ;;  %v4616_v39 = vld [vmem:[%s6764_s4 + $0x30] sm:$0xff] }
0x125f   :  { %5343 = vmatprep.subr.bf16.mxu1 %v5342_v36  ;;  %v5346_v43 = vpack.c.bf16 %v4617_v42, %v4616_v39 }
0x12e5   :  { %v2048_v40 = vpop.xlane.xlu1 %2047 }
0x12e6   :  { %v2050_v22 = vmul.f32 0.03125, %v2048_v40  ;;  %v2045_v23 = vpop.xlane.xlu0 %2044 }
0x12e7   :  { %v2049_v25 = vmul.f32 0.03125, %v2045_v23 }
0x12e8   :  { %v2052_v26 = vsub.f32 %v2042_v12, %v2050_v22 }
0x12e9   :  { %v2051_v37 = vsub.f32 %v2041_v16, %v2049_v25 }
0x12ea   :  { %v2054_v28 = vmul.f32 %v2052_v26, %v2052_v26 }
0x12eb   :  { %v2053_v27 = vmul.f32 %v2051_v37, %v2051_v37 }
0x12ec   :  { %v2058_v30 = vsel %vm167_vm2, %v2054_v28, 0.0 }
0x12ed   :  { %v2055_v35 = vsel %vm167_vm2, %v2053_v27, 0.0 }
0x12ee   :  { %2056 = vadd.xlane.f32.xlu0 %v2055_v35 }
0x12f2   :  { %2059 = vadd.xlane.f32.xlu0 %v2058_v30 }
0x137b   :  { %v2057_v51 = vpop.xlane.xlu0 %2056 }
0x137c   :  { %v2061_v52 = vmul.f32 0.03125, %v2057_v51  ;;  %v2303_v51 = vrot.slane %v6095_v19, %v6311_v50 }
0x137e   :  { %v2063_v53 = vadd.f32 1e-05, %v2061_v52 }
0x137f   :  { %v2060_v54 = vpop.xlane.xlu0 %2059 }
0x1380   :  { %5704 = vrsqrt.f32 %v2063_v53  ;;  %v2062_v32 = vmul.f32 0.03125, %v2060_v54 }
0x1382   :  { %v2064_v33 = vadd.f32 1e-05, %v2062_v32 }
0x1384   :  { %5706 = vrsqrt.f32 %v2064_v33  ;;  %v2309_v33 = vrot.slane %v6100_v21, %v6311_v50 }
0x138a   :  { %v5705_v59 = vpop.eup %5704 }
0x138b   :  { %v2067_v60 = vmul.f32 %v5705_v59, %v2051_v37 }
0x138d   :  { %v2073_v62 = vmul.f32 %v2072_v56, %v2067_v60 }
0x138e   :  { %v5707_v58 = vpop.eup %5706 }
0x138f   :  { %v2068_v63 = vmul.f32 %v5707_v58, %v2052_v26  ;;  %v2079_v41 = vadd.f32 %v2078_v61, %v2073_v62 }
0x1391   :  { %v2074_v0 = vmul.f32 %v2072_v56, %v2068_v63  ;;  %5036 = vmatprep.mubr.msk.f32.mxu1 %vm167_vm2, %v2079_v41 }
0x1393   :  { %v2080_v38 = vadd.f32 %v2078_v61, %v2074_v0 }
0x1395   :  { %5037 = vmatmul.mubr.msk.f32.vlgmr.msra.gmra.mrb[22].mxu1 %vm167_vm2, %v2080_v38 }
0x1396   :  { %5345 = vmatpush3.bf16.msra.mxu1 %v5342_v36 }
0x1397   :  { %5347 = vmatprep.subr.bf16.mxu1 %v5346_v43 }
0x139a   :  { %5349 = vmatpush3.bf16.msra.mxu1 %v5346_v43 }
0x1468   :  { %v5038_v3 = vpop.f32.mrb[22].mxu1 }
0x1469   :  { %v2170_v4 = vadd.f32 %v5038_v3, %v4606_v2  ;;  %v2164_v5 = vpop.f32.mrb[23].mxu1 }
0x146a   :  { %v2165_v6 = vadd.f32 %v4606_v2, %v2164_v5 }
0x146b   :  { %v2174_v8 = vmax.f32 %v2170_v4, 0.0 }
0x146c   :  { %v2173_v7 = vmax.f32 %v2165_v6, 0.0  ;;  %v6355_v6 = vld [vmem:[%s6710_s3] sm:$0xff] }
0x146e   :  { %5055 = vmatprep.mubr.msk.f32.mxu0 %vm2190_vm7, %v2173_v7 }
0x146f   :  { %5056 = vmatmul.mubr.msk.f32.vlgmr.msra.gmra.mrb[16].mxu0 %vm2190_vm7, %v2174_v8  ;;  %v6361_v8 = vld [vmem:[%s6710_s3 + $0x8] sm:$0xff]  ;;  %s6777_s3 = smov 88  }
0x1542   :  { %v5057_v10 = vpop.f32.mrb[16].mxu0 }
0x1543   :  { %v2269_v11 = vadd.f32 %v5057_v10, %v4609_v9  ;;  %v2263_v12 = vpop.f32.mrb[17].mxu0 }
0x1544   :  { %v2264_v16 = vadd.f32 %v4609_v9, %v2263_v12 }
0x1545   :  { %v2273_v17 = vadd.f32 %v2269_v11, %v2080_v38 }
0x1546   :  { %v2272_v57 = vadd.f32 %v2264_v16, %v2079_v41 }
0x1547   :  { %v2277_v40 = vsel %vm167_vm2, %v2273_v17, 0.0 }
0x1548   :  { %2278 = vadd.xlane.f32.xlu0 %v2277_v40  ;;  %v2274_v22 = vsel %vm167_vm2, %v2272_v57, 0.0 }
0x1549   :  { %2275 = vadd.xlane.f32.xlu1 %v2274_v22 }
0x15d5   :  { %v2279_v23 = vpop.xlane.xlu0 %2278 }
0x15d6   :  { %v2281_v25 = vmul.f32 0.03125, %v2279_v23  ;;  %v2276_v26 = vpop.xlane.xlu1 %2275 }
0x15d7   :  { %v2280_v37 = vmul.f32 0.03125, %v2276_v26 }
0x15d8   :  { %v2283_v27 = vsub.f32 %v2273_v17, %v2281_v25 }
0x15d9   :  { %v2282_v35 = vsub.f32 %v2272_v57, %v2280_v37 }
0x15da   :  { %v2285_v28 = vmul.f32 %v2283_v27, %v2283_v27 }
0x15db   :  { %v2284_v30 = vmul.f32 %v2282_v35, %v2282_v35 }
0x15dc   :  { %v2289_v20 = vsel %vm167_vm2, %v2285_v28, 0.0 }
0x15dd   :  { %2290 = vadd.xlane.f32.xlu0 %v2289_v20  ;;  %v2286_v29 = vsel %vm167_vm2, %v2284_v30, 0.0 }
0x15de   :  { %2287 = vadd.xlane.f32.xlu1 %v2286_v29 }
0x166a   :  { %v2291_v44 = vpop.xlane.xlu0 %2290 }
0x166b   :  { %v2293_v45 = vmul.f32 0.03125, %v2291_v44  ;;  %v2288_v46 = vpop.xlane.xlu1 %2287 }
0x166c   :  { %v2292_v47 = vmul.f32 0.03125, %v2288_v46 }
0x166d   :  { %v2295_v48 = vadd.f32 1e-05, %v2293_v45 }
0x166e   :  { %v2294_v49 = vadd.f32 1e-05, %v2292_v47 }
0x166f   :  { %5708 = vrsqrt.f32 %v2295_v48 }
0x1670   :  { %5710 = vrsqrt.f32 %v2294_v49 }
0x1679   :  { %v5709_v52 = vpop.eup %5708 }
0x167a   :  { %v5711_v53 = vpop.eup %5710  ;;  %v2299_v54 = vmul.f32 %v5709_v52, %v2283_v27 }
0x167b   :  { %v2298_v32 = vmul.f32 %v5711_v53, %v2282_v35 }
0x167c   :  { %v2305_v56 = vmul.f32 %v2303_v51, %v2299_v54 }
0x167d   :  { %v2304_v59 = vmul.f32 %v2303_v51, %v2298_v32 }
0x167e   :  { %v6319_v61 = vadd.f32 %v2309_v33, %v2305_v56 }
0x167f   :  { %v6317_v60 = vadd.f32 %v2309_v33, %v2304_v59 }
0x1681   :  { %5066 = vmatprep.mubr.msk.f32.mxu1 %vm167_vm2, %v6317_v60 }
0x1682   :  { %5067 = vmatmul.mubr.msk.f32.vlgmr.msra.gmra.mrb[24].mxu1 %vm167_vm2, %v6319_v61 }
0x1755   :  { %v5068_v19 = vpop.f32.mrb[24].mxu1 }
0x1756   :  { %v6328_v62 = vadd.f32 %v5068_v19, %v4619_v15  ;;  %v2401_v21 = vpop.f32.mrb[25].mxu1 }
0x1757   :  { %v6330_v58 = vadd.f32 %v4619_v15, %v2401_v21 }
0x1759   :  { %5073 = vmatprep.mubr.msk.f32.mxu1 %vm255_vm3, %v6330_v58  ;;  %v6336_v63 = vpack.i.bf16 %v6328_v62, %v6330_v58 }
0x175b   :  { %5557 = vrot.lane.b32.xlu1 %v6336_v63, %s6774_s27 }
0x175f   :  { %5562 = vrot.lane.b32.xlu1 %v6336_v63, %s6775_s1 }
0x1763   :  { %2608 = vrot.lane.b32.xlu1 %v6330_v58, %s6776_s5 }
0x1767   :  { %2610 = vrot.lane.b32.xlu1 %v6328_v62, %s6776_s5 }
0x17cd   :  { %v5558_v41 = vpop.permute.xlu1 %5557 }
0x17ce   :  { %v5560_v0 = vunpack.i.h.bf16 %v5558_v41  ;;  %v5559_v38 = vunpack.i.l.bf16 %v5558_v41 }
0x17d0   :  { %v5350_v1 = vpack.c.bf16 %v5560_v0, %v5559_v38 }
0x17d1   :  { %v5563_v14 = vpop.permute.xlu1 %5562 }
0x17d2   :  { %v5565_v13 = vunpack.i.h.bf16 %v5563_v14  ;;  %v5564_v2 = vunpack.i.l.bf16 %v5563_v14  ;;  %5352 = vmatprep.subr.msk.bf16.mxu1 %vm5961_vm4, %v5350_v1 }
0x17d3   :  { %5355 = vmatpush3.bf16.xpose.msk.msra.mxu1 %vm5961_vm4, %v5350_v1 }
0x17d4   :  { %v5356_v3 = vpack.c.bf16 %v5565_v13, %v5564_v2 }
0x17d5   :  { %v2609_v42 = vpop.permute.xlu1 %2608 }
0x17d6   :  { %5357 = vmatprep.subr.bf16.mxu0 %v5356_v3 }
0x17d7   :  { %5359 = vmatpush3.bf16.msra.mxu0 %v5356_v3 }
0x17d9   :  { %v2611_v43 = vpop.permute.xlu1 %2610 }
0x17da   :  { %5074 = vmatmul.mubr.msk.f32.vlgmr.msra.gmra.mrb[26].mxu1 %vm255_vm3, %v6328_v62 }
0x18ad   :  { %v5075_v4 = vpop.f32.mrb[26].mxu1 }
0x18ae   :  { %v2490_v5 = vpop.f32.mrb[27].mxu1  ;;  %v2496_v9 = vadd.f32 %v6361_v8, %v5075_v4 }
0x18af   :  { %v2491_v7 = vadd.f32 %v6355_v6, %v2490_v5 }
0x18b0   :  { %v2502_v11 = vsel %vm339_vm5, %v2496_v9, -inf }
0x18b1   :  { %v2499_v10 = vsel %vm339_vm5, %v2491_v7, -inf }
0x18b2   :  { %2500 = vmax.xlane.f32.xlu0 %v2499_v10 }
0x18b6   :  { %2503 = vmax.xlane.f32.xlu0 %v2502_v11 }
0x193f   :  { %v2501_v12 = vpop.xlane.xlu0 %2500 }
0x1940   :  { %v2505_v16 = vsub.f32 %v2491_v7, %v2501_v12 }
0x1942   :  { %v2507_v40 = vmul.f32 1.442695, %v2505_v16 }
0x1943   :  { %v2504_v17 = vpop.xlane.xlu0 %2503 }
0x1944   :  { %v2506_v57 = vsub.f32 %v2496_v9, %v2504_v17 }
0x1946   :  { %v2509_v22 = vmul.f32 1.442695, %v2506_v57 }
0x1948   :  { %5712 = vpow2.f32 %v2509_v22 }
0x1949   :  { %5714 = vpow2.f32 %v2507_v40 }
0x1952   :  { %v5713_v23 = vpop.eup %5712 }
0x1953   :  { %v2514_v25 = vsel %vm339_vm5, %v5713_v23, 0.0  ;;  %v5715_v26 = vpop.eup %5714 }
0x1954   :  { %2515 = vadd.xlane.f32.xlu0 %v2514_v25  ;;  %v2511_v37 = vsel %vm339_vm5, %v5715_v26, 0.0 }
0x1958   :  { %2512 = vadd.xlane.f32.xlu0 %v2511_v37 }
0x196e   :  { %5567 = vrot.lane.b32.xlu0 %v6336_v63, %s6777_s3 }
0x19e1   :  { %v2516_v27 = vpop.xlane.xlu0 %2515 }
0x19e2   :  { %5716 = vrcp.f32 %v2516_v27 }
0x19e5   :  { %v2513_v35 = vpop.xlane.xlu0 %2512 }
0x19e6   :  { %5718 = vrcp.f32 %v2513_v35 }
0x19e9   :  { %v5568_v28 = vpop.permute.xlu0 %5567 }
0x19ea   :  { %v5570_v30 = vunpack.i.h.bf16 %v5568_v28  ;;  %v5569_v20 = vunpack.i.l.bf16 %v5568_v28 }
0x19ec   :  { %v5360_v29 = vpack.c.bf16 %v5570_v30, %v5569_v20  ;;  %v5717_v31 = vpop.eup %5716 }
0x19ed   :  { %v2520_v39 = vmul.f32 %v5717_v31, %v5713_v23 }
0x19ee   :  { %5362 = vmatprep.subr.msk.bf16.mxu0 %vm5961_vm4, %v5360_v29 }
0x19f0   :  { %v5719_v34 = vpop.eup %5718 }
0x19f1   :  { %v2518_v36 = vmul.f32 %v5719_v34, %v5715_v26 }
0x19f3   :  { %5080 = vmatprep.mubr.msk.f32.mxu0 %vm339_vm5, %v2518_v36 }
0x19f4   :  { %5081 = vmatmul.mubr.msk.f32.vlgmr.msra.gmra.mrb[18].mxu0 %vm339_vm5, %v2520_v39 }
0x19f5   :  { %5365 = vmatpush3.bf16.xpose.msk.msra.mxu0 %vm5961_vm4, %v5360_v29  ;;  %5087 = vmatprep.mubr.msk.f32.mxu0 %vm255_vm3, %v2609_v42 }
0x19fc   :  { %5088 = vmatmul.mubr.msk.f32.vlgmr.msra.gmra.mrb[20].mxu0 %vm255_vm3, %v2611_v43 }
0x1ac7   :  { %v6378_v44 = vpop.f32.mrb[18].mxu0 }
0x1ac8   :  { %v6380_v45 = vpop.f32.mrb[19].mxu0 }
0x1acf   :  { %v5089_v46 = vpop.f32.mrb[20].mxu0 }
0x1ad0   :  { %v2696_v47 = vadd.f32 %v6361_v8, %v5089_v46  ;;  %v2690_v48 = vpop.f32.mrb[21].mxu0 }
0x1ad1   :  { %v2691_v49 = vadd.f32 %v6355_v6, %v2690_v48 }
0x1ad2   :  { %v2702_v51 = vsel %vm339_vm5, %v2696_v47, -inf }
0x1ad3   :  { %2703 = vmax.xlane.f32.xlu0 %v2702_v51  ;;  %v2699_v52 = vsel %vm339_vm5, %v2691_v49, -inf }
0x1ad4   :  { %2700 = vmax.xlane.f32.xlu1 %v2699_v52 }
0x1ae5   :  { %5577 = vrot.lane.b32.xlu1 %v6336_v63, %s6778_s30 }
0x1ae9   :  { %5572 = vrot.lane.b32.xlu0 %v6336_v63, %s6779_s2 }
0x1aed   :  { %2810 = vrot.lane.b32.xlu0 %v6328_v62, %s6780_s22 }
0x1b60   :  { %v2704_v53 = vpop.xlane.xlu0 %2703 }
0x1b61   :  { %v2706_v54 = vsub.f32 %v2696_v47, %v2704_v53  ;;  %v2701_v32 = vpop.xlane.xlu1 %2700 }
0x1b62   :  { %v2705_v33 = vsub.f32 %v2691_v49, %v2701_v32 }
0x1b63   :  { %v2709_v56 = vmul.f32 1.442695, %v2706_v54 }
0x1b64   :  { %v2707_v59 = vmul.f32 1.442695, %v2705_v33  ;;  %v5573_v15 = vpop.permute.xlu0 %5572 }
0x1b65   :  { %5720 = vpow2.f32 %v2709_v56  ;;  %v5575_v19 = vunpack.i.h.bf16 %v5573_v15  ;;  %v5574_v21 = vunpack.i.l.bf16 %v5573_v15  ;;  %v5578_v41 = vpop.permute.xlu1 %5577 }
0x1b66   :  { %v5580_v0 = vunpack.i.h.bf16 %v5578_v41  ;;  %v5579_v38 = vunpack.i.l.bf16 %v5578_v41  ;;  %5722 = vpow2.f32 %v2707_v59 }
0x1b67   :  { %v5366_v1 = vpack.c.bf16 %v5575_v19, %v5574_v21 }
0x1b68   :  { %v5370_v14 = vpack.c.bf16 %v5580_v0, %v5579_v38  ;;  %v2811_v17 = vpop.permute.xlu0 %2810 }
0x1b69   :  { %5367 = vmatprep.subr.bf16.mxu1 %v5366_v1 }
0x1b6a   :  { %5369 = vmatpush3.bf16.msra.mxu1 %v5366_v1 }
0x1b6b   :  { %5372 = vmatprep.subr.msk.bf16.mxu1 %vm5961_vm4, %v5370_v14 }
0x1b6f   :  { %v5721_v13 = vpop.eup %5720 }
0x1b70   :  { %v2714_v2 = vsel %vm339_vm5, %v5721_v13, 0.0  ;;  %v5723_v3 = vpop.eup %5722 }
0x1b71   :  { %2715 = vadd.xlane.f32.xlu1 %v2714_v2  ;;  %v2711_v4 = vsel %vm339_vm5, %v5723_v3, 0.0 }
0x1b75   :  { %2712 = vadd.xlane.f32.xlu1 %v2711_v4 }
0x1b86   :  { %2808 = vrot.lane.b32.xlu1 %v6330_v58, %s6780_s22 }
0x1bfe   :  { %v2716_v5 = vpop.xlane.xlu1 %2715 }
0x1bff   :  { %5724 = vrcp.f32 %v2716_v5 }
0x1c02   :  { %v2713_v7 = vpop.xlane.xlu1 %2712 }
0x1c03   :  { %5726 = vrcp.f32 %v2713_v7 }
0x1c06   :  { %v2809_v16 = vpop.permute.xlu1 %2808 }
0x1c09   :  { %v5725_v9 = vpop.eup %5724 }
0x1c0a   :  { %v2720_v12 = vmul.f32 %v5725_v9, %v5721_v13 }
0x1c0d   :  { %v5727_v10 = vpop.eup %5726 }
0x1c0e   :  { %v2718_v11 = vmul.f32 %v5727_v10, %v5723_v3 }
0x1c10   :  { %5094 = vmatprep.mubr.msk.f32.mxu1 %vm339_vm5, %v2718_v11 }
0x1c11   :  { %5095 = vmatmul.mubr.msk.f32.vlgmr.msra.gmra.mrb[28].mxu1 %vm339_vm5, %v2720_v12 }
0x1c12   :  { %5375 = vmatpush3.bf16.xpose.msk.msra.mxu1 %vm5961_vm4, %v5370_v14  ;;  %5101 = vmatprep.mubr.msk.f32.mxu1 %vm255_vm3, %v2809_v16 }
0x1c19   :  { %5102 = vmatmul.mubr.msk.f32.vlgmr.msra.gmra.mrb[30].mxu1 %vm255_vm3, %v2811_v17 }
0x1ce4   :  { %v6404_v57 = vpop.f32.mrb[28].mxu1 }
0x1ce5   :  { %v6406_v40 = vpop.f32.mrb[29].mxu1 }
0x1cec   :  { %v5103_v22 = vpop.f32.mrb[30].mxu1 }
0x1ced   :  { %v2896_v23 = vadd.f32 %v6361_v8, %v5103_v22  ;;  %v2890_v25 = vpop.f32.mrb[31].mxu1 }
0x1cee   :  { %v2891_v26 = vadd.f32 %v6355_v6, %v2890_v25 }
0x1cef   :  { %v2902_v37 = vsel %vm339_vm5, %v2896_v23, -inf }
0x1cf0   :  { %2903 = vmax.xlane.f32.xlu0 %v2902_v37  ;;  %v2899_v27 = vsel %vm339_vm5, %v2891_v26, -inf }
0x1cf1   :  { %2900 = vmax.xlane.f32.xlu1 %v2899_v27 }
0x1d7d   :  { %v2904_v35 = vpop.xlane.xlu0 %2903 }
0x1d7e   :  { %v2906_v28 = vsub.f32 %v2896_v23, %v2904_v35  ;;  %v2901_v30 = vpop.xlane.xlu1 %2900 }
0x1d7f   :  { %v2905_v20 = vsub.f32 %v2891_v26, %v2901_v30 }
0x1d80   :  { %v2909_v29 = vmul.f32 1.442695, %v2906_v28 }
0x1d81   :  { %v2907_v31 = vmul.f32 1.442695, %v2905_v20 }
0x1d82   :  { %5728 = vpow2.f32 %v2909_v29 }
0x1d83   :  { %5730 = vpow2.f32 %v2907_v31 }
0x1d8c   :  { %v5729_v34 = vpop.eup %5728 }
0x1d8d   :  { %v5731_v36 = vpop.eup %5730  ;;  %v2914_v39 = vsel %vm339_vm5, %v5729_v34, 0.0 }
0x1d8e   :  { %2915 = vadd.xlane.f32.xlu1 %v2914_v39  ;;  %v2911_v42 = vsel %vm339_vm5, %v5731_v36, 0.0 }
0x1d8f   :  { %2912 = vadd.xlane.f32.xlu0 %v2911_v42 }
0x1d9f   :  { %5587 = vrot.lane.b32.xlu1 %v6336_v63, %s6767_s25 }
0x1da3   :  { %3008 = vrot.lane.b32.xlu1 %v6330_v58, %s6768_s26 }
0x1da5   :  { %5582 = vrot.lane.b32.xlu0 %v6336_v63, %s6769_s0 }
0x1da9   :  { %3010 = vrot.lane.b32.xlu0 %v6328_v62, %s6768_s26 }
0x1e1b   :  { %v2916_v43 = vpop.xlane.xlu1 %2915 }
0x1e1c   :  { %5732 = vrcp.f32 %v2916_v43  ;;  %v2913_v46 = vpop.xlane.xlu0 %2912 }
0x1e1d   :  { %5734 = vrcp.f32 %v2913_v46 }
0x1e1f   :  { %v5588_v47 = vpop.permute.xlu1 %5587 }
0x1e20   :  { %v5583_v48 = vpop.permute.xlu0 %5582  ;;  %v5590_v49 = vunpack.i.h.bf16 %v5588_v47  ;;  %v5589_v51 = vunpack.i.l.bf16 %v5588_v47 }
0x1e21   :  { %v5585_v52 = vunpack.i.h.bf16 %v5583_v48  ;;  %v5584_v53 = vunpack.i.l.bf16 %v5583_v48 }
0x1e22   :  { %v5380_v32 = vpack.c.bf16 %v5590_v49, %v5589_v51 }
0x1e23   :  { %v5376_v54 = vpack.c.bf16 %v5585_v52, %v5584_v53  ;;  %v3009_v59 = vpop.permute.xlu1 %3008 }
0x1e24   :  { %v3011_v15 = vpop.permute.xlu0 %3010 }
0x1e25   :  { %5377 = vmatprep.subr.bf16.mxu0 %v5376_v54 }
0x1e26   :  { %v5733_v58 = vpop.eup %5732  ;;  %5379 = vmatpush3.bf16.msra.mxu0 %v5376_v54 }
0x1e27   :  { %v5735_v33 = vpop.eup %5734  ;;  %5382 = vmatprep.subr.msk.bf16.mxu0 %vm5961_vm4, %v5380_v32  ;;  %v2920_v56 = vmul.f32 %v5733_v58, %v5729_v34 }
0x1e28   :  { %v2918_v62 = vmul.f32 %v5735_v33, %v5731_v36 }
0x1e2a   :  { %5108 = vmatprep.mubr.msk.f32.mxu0 %vm339_vm5, %v2918_v62 }
0x1e2b   :  { %5109 = vmatmul.mubr.msk.f32.vlgmr.msra.gmra.mrb[22].mxu0 %vm339_vm5, %v2920_v56 }
0x1e2c   :  { %5115 = vmatprep.mubr.msk.f32.mxu0 %vm255_vm3, %v3009_v59 }
0x1e2f   :  { %5385 = vmatpush3.bf16.xpose.msk.msra.mxu0 %vm5961_vm4, %v5380_v32 }
0x1e36   :  { %5116 = vmatmul.mubr.msk.f32.vlgmr.msra.gmra.mrb[24].mxu0 %vm255_vm3, %v3011_v15  ;;  %v4647_v15 = vld [vmem:[%s6711_s6 + $0x28] sm:$0xff] }
0x1efe   :  { %v5110_v19 = vpop.f32.mrb[22].mxu0 }
0x1eff   :  { %v2999_v21 = vpop.f32.mrb[23].mxu0 }
0x1f09   :  { %v5117_v41 = vpop.f32.mrb[24].mxu0 }
0x1f0a   :  { %v3096_v0 = vadd.f32 %v6361_v8, %v5117_v41  ;;  %v3090_v38 = vpop.f32.mrb[25].mxu0  ;;  %v4649_v41 = vld [vmem:[%s6711_s6 + $0x38] sm:$0xff] }
0x1f0b   :  { %v3091_v1 = vadd.f32 %v6355_v6, %v3090_v38 }
0x1f0c   :  { %v3102_v14 = vsel %vm339_vm5, %v3096_v0, -inf }
0x1f0d   :  { %3103 = vmax.xlane.f32.xlu0 %v3102_v14  ;;  %v3099_v13 = vsel %vm339_vm5, %v3091_v1, -inf }
0x1f0e   :  { %3100 = vmax.xlane.f32.xlu1 %v3099_v13 }
0x1f9a   :  { %v3104_v2 = vpop.xlane.xlu0 %3103 }
0x1f9b   :  { %v3106_v3 = vsub.f32 %v3096_v0, %v3104_v2  ;;  %v3101_v4 = vpop.xlane.xlu1 %3100 }
0x1f9c   :  { %v3105_v5 = vsub.f32 %v3091_v1, %v3101_v4  ;;  %v6477_v4 = vld [vmem:[%s6712_s12 + $0x4] sm:$0x7] }
0x1f9d   :  { %v3109_v7 = vmul.f32 1.442695, %v3106_v3 }
0x1f9e   :  { %v3107_v9 = vmul.f32 1.442695, %v3105_v5  ;;  %v6482_v5 = vld [vmem:[%s6713_s13 + $0x4] sm:$0x7] }
0x1f9f   :  { %5736 = vpow2.f32 %v3109_v7  ;;  %v3269_v7 = vrot.slane %v6477_v4, %v6090_v18 }
0x1fa0   :  { %5738 = vpow2.f32 %v3107_v9 }
0x1fa9   :  { %v5737_v10 = vpop.eup %5736 }
0x1faa   :  { %v5739_v11 = vpop.eup %5738  ;;  %v3114_v12 = vsel %vm339_vm5, %v5737_v10, 0.0 }
0x1fab   :  { %3115 = vadd.xlane.f32.xlu1 %v3114_v12  ;;  %v3111_v16 = vsel %vm339_vm5, %v5739_v11, 0.0 }
0x1fac   :  { %3112 = vadd.xlane.f32.xlu0 %v3111_v16 }
0x1fbc   :  { %3210 = vrot.lane.b32.xlu1 %v6406_v40, %s6770_s29 }
0x1fc0   :  { %3212 = vrot.lane.b32.xlu1 %v6404_v57, %s6770_s29 }
0x1fc2   :  { %5592 = vrot.lane.b32.xlu0 %v6336_v63, %s6771_s19 }
0x1fc4   :  { %3220 = vrot.lane.b32.xlu1 %v5110_v19, %s6772_s20 }
0x1fc6   :  { %3218 = vrot.lane.b32.xlu0 %v2999_v21, %s6772_s20  ;;  %v4648_v21 = vld [vmem:[%s6711_s6 + $0x30] sm:$0xff] }
0x1fc7   :  { %v5394_v0 = vpack.c.bf16 %v4649_v41, %v4648_v21 }
0x2038   :  { %v3116_v17 = vpop.xlane.xlu1 %3115 }
0x2039   :  { %5740 = vrcp.f32 %v3116_v17  ;;  %v3113_v22 = vpop.xlane.xlu0 %3112 }
0x203a   :  { %5742 = vrcp.f32 %v3113_v22 }
0x203c   :  { %v3211_v30 = vpop.permute.xlu1 %3210 }
0x203d   :  { %v5593_v23 = vpop.permute.xlu0 %5592  ;;  %v3232_v36 = vsel %vm255_vm3, %v6380_v45, %v3211_v30 }
0x203e   :  { %v5595_v25 = vunpack.i.h.bf16 %v5593_v23  ;;  %v5594_v26 = vunpack.i.l.bf16 %v5593_v23 }
0x2040   :  { %v5386_v37 = vpack.c.bf16 %v5595_v25, %v5594_v26  ;;  %v3213_v20 = vpop.permute.xlu1 %3212  ;;  %v4651_v26 = vld [vmem:[%s6714_s7 + $0x1] ss:$0 sm:$0xff] }
0x2041   :  { %v3219_v31 = vpop.permute.xlu0 %3218  ;;  %v3233_v34 = vsel %vm255_vm3, %v6378_v44, %v3213_v20 }
0x2042   :  { %5387 = vmatprep.subr.bf16.mxu1 %v5386_v37  ;;  %v3234_v43 = vsel %vm339_vm5, %v3232_v36, %v3219_v31 }
0x2043   :  { %v5741_v40 = vpop.eup %5740  ;;  %5389 = vmatpush3.bf16.msra.mxu1 %v5386_v37 }
0x2044   :  { %v5743_v27 = vpop.eup %5742  ;;  %v3120_v35 = vmul.f32 %v5741_v40, %v5737_v10  ;;  %v3221_v29 = vpop.permute.xlu1 %3220 }
0x2045   :  { %v3118_v57 = vmul.f32 %v5743_v27, %v5739_v11  ;;  %v3235_v39 = vsel %vm339_vm5, %v3233_v34, %v3221_v29  ;;  %v3275_v11 = vrot.slane %v6482_v5, %v6090_v18 }
0x2047   :  { %5122 = vmatprep.mubr.msk.f32.mxu1 %vm339_vm5, %v3118_v57 }
0x2048   :  { %5123 = vmatmul.mubr.msk.f32.vlgmr.msra.gmra.mrb[32].mxu1 %vm339_vm5, %v3120_v35 }
0x211b   :  { %v5124_v63 = vpop.f32.mrb[32].mxu1 }
0x211c   :  { %3228 = vrot.lane.b32.xlu1 %v5124_v63, %s6773_s23  ;;  %v3199_v28 = vpop.f32.mrb[33].mxu1 }
0x211d   :  { %3226 = vrot.lane.b32.xlu0 %v3199_v28, %s6773_s23 }
0x218e   :  { %v3229_v42 = vpop.permute.xlu1 %3228 }
0x218f   :  { %v3237_v46 = vsel %vm1077_vm6, %v3235_v39, %v3229_v42  ;;  %v3227_v47 = vpop.permute.xlu0 %3226 }
0x2190   :  { %v3239_v48 = vadd.f32 %v3237_v46, %v6319_v61  ;;  %v3236_v49 = vsel %vm1077_vm6, %v3234_v43, %v3227_v47 }
0x2191   :  { %v3238_v51 = vadd.f32 %v3236_v49, %v6317_v60  ;;  %v4646_v60 = vld [vmem:[%s6711_s6 + $0x20] sm:$0xff] }
0x2192   :  { %v3243_v52 = vsel %vm167_vm2, %v3239_v48, 0.0  ;;  %v5390_v19 = vpack.c.bf16 %v4647_v15, %v4646_v60 }
0x2193   :  { %3244 = vadd.xlane.f32.xlu1 %v3243_v52  ;;  %v3240_v44 = vsel %vm167_vm2, %v3238_v51, 0.0 }
0x2194   :  { %3241 = vadd.xlane.f32.xlu0 %v3240_v44  ;;  %5391 = vmatprep.subr.bf16.mxu1 %v5390_v19 }
0x2195   :  { %5393 = vmatpush3.bf16.msra.mxu1 %v5390_v19 }
0x2196   :  { %5395 = vmatprep.subr.bf16.mxu1 %v5394_v0 }
0x2199   :  { %5397 = vmatpush3.bf16.msra.mxu1 %v5394_v0 }
0x2220   :  { %v3245_v45 = vpop.xlane.xlu1 %3244 }
0x2221   :  { %v3247_v53 = vmul.f32 0.03125, %v3245_v45  ;;  %v3242_v54 = vpop.xlane.xlu0 %3241 }
0x2222   :  { %v3246_v32 = vmul.f32 0.03125, %v3242_v54 }
0x2223   :  { %v3249_v58 = vsub.f32 %v3239_v48, %v3247_v53 }
0x2224   :  { %v3248_v33 = vsub.f32 %v3238_v51, %v3246_v32 }
0x2225   :  { %v3251_v61 = vmul.f32 %v3249_v58, %v3249_v58 }
0x2226   :  { %v3250_v62 = vmul.f32 %v3248_v33, %v3248_v33 }
0x2227   :  { %v3255_v59 = vsel %vm167_vm2, %v3251_v61, 0.0 }
0x2228   :  { %v3252_v56 = vsel %vm167_vm2, %v3250_v62, 0.0 }
0x2229   :  { %3253 = vadd.xlane.f32.xlu0 %v3252_v56 }
0x222d   :  { %3256 = vadd.xlane.f32.xlu0 %v3255_v59 }
0x22b6   :  { %v3254_v38 = vpop.xlane.xlu0 %3253 }
0x22b7   :  { %v3258_v1 = vmul.f32 0.03125, %v3254_v38 }
0x22b9   :  { %v3260_v14 = vadd.f32 1e-05, %v3258_v1 }
0x22ba   :  { %v3257_v13 = vpop.xlane.xlu0 %3256 }
0x22bb   :  { %5744 = vrsqrt.f32 %v3260_v14  ;;  %v3259_v2 = vmul.f32 0.03125, %v3257_v13 }
0x22bd   :  { %v3261_v3 = vadd.f32 1e-05, %v3259_v2 }
0x22bf   :  { %5746 = vrsqrt.f32 %v3261_v3 }
0x22c5   :  { %v5745_v9 = vpop.eup %5744 }
0x22c6   :  { %v3264_v10 = vmul.f32 %v5745_v9, %v3248_v33 }
0x22c8   :  { %v3270_v12 = vmul.f32 %v3269_v7, %v3264_v10 }
0x22c9   :  { %v5747_v16 = vpop.eup %5746 }
0x22ca   :  { %v3265_v17 = vmul.f32 %v5747_v16, %v3249_v58  ;;  %v6488_v22 = vadd.f32 %v3275_v11, %v3270_v12 }
0x22cc   :  { %v3271_v23 = vmul.f32 %v3269_v7, %v3265_v17  ;;  %5133 = vmatprep.mubr.msk.f32.mxu1 %vm167_vm2, %v6488_v22 }
0x22ce   :  { %v6492_v25 = vadd.f32 %v3275_v11, %v3271_v23 }
0x22d0   :  { %5134 = vmatmul.mubr.msk.f32.vlgmr.msra.gmra.mrb[34].mxu1 %vm167_vm2, %v6492_v25 }
0x23a3   :  { %v5135_v37 = vpop.f32.mrb[34].mxu1 }
0x23a4   :  { %v6499_v18 = vadd.f32 %v5135_v37, %v4651_v26  ;;  %v3363_v40 = vpop.f32.mrb[35].mxu1 }
0x23a5   :  { %v6501_v27 = vadd.f32 %v4651_v26, %v3363_v40 }
0x23a7   :  { %5140 = vmatprep.mubr.msk.f32.mxu0 %vm255_vm3, %v6501_v27  ;;  %v6507_v57 = vpack.i.bf16 %v6499_v18, %v6501_v27 }
0x23a9   :  { %5602 = vrot.lane.b32.xlu0 %v6507_v57, %s6777_s3  ;;  %5597 = vrot.lane.b32.xlu1 %v6507_v57, %s6774_s27 }
0x23ad   :  { %3570 = vrot.lane.b32.xlu1 %v6501_v27, %s6776_s5 }
0x23b1   :  { %3572 = vrot.lane.b32.xlu1 %v6499_v18, %s6776_s5 }
0x241b   :  { %v5603_v35 = vpop.permute.xlu0 %5602  ;;  %v5598_v63 = vpop.permute.xlu1 %5597 }
0x241c   :  { %v5605_v28 = vunpack.i.h.bf16 %v5603_v35  ;;  %v5604_v30 = vunpack.i.l.bf16 %v5603_v35  ;;  %v5600_v20 = vunpack.i.h.bf16 %v5598_v63  ;;  %v5599_v29 = vunpack.i.l.bf16 %v5598_v63 }
0x241e   :  { %v5398_v31 = vpack.c.bf16 %v5600_v20, %v5599_v29  ;;  %v5408_v34 = vpack.c.bf16 %v5605_v28, %v5604_v30 }
0x241f   :  { %v3571_v36 = vpop.permute.xlu1 %3570 }
0x2420   :  { %5400 = vmatprep.subr.msk.bf16.mxu0 %vm5961_vm4, %v5398_v31 }
0x2421   :  { %5403 = vmatpush3.bf16.xpose.msk.msra.mxu0 %vm5961_vm4, %v5398_v31 }
0x2422   :  { %5410 = vmatprep.subr.msk.bf16.mxu0 %vm5961_vm4, %v5408_v34 }
0x2423   :  { %v3573_v39 = vpop.permute.xlu1 %3572 }
0x2428   :  { %5141 = vmatmul.mubr.msk.f32.vlgmr.msra.gmra.mrb[26].mxu0 %vm255_vm3, %v6499_v18 }
0x2429   :  { %5413 = vmatpush3.bf16.xpose.msk.msra.mxu0 %vm5961_vm4, %v5408_v34  ;;  %5154 = vmatprep.mubr.msk.f32.mxu0 %vm255_vm3, %v3571_v36 }
0x2430   :  { %5155 = vmatmul.mubr.msk.f32.vlgmr.msra.gmra.mrb[28].mxu0 %vm255_vm3, %v3573_v39 }
0x24fb   :  { %v5142_v42 = vpop.f32.mrb[26].mxu0 }
0x24fc   :  { %v3458_v43 = vadd.f32 %v6361_v8, %v5142_v42  ;;  %v3452_v46 = vpop.f32.mrb[27].mxu0 }
0x24fd   :  { %v3453_v47 = vadd.f32 %v6355_v6, %v3452_v46 }
0x24fe   :  { %v3464_v48 = vsel %vm339_vm5, %v3458_v43, -inf }
0x24ff   :  { %3465 = vmax.xlane.f32.xlu1 %v3464_v48  ;;  %v3461_v49 = vsel %vm339_vm5, %v3453_v47, -inf }
0x2500   :  { %3462 = vmax.xlane.f32.xlu0 %v3461_v49 }
0x2503   :  { %v5156_v51 = vpop.f32.mrb[28].mxu0 }
0x2504   :  { %v3652_v52 = vpop.f32.mrb[29].mxu0  ;;  %v3658_v45 = vadd.f32 %v6361_v8, %v5156_v51 }
0x2505   :  { %v3653_v44 = vadd.f32 %v6355_v6, %v3652_v52 }
0x2506   :  { %v3664_v54 = vsel %vm339_vm5, %v3658_v45, -inf }
0x2507   :  { %v3661_v53 = vsel %vm339_vm5, %v3653_v44, -inf }
0x2508   :  { %3662 = vmax.xlane.f32.xlu0 %v3661_v53 }
0x250c   :  { %3665 = vmax.xlane.f32.xlu0 %v3664_v54 }
0x2510   :  { %5607 = vrot.lane.b32.xlu1 %v6507_v57, %s6775_s1 }
0x258c   :  { %v3466_v32 = vpop.xlane.xlu1 %3465 }
0x258d   :  { %v3468_v58 = vsub.f32 %v3458_v43, %v3466_v32  ;;  %v3463_v33 = vpop.xlane.xlu0 %3462 }
0x258e   :  { %v3467_v62 = vsub.f32 %v3453_v47, %v3463_v33 }
0x258f   :  { %v3471_v56 = vmul.f32 1.442695, %v3468_v58 }
0x2590   :  { %v3469_v61 = vmul.f32 1.442695, %v3467_v62  ;;  %v5608_v59 = vpop.permute.xlu1 %5607 }
0x2591   :  { %5748 = vpow2.f32 %v3471_v56  ;;  %v5610_v60 = vunpack.i.h.bf16 %v5608_v59  ;;  %v5609_v15 = vunpack.i.l.bf16 %v5608_v59 }
0x2592   :  { %5750 = vpow2.f32 %v3469_v61 }
0x2593   :  { %v5404_v19 = vpack.c.bf16 %v5610_v60, %v5609_v15 }
0x2595   :  { %5405 = vmatprep.subr.bf16.mxu1 %v5404_v19  ;;  %v3663_v21 = vpop.xlane.xlu0 %3662 }
0x2596   :  { %5407 = vmatpush3.bf16.msra.mxu1 %v5404_v19  ;;  %v3667_v9 = vsub.f32 %v3653_v44, %v3663_v21 }
0x2598   :  { %v3669_v10 = vmul.f32 1.442695, %v3667_v9 }
0x2599   :  { %v3666_v41 = vpop.xlane.xlu0 %3665 }
0x259a   :  { %v3668_v0 = vsub.f32 %v3658_v45, %v3666_v41 }
0x259b   :  { %v5749_v38 = vpop.eup %5748 }
0x259c   :  { %v5751_v1 = vpop.eup %5750  ;;  %v3671_v14 = vmul.f32 1.442695, %v3668_v0  ;;  %v3476_v13 = vsel %vm339_vm5, %v5749_v38, 0.0 }
0x259d   :  { %3477 = vadd.xlane.f32.xlu0 %v3476_v13  ;;  %v3473_v2 = vsel %vm339_vm5, %v5751_v1, 0.0 }
0x259e   :  { %5752 = vpow2.f32 %v3671_v14  ;;  %3474 = vadd.xlane.f32.xlu1 %v3473_v2 }
0x259f   :  { %5754 = vpow2.f32 %v3669_v10 }
0x25a8   :  { %v5753_v3 = vpop.eup %5752 }
0x25a9   :  { %v3676_v7 = vsel %vm339_vm5, %v5753_v3, 0.0  ;;  %v5755_v11 = vpop.eup %5754 }
0x25aa   :  { %3677 = vadd.xlane.f32.xlu0 %v3676_v7  ;;  %v3673_v12 = vsel %vm339_vm5, %v5755_v11, 0.0 }
0x25af   :  { %5617 = vrot.lane.b32.xlu1 %v6507_v57, %s6778_s30 }
0x25c0   :  { %5612 = vrot.lane.b32.xlu0 %v6507_v57, %s6779_s2 }
0x25c4   :  { %3772 = vrot.lane.b32.xlu0 %v6499_v18, %s6780_s22 }
0x25d3   :  { %3674 = vadd.xlane.f32.xlu1 %v3673_v12 }
0x25e4   :  { %3770 = vrot.lane.b32.xlu1 %v6501_v27, %s6780_s22 }
0x262a   :  { %v3478_v16 = vpop.xlane.xlu0 %3477 }
0x262b   :  { %5756 = vrcp.f32 %v3478_v16  ;;  %v3475_v17 = vpop.xlane.xlu1 %3474 }
0x262c   :  { %5758 = vrcp.f32 %v3475_v17 }
0x262f   :  { %v5618_v63 = vpop.permute.xlu1 %5617 }
0x2630   :  { %v5620_v30 = vunpack.i.h.bf16 %v5618_v63  ;;  %v5619_v20 = vunpack.i.l.bf16 %v5618_v63 }
0x2632   :  { %v5418_v36 = vpack.c.bf16 %v5620_v30, %v5619_v20 }
0x2635   :  { %v5757_v23 = vpop.eup %5756 }
0x2636   :  { %v5759_v26 = vpop.eup %5758  ;;  %v3482_v35 = vmul.f32 %v5757_v23, %v5749_v38 }
0x2637   :  { %v3678_v37 = vpop.xlane.xlu0 %3677  ;;  %v3480_v40 = vmul.f32 %v5759_v26, %v5751_v1 }
0x2638   :  { %5760 = vrcp.f32 %v3678_v37 }
0x2639   :  { %5147 = vmatprep.mubr.msk.f32.mxu1 %vm339_vm5, %v3480_v40 }
0x263a   :  { %5148 = vmatmul.mubr.msk.f32.vlgmr.msra.gmra.mrb[36].mxu1 %vm339_vm5, %v3482_v35 }
0x263b   :  { %v5613_v28 = vpop.permute.xlu0 %5612 }
0x263c   :  { %v5615_v29 = vunpack.i.h.bf16 %v5613_v28  ;;  %v5614_v31 = vunpack.i.l.bf16 %v5613_v28 }
0x263e   :  { %v5414_v34 = vpack.c.bf16 %v5615_v29, %v5614_v31 }
0x263f   :  { %v3773_v49 = vpop.permute.xlu0 %3772 }
0x2640   :  { %5415 = vmatprep.subr.bf16.mxu1 %v5414_v34 }
0x2641   :  { %5417 = vmatpush3.bf16.msra.mxu1 %v5414_v34 }
0x2642   :  { %5420 = vmatprep.subr.msk.bf16.mxu1 %vm5961_vm4, %v5418_v36  ;;  %v5761_v42 = vpop.eup %5760 }
0x2643   :  { %v3682_v47 = vmul.f32 %v5761_v42, %v5753_v3 }
0x2660   :  { %v3675_v39 = vpop.xlane.xlu1 %3674 }
0x2661   :  { %5762 = vrcp.f32 %v3675_v39 }
0x2664   :  { %v3771_v48 = vpop.permute.xlu1 %3770 }
0x266b   :  { %v5763_v43 = vpop.eup %5762 }
0x266c   :  { %v3680_v46 = vmul.f32 %v5763_v43, %v5755_v11 }
0x266e   :  { %5161 = vmatprep.mubr.msk.f32.mxu1 %vm339_vm5, %v3680_v46 }
0x266f   :  { %5162 = vmatmul.mubr.msk.f32.vlgmr.msra.gmra.mrb[38].mxu1 %vm339_vm5, %v3682_v47 }
0x2670   :  { %5423 = vmatpush3.bf16.xpose.msk.msra.mxu1 %vm5961_vm4, %v5418_v36  ;;  %5168 = vmatprep.mubr.msk.f32.mxu1 %vm255_vm3, %v3771_v48 }
0x2677   :  { %5169 = vmatmul.mubr.msk.f32.vlgmr.msra.gmra.mrb[40].mxu1 %vm255_vm3, %v3773_v49 }
0x270d   :  { %v6561_v51 = vpop.f32.mrb[36].mxu1 }
0x270e   :  { %v6563_v52 = vpop.f32.mrb[37].mxu1 }
0x2742   :  { %v6565_v44 = vpop.f32.mrb[38].mxu1 }
0x2743   :  { %v6567_v45 = vpop.f32.mrb[39].mxu1 }
0x274a   :  { %v5170_v53 = vpop.f32.mrb[40].mxu1 }
0x274b   :  { %v3858_v54 = vadd.f32 %v6361_v8, %v5170_v53  ;;  %v3852_v32 = vpop.f32.mrb[41].mxu1 }
0x274c   :  { %v3853_v58 = vadd.f32 %v6355_v6, %v3852_v32 }
0x274d   :  { %v3864_v33 = vsel %vm339_vm5, %v3858_v54, -inf }
0x274e   :  { %3865 = vmax.xlane.f32.xlu0 %v3864_v33  ;;  %v3861_v62 = vsel %vm339_vm5, %v3853_v58, -inf }
0x274f   :  { %3862 = vmax.xlane.f32.xlu1 %v3861_v62 }
0x27db   :  { %v3866_v56 = vpop.xlane.xlu0 %3865 }
0x27dc   :  { %v3868_v61 = vsub.f32 %v3858_v54, %v3866_v56  ;;  %v3863_v59 = vpop.xlane.xlu1 %3862 }
0x27dd   :  { %v3867_v60 = vsub.f32 %v3853_v58, %v3863_v59 }
0x27de   :  { %v3871_v15 = vmul.f32 1.442695, %v3868_v61 }
0x27df   :  { %v3869_v19 = vmul.f32 1.442695, %v3867_v60 }
0x27e0   :  { %5764 = vpow2.f32 %v3871_v15 }
0x27e1   :  { %5766 = vpow2.f32 %v3869_v19 }
0x27ea   :  { %v5765_v21 = vpop.eup %5764 }
0x27eb   :  { %v5767_v41 = vpop.eup %5766  ;;  %v3876_v0 = vsel %vm339_vm5, %v5765_v21, 0.0 }
0x27ec   :  { %3877 = vadd.xlane.f32.xlu1 %v3876_v0  ;;  %v3873_v38 = vsel %vm339_vm5, %v5767_v41, 0.0 }
0x27ed   :  { %3874 = vadd.xlane.f32.xlu0 %v3873_v38 }
0x27fd   :  { %5627 = vrot.lane.b32.xlu1 %v6507_v57, %s6767_s25 }
0x2801   :  { %3970 = vrot.lane.b32.xlu1 %v6501_v27, %s6768_s26 }
0x2803   :  { %5622 = vrot.lane.b32.xlu0 %v6507_v57, %s6769_s0 }
0x2807   :  { %3972 = vrot.lane.b32.xlu0 %v6499_v18, %s6768_s26  ;;  %s6782_s26 = sld [smem:[#allocation7_spill]] }
0x2879   :  { %v3878_v1 = vpop.xlane.xlu1 %3877 }
0x287a   :  { %5768 = vrcp.f32 %v3878_v1  ;;  %v3875_v14 = vpop.xlane.xlu0 %3874 }
0x287b   :  { %5770 = vrcp.f32 %v3875_v14 }
0x287d   :  { %v5628_v13 = vpop.permute.xlu1 %5627 }
0x287e   :  { %v5623_v2 = vpop.permute.xlu0 %5622  ;;  %v5630_v3 = vunpack.i.h.bf16 %v5628_v13  ;;  %v5629_v7 = vunpack.i.l.bf16 %v5628_v13 }
0x287f   :  { %v5625_v9 = vunpack.i.h.bf16 %v5623_v2  ;;  %v5624_v10 = vunpack.i.l.bf16 %v5623_v2 }
0x2880   :  { %v5428_v12 = vpack.c.bf16 %v5630_v3, %v5629_v7 }
0x2881   :  { %v5424_v11 = vpack.c.bf16 %v5625_v9, %v5624_v10  ;;  %v3971_v23 = vpop.permute.xlu1 %3970 }
0x2882   :  { %v3973_v26 = vpop.permute.xlu0 %3972 }
0x2883   :  { %5425 = vmatprep.subr.bf16.mxu0 %v5424_v11 }
0x2884   :  { %v5769_v27 = vpop.eup %5768  ;;  %5427 = vmatpush3.bf16.msra.mxu0 %v5424_v11 }
0x2885   :  { %v5771_v16 = vpop.eup %5770  ;;  %5430 = vmatprep.subr.msk.bf16.mxu0 %vm5961_vm4, %v5428_v12  ;;  %v3882_v17 = vmul.f32 %v5769_v27, %v5765_v21 }
0x2886   :  { %v3880_v18 = vmul.f32 %v5771_v16, %v5767_v41 }
0x2888   :  { %5175 = vmatprep.mubr.msk.f32.mxu0 %vm339_vm5, %v3880_v18 }
0x2889   :  { %5176 = vmatmul.mubr.msk.f32.vlgmr.msra.gmra.mrb[30].mxu0 %vm339_vm5, %v3882_v17  ;;  %v4679_v17 = vld [vmem:[%s6715_s8 + $0x28] sm:$0xff] }
0x288a   :  { %5182 = vmatprep.mubr.msk.f32.mxu0 %vm255_vm3, %v3971_v23 }
0x288d   :  { %5433 = vmatpush3.bf16.xpose.msk.msra.mxu0 %vm5961_vm4, %v5428_v12 }
0x2894   :  { %5183 = vmatmul.mubr.msk.f32.vlgmr.msra.gmra.mrb[32].mxu0 %vm255_vm3, %v3973_v26  ;;  %v4680_v26 = vld [vmem:[%s6715_s8 + $0x30] sm:$0xff] }
0x295c   :  { %v5177_v37 = vpop.f32.mrb[30].mxu0 }
0x295d   :  { %v3961_v40 = vpop.f32.mrb[31].mxu0 }
0x2967   :  { %v5184_v35 = vpop.f32.mrb[32].mxu0 }
0x2968   :  { %v4058_v63 = vadd.f32 %v6361_v8, %v5184_v35  ;;  %v4052_v28 = vpop.f32.mrb[33].mxu0  ;;  %v4686_v35 = vld [vmem:[%s6716_s10 + $0x40] sm:$0xff] }
0x2969   :  { %v4053_v30 = vadd.f32 %v6355_v6, %v4052_v28  ;;  %v4688_v28 = vld [vmem:[%s6716_s10 + $0x50] sm:$0xff] }
0x296a   :  { %v4064_v20 = vsel %vm339_vm5, %v4058_v63, -inf }
0x296b   :  { %4065 = vmax.xlane.f32.xlu0 %v4064_v20  ;;  %v4061_v29 = vsel %vm339_vm5, %v4053_v30, -inf  ;;  %v4689_v20 = vld [vmem:[%s6716_s10 + $0x58] sm:$0xff] }
0x296c   :  { %4062 = vmax.xlane.f32.xlu1 %v4061_v29  ;;  %v5450_v29 = vpack.c.bf16 %v4689_v20, %v4688_v28 }
0x29f8   :  { %v4066_v31 = vpop.xlane.xlu0 %4065 }
0x29f9   :  { %v4068_v24 = vsub.f32 %v4058_v63, %v4066_v31  ;;  %v4063_v34 = vpop.xlane.xlu1 %4062  ;;  %v4687_v63 = vld [vmem:[%s6716_s10 + $0x48] sm:$0xff]  ;;  %v4690_v31 = vld [vmem:[%s6716_s10 + $0x60] sm:$0xff] }
0x29fa   :  { %v4067_v36 = vsub.f32 %v4053_v30, %v4063_v34  ;;  %v5446_v30 = vpack.c.bf16 %v4687_v63, %v4686_v35 }
0x29fb   :  { %v4071_v39 = vmul.f32 1.442695, %v4068_v24  ;;  %v4691_v24 = vld [vmem:[%s6716_s10 + $0x68] sm:$0xff] }
0x29fc   :  { %v4069_v42 = vmul.f32 1.442695, %v4067_v36  ;;  %5447 = vmatprep.subr.bf16.mxu0 %v5446_v30  ;;  %v5454_v34 = vpack.c.bf16 %v4691_v24, %v4690_v31 }
0x29fd   :  { %5772 = vpow2.f32 %v4071_v39  ;;  %5449 = vmatpush3.bf16.msra.mxu0 %v5446_v30  ;;  %v4471_v30 = vrot.slane %v6482_v5, %v6311_v50 }
0x29fe   :  { %5774 = vpow2.f32 %v4069_v42  ;;  %5451 = vmatprep.subr.bf16.mxu0 %v5450_v29 }
0x2a01   :  { %5453 = vmatpush3.bf16.msra.mxu0 %v5450_v29 }
0x2a02   :  { %5455 = vmatprep.subr.bf16.mxu0 %v5454_v34 }
0x2a05   :  { %5457 = vmatpush3.bf16.msra.mxu0 %v5454_v34 }
0x2a07   :  { %v5773_v43 = vpop.eup %5772 }
0x2a08   :  { %v5775_v46 = vpop.eup %5774  ;;  %v4076_v8 = vsel %vm339_vm5, %v5773_v43, 0.0 }
0x2a09   :  { %4077 = vadd.xlane.f32.xlu1 %v4076_v8  ;;  %v4073_v6 = vsel %vm339_vm5, %v5775_v46, 0.0 }
0x2a0a   :  { %4074 = vadd.xlane.f32.xlu0 %v4073_v6  ;;  %v4231_v6 = vrot.slane %v6477_v4, %v6272_v55 }
0x2a1a   :  { %4172 = vrot.lane.b32.xlu1 %v6567_v45, %s6770_s29 }
0x2a1e   :  { %4174 = vrot.lane.b32.xlu1 %v6565_v44, %s6770_s29  ;;  %s6783_s29 = sld [smem:[#allocation8_spill]] }
0x2a20   :  { %5632 = vrot.lane.b32.xlu0 %v6507_v57, %s6771_s19 }
0x2a22   :  { %4182 = vrot.lane.b32.xlu1 %v5177_v37, %s6772_s20  ;;  %v4681_v37 = vld [vmem:[%s6715_s8 + $0x38] sm:$0xff] }
0x2a24   :  { %4180 = vrot.lane.b32.xlu0 %v3961_v40, %s6772_s20  ;;  %v5442_v40 = vpack.c.bf16 %v4681_v37, %v4680_v26 }
0x2a96   :  { %v4078_v47 = vpop.xlane.xlu1 %4077 }
0x2a97   :  { %5776 = vrcp.f32 %v4078_v47  ;;  %v4075_v48 = vpop.xlane.xlu0 %4074 }
0x2a98   :  { %5778 = vrcp.f32 %v4075_v48 }
0x2a9a   :  { %v4173_v56 = vpop.permute.xlu1 %4172 }
0x2a9b   :  { %v5633_v49 = vpop.permute.xlu0 %5632  ;;  %v4194_v19 = vsel %vm255_vm3, %v6563_v52, %v4173_v56 }
0x2a9c   :  { %v5635_v53 = vunpack.i.h.bf16 %v5633_v49  ;;  %v5634_v54 = vunpack.i.l.bf16 %v5633_v49  ;;  %v4237_v49 = vrot.slane %v6482_v5, %v6272_v55  ;;  %v4683_v55 = vld [vmem:[%s6717_s9 + $0x1] ss:$0 sm:$0xff] }
0x2a9e   :  { %v5434_v32 = vpack.c.bf16 %v5635_v53, %v5634_v54  ;;  %v4175_v61 = vpop.permute.xlu1 %4174 }
0x2a9f   :  { %v4181_v60 = vpop.permute.xlu0 %4180  ;;  %v4195_v15 = vsel %vm255_vm3, %v6561_v51, %v4175_v61 }
0x2aa0   :  { %5435 = vmatprep.subr.bf16.mxu1 %v5434_v32  ;;  %v4196_v0 = vsel %vm339_vm5, %v4194_v19, %v4181_v60 }
0x2aa1   :  { %v5777_v45 = vpop.eup %5776  ;;  %5437 = vmatpush3.bf16.msra.mxu1 %v5434_v32 }
0x2aa2   :  { %v5779_v58 = vpop.eup %5778  ;;  %v4082_v33 = vmul.f32 %v5777_v45, %v5773_v43  ;;  %v4183_v59 = vpop.permute.xlu1 %4182 }
0x2aa3   :  { %v4080_v44 = vmul.f32 %v5779_v58, %v5775_v46  ;;  %v4197_v21 = vsel %vm339_vm5, %v4195_v15, %v4183_v59 }
0x2aa5   :  { %5189 = vmatprep.mubr.msk.f32.mxu1 %vm339_vm5, %v4080_v44 }
0x2aa6   :  { %5190 = vmatmul.mubr.msk.f32.vlgmr.msra.gmra.mrb[42].mxu1 %vm339_vm5, %v4082_v33  ;;  %v4692_v33 = vld [vmem:[%s6716_s10 + $0x70] sm:$0xff] }
0x2b79   :  { %v5191_v57 = vpop.f32.mrb[42].mxu1 }
0x2b7a   :  { %4190 = vrot.lane.b32.xlu1 %v5191_v57, %s6773_s23  ;;  %v4161_v62 = vpop.f32.mrb[43].mxu1  ;;  %v4693_v57 = vld [vmem:[%s6716_s10 + $0x78] sm:$0xff] }
0x2b7b   :  { %4188 = vrot.lane.b32.xlu0 %v4161_v62, %s6773_s23  ;;  %v5458_v62 = vpack.c.bf16 %v4693_v57, %v4692_v33  ;;  %v4698_v57 = vld [vmem:[%s6781_s14] ss:$0 sm:$0xff]  ;;  %s6784_s23 = sld [smem:[#allocation9_spill]] }
0x2b7d   :  { %5459 = vmatprep.subr.bf16.mxu0 %v5458_v62 }
0x2b7e   :  { %5461 = vmatpush3.bf16.msra.mxu0 %v5458_v62 }
0x2bec   :  { %v4191_v41 = vpop.permute.xlu1 %4190 }
0x2bed   :  { %v4199_v38 = vsel %vm1077_vm6, %v4197_v21, %v4191_v41  ;;  %v4189_v1 = vpop.permute.xlu0 %4188  ;;  %v4695_v21 = vld [vmem:[%s6718_s11 + $0x1] ss:$0 sm:$0xff] }
0x2bee   :  { %v4201_v14 = vadd.f32 %v4199_v38, %v6492_v25  ;;  %v4198_v13 = vsel %vm1077_vm6, %v4196_v0, %v4189_v1 }
0x2bef   :  { %v4200_v2 = vadd.f32 %v4198_v13, %v6488_v22  ;;  %v4678_v22 = vld [vmem:[%s6715_s8 + $0x20] sm:$0xff] }
0x2bf0   :  { %v4205_v3 = vsel %vm167_vm2, %v4201_v14, 0.0  ;;  %v5438_v23 = vpack.c.bf16 %v4679_v17, %v4678_v22 }
0x2bf1   :  { %4206 = vadd.xlane.f32.xlu1 %v4205_v3  ;;  %v4202_v51 = vsel %vm167_vm2, %v4200_v2, 0.0 }
0x2bf2   :  { %4203 = vadd.xlane.f32.xlu0 %v4202_v51  ;;  %5439 = vmatprep.subr.bf16.mxu1 %v5438_v23 }
0x2bf3   :  { %5441 = vmatpush3.bf16.msra.mxu1 %v5438_v23 }
0x2bf4   :  { %5443 = vmatprep.subr.bf16.mxu1 %v5442_v40 }
0x2bf7   :  { %5445 = vmatpush3.bf16.msra.mxu1 %v5442_v40  ;;  %v4465_v40 = vrot.slane %v6477_v4, %v6311_v50 }
0x2c7e   :  { %v4207_v52 = vpop.xlane.xlu1 %4206 }
0x2c7f   :  { %v4209_v7 = vmul.f32 0.03125, %v4207_v52  ;;  %v4204_v9 = vpop.xlane.xlu0 %4203 }
0x2c80   :  { %v4208_v10 = vmul.f32 0.03125, %v4204_v9 }
0x2c81   :  { %v4211_v11 = vsub.f32 %v4201_v14, %v4209_v7 }
0x2c82   :  { %v4210_v12 = vsub.f32 %v4200_v2, %v4208_v10 }
0x2c83   :  { %v4213_v25 = vmul.f32 %v4211_v11, %v4211_v11 }
0x2c84   :  { %v4212_v27 = vmul.f32 %v4210_v12, %v4210_v12 }
0x2c85   :  { %v4217_v18 = vsel %vm167_vm2, %v4213_v25, 0.0 }
0x2c86   :  { %v4214_v16 = vsel %vm167_vm2, %v4212_v27, 0.0 }
0x2c87   :  { %4215 = vadd.xlane.f32.xlu0 %v4214_v16 }
0x2c8b   :  { %4218 = vadd.xlane.f32.xlu0 %v4217_v18 }
0x2d14   :  { %v4216_v36 = vpop.xlane.xlu0 %4215 }
0x2d15   :  { %v4220_v39 = vmul.f32 0.03125, %v4216_v36 }
0x2d17   :  { %v4222_v42 = vadd.f32 1e-05, %v4220_v39 }
0x2d18   :  { %v4219_v43 = vpop.xlane.xlu0 %4218 }
0x2d19   :  { %5780 = vrsqrt.f32 %v4222_v42  ;;  %v4221_v46 = vmul.f32 0.03125, %v4219_v43 }
0x2d1b   :  { %v4223_v8 = vadd.f32 1e-05, %v4221_v46 }
0x2d1d   :  { %5782 = vrsqrt.f32 %v4223_v8 }
0x2d23   :  { %v5781_v47 = vpop.eup %5780 }
0x2d24   :  { %v4226_v48 = vmul.f32 %v5781_v47, %v4210_v12 }
0x2d26   :  { %v4232_v53 = vmul.f32 %v4231_v6, %v4226_v48 }
0x2d27   :  { %v5783_v54 = vpop.eup %5782 }
0x2d28   :  { %v4227_v32 = vmul.f32 %v5783_v54, %v4211_v11  ;;  %v4238_v45 = vadd.f32 %v4237_v49, %v4232_v53 }
0x2d2a   :  { %v4233_v58 = vmul.f32 %v4231_v6, %v4227_v32  ;;  %5200 = vmatprep.mubr.msk.f32.mxu1 %vm167_vm2, %v4238_v45 }
0x2d2c   :  { %v4239_v44 = vadd.f32 %v4237_v49, %v4233_v58  ;;  %v23_v49 = vstv %s6719_s17 }
0x2d2d   :  { %24 = vst [vmem:[#allocation2] sm:$0x1] %v23_v49 }
0x2d2e   :  { %5201 = vmatmul.mubr.msk.f32.vlgmr.msra.gmra.mrb[44].mxu1 %vm167_vm2, %v4239_v44 }
0x2e01   :  { %v5202_v56 = vpop.f32.mrb[44].mxu1 }
0x2e02   :  { %v4331_v61 = vadd.f32 %v5202_v56, %v4683_v55  ;;  %v4325_v59 = vpop.f32.mrb[45].mxu1  ;;  %v4699_v56 = vld [vmem:[%s6782_s26] ss:$0 sm:$0xff] }
0x2e03   :  { %v4326_v60 = vadd.f32 %v4683_v55, %v4325_v59 }
0x2e04   :  { %v4335_v19 = vmax.f32 %v4331_v61, 0.0 }
0x2e05   :  { %v4334_v15 = vmax.f32 %v4326_v60, 0.0  ;;  %v4700_v60 = vld [vmem:[%s6783_s29] ss:$0 sm:$0xff] }
0x2e07   :  { %5219 = vmatprep.mubr.msk.f32.mxu0 %vm2190_vm7, %v4334_v15 }
0x2e08   :  { %5220 = vmatmul.mubr.msk.f32.vlgmr.msra.gmra.mrb[34].mxu0 %vm2190_vm7, %v4335_v19 }
0x2edb   :  { %v5221_v41 = vpop.f32.mrb[34].mxu0 }
0x2edc   :  { %v4431_v0 = vadd.f32 %v5221_v41, %v4695_v21  ;;  %v4425_v38 = vpop.f32.mrb[35].mxu0 }
0x2edd   :  { %v4426_v1 = vadd.f32 %v4695_v21, %v4425_v38 }
0x2ede   :  { %v4435_v14 = vadd.f32 %v4431_v0, %v4239_v44 }
0x2edf   :  { %v4434_v13 = vadd.f32 %v4426_v1, %v4238_v45 }
0x2ee0   :  { %v4439_v2 = vsel %vm167_vm2, %v4435_v14, 0.0 }
0x2ee1   :  { %4440 = vadd.xlane.f32.xlu0 %v4439_v2  ;;  %v4436_v3 = vsel %vm167_vm2, %v4434_v13, 0.0 }
0x2ee2   :  { %4437 = vadd.xlane.f32.xlu1 %v4436_v3 }
0x2f6e   :  { %v4441_v51 = vpop.xlane.xlu0 %4440 }
0x2f6f   :  { %v4443_v52 = vmul.f32 0.03125, %v4441_v51  ;;  %v4438_v7 = vpop.xlane.xlu1 %4437 }
0x2f70   :  { %v4442_v9 = vmul.f32 0.03125, %v4438_v7 }
0x2f71   :  { %v4445_v10 = vsub.f32 %v4435_v14, %v4443_v52  ;;  %v4701_v14 = vld [vmem:[#allocation2] ss:$0 sm:$0xff] }
0x2f72   :  { %v4444_v11 = vsub.f32 %v4434_v13, %v4442_v9 }
0x2f73   :  { %v4447_v12 = vmul.f32 %v4445_v10, %v4445_v10 }
0x2f74   :  { %v4446_v27 = vmul.f32 %v4444_v11, %v4444_v11 }
0x2f75   :  { %v4451_v16 = vsel %vm167_vm2, %v4447_v12, 0.0 }
0x2f76   :  { %4452 = vadd.xlane.f32.xlu0 %v4451_v16  ;;  %v4448_v25 = vsel %vm167_vm2, %v4446_v27, 0.0 }
0x2f77   :  { %4449 = vadd.xlane.f32.xlu1 %v4448_v25 }
0x3003   :  { %v4453_v18 = vpop.xlane.xlu0 %4452 }
0x3004   :  { %v4455_v22 = vmul.f32 0.03125, %v4453_v18  ;;  %v4450_v17 = vpop.xlane.xlu1 %4449 }
0x3005   :  { %v4454_v23 = vmul.f32 0.03125, %v4450_v17 }
0x3006   :  { %v4457_v26 = vadd.f32 1e-05, %v4455_v22 }
0x3007   :  { %v4456_v37 = vadd.f32 1e-05, %v4454_v23 }
0x3008   :  { %5784 = vrsqrt.f32 %v4457_v26 }
0x3009   :  { %5786 = vrsqrt.f32 %v4456_v37 }
0x3012   :  { %v5785_v35 = vpop.eup %5784 }
0x3013   :  { %v5787_v63 = vpop.eup %5786  ;;  %v4461_v28 = vmul.f32 %v5785_v35, %v4445_v10 }
0x3014   :  { %v4460_v20 = vmul.f32 %v5787_v63, %v4444_v11 }
0x3015   :  { %v4467_v29 = vmul.f32 %v4465_v40, %v4461_v28 }
0x3016   :  { %v4466_v31 = vmul.f32 %v4465_v40, %v4460_v20 }
0x3017   :  { %v4473_v24 = vadd.f32 %v4471_v30, %v4467_v29 }
0x3018   :  { %v4472_v34 = vadd.f32 %v4471_v30, %v4466_v31 }
0x3019   :  { %v4479_v36 = vsel %vm167_vm2, %v4473_v24, 0.0 }
0x301a   :  { %4480 = vadd.xlane.f32.xlu0 %v4479_v36  ;;  %v4476_v39 = vsel %vm167_vm2, %v4472_v34, 0.0 }
0x301b   :  { %4477 = vadd.xlane.f32.xlu1 %v4476_v39 }
0x30a7   :  { %v4481_v42 = vpop.xlane.xlu0 %4480 }
0x30a8   :  { %v4483_v43 = vmul.f32 0.03125, %v4481_v42  ;;  %v4478_v4 = vpop.xlane.xlu1 %4477 }
0x30a9   :  { %v4482_v46 = vmul.f32 0.03125, %v4478_v4 }
0x30aa   :  { %v4485_v8 = vsub.f32 %v4473_v24, %v4483_v43 }
0x30ab   :  { %v4484_v6 = vsub.f32 %v4472_v34, %v4482_v46 }
0x30ac   :  { %v4487_v47 = vmul.f32 %v4485_v8, %v4485_v8 }
0x30ad   :  { %v4486_v48 = vmul.f32 %v4484_v6, %v4484_v6 }
0x30ae   :  { %v4491_v50 = vsel %vm167_vm2, %v4487_v47, 0.0 }
0x30af   :  { %4492 = vadd.xlane.f32.xlu0 %v4491_v50  ;;  %v4488_v5 = vsel %vm167_vm2, %v4486_v48, 0.0 }
0x30b0   :  { %4489 = vadd.xlane.f32.xlu1 %v4488_v5 }
0x313c   :  { %v4493_v53 = vpop.xlane.xlu0 %4492 }
0x313d   :  { %v4495_v54 = vmul.f32 0.03125, %v4493_v53  ;;  %v4490_v32 = vpop.xlane.xlu1 %4489 }
0x313e   :  { %v4494_v45 = vmul.f32 0.03125, %v4490_v32 }
0x313f   :  { %v4497_v58 = vadd.f32 1e-05, %v4495_v54 }
0x3140   :  { %v4496_v44 = vadd.f32 1e-05, %v4494_v45 }
0x3141   :  { %5788 = vrsqrt.f32 %v4497_v58 }
0x3142   :  { %5790 = vrsqrt.f32 %v4496_v44 }
0x314b   :  { %v5789_v33 = vpop.eup %5788 }
0x314c   :  { %v5791_v62 = vpop.eup %5790  ;;  %v4501_v55 = vmul.f32 %v5789_v33, %v4485_v8 }
0x314d   :  { %v4500_v61 = vmul.f32 %v5791_v62, %v4484_v6 }
0x314e   :  { %v4509_v59 = vmul.f32 %v4698_v57, %v4501_v55 }
0x314f   :  { %v4508_v15 = vmul.f32 %v4698_v57, %v4500_v61 }
0x3150   :  { %v4517_v19 = vadd.f32 %v4699_v56, %v4509_v59 }
0x3151   :  { %v4516_v21 = vadd.f32 %v4699_v56, %v4508_v15 }
0x3152   :  { %v4526_v41 = vmul.f32 %v4700_v60, %v4517_v19 }
0x3153   :  { %v4525_v0 = vmul.f32 %v4700_v60, %v4516_v21 }
0x3154   :  { %v4530_v38 = vsel %vm167_vm2, %v4526_v41, 0.0 }
0x3155   :  { %4531 = vadd.xlane.f32.xlu0 %v4530_v38  ;;  %v4527_v1 = vsel %vm167_vm2, %v4525_v0, 0.0 }
0x3156   :  { %4528 = vadd.xlane.f32.xlu1 %v4527_v1 }
0x31e2   :  { %v4532_v13 = vpop.xlane.xlu0 %4531 }
0x31e3   :  { %v4541_v2 = vadd.f32 %v4701_v14, %v4532_v13  ;;  %v4529_v3 = vpop.xlane.xlu1 %4528 }
0x31e4   :  { %v4540_v51 = vadd.f32 %v4701_v14, %v4529_v3 }
0x31e5   :  { %4544 = vst.msk [vmem:[%s6784_s23 + $0x8] sm:$0xff] %vm4542_vm8, %v4541_v2 }
0x31e6   :  { %4543 = vst.msk [vmem:[%s6784_s23] sm:$0xff] %vm4542_vm8, %v4540_v51 }

</bundles_post_ra>
